<compile_context>
chip_gen: v7x
topology: tpu7x:2x2x1
jax: 0.10.0
libtpu: 0.0.40
codegen_flags: <defaults>
</compile_context>

<pallas_src>
import numpy as np
import jax
import jax.numpy as jnp
from jax import lax
from jax.experimental import pallas as pl
from jax.experimental.pallas import tpu as pltpu

HIDDEN = 128          # self.hidden_size
ENC = 2 * 128         # encoding_size (bilstm output)
ENT = 16              # entity_embedding_size
EVT = 16              # event_embedding_size
ROLE = 8              # self.role_size
TMP = 64              # tmp_size
IN_SIZE = ENC + ENT + EVT + ROLE   # 296
K_PAD = 384           # feature dim zero-padded to a multiple of 128 (bias column at 296)
LEAKY_SLOPE = 0.01    # F.leaky_relu default


def _log_softmax(v):
    m = jnp.max(v, axis=1, keepdims=True)
    s = v - m
    return s - jnp.log(jnp.sum(jnp.exp(s), axis=1, keepdims=True))


def _event_eval_kernel(comp_ref,                    # (1, T, K_PAD) bf16  one event
                       wif_ref, wib_ref,            # (K_PAD, 512) bf16   gate order i,f,o,g (bias in row 296)
                       whh_ref,                     # (256, 1024) bf16    block + slot-interleaved
                       whid_ref, bhid_ref,          # (256, 128) bf16, (1, 128) f32   [head1 | head2]
                       wout_ref, bout_ref,          # (128, 128) bf16, (1, 128) f32
                       o_ref,                       # (1, 1, 8) f32       [x0,x1,_,_,m0,m1,m2,_]
                       g_scr):                      # VMEM scratch (T, 1024) f32
    T = comp_ref.shape[1]
    H = HIDDEN
    bf = jnp.bfloat16

    x = comp_ref[0]                                               # (T, K_PAD) bf16

    # ---- hoisted input projection: one dense MXU matmul per direction --------
    # Bias is folded into weight row 296 (input column 296 is 1.0).
    gin_f = jnp.dot(x, wif_ref[...], preferred_element_type=jnp.float32)   # (T, 4H) [i,f,o,g]
    gin_b = jnp.dot(x, wib_ref[...], preferred_element_type=jnp.float32)   # (T, 4H) [i,f,o,g]

    # Backward direction consumes the sequence time-reversed: reverse its rows
    # here (static slices, off the serial recurrence path) instead of shipping
    # a separate reversed input array from HBM.
    gin_b_rev = jnp.concatenate(
        [gin_b[T - 1 - t:T - t, :] for t in range(T)], axis=0)             # (T, 4H)

    # Interleave per-direction gate pre-activations into the fused slot layout
    #   [i_f, i_b, f_f, f_b, o_f, o_b, g_f, g_b]
    # so the sigmoid gates sit in lanes 0:6H and the tanh gate in 6H:8H.
    g_scr[...] = jnp.concatenate(
        [gin_f[:, 0 * H:1 * H], gin_b_rev[:, 0 * H:1 * H],
         gin_f[:, 1 * H:2 * H], gin_b_rev[:, 1 * H:2 * H],
         gin_f[:, 2 * H:3 * H], gin_b_rev[:, 2 * H:3 * H],
         gin_f[:, 3 * H:4 * H], gin_b_rev[:, 3 * H:4 * H]], axis=1)        # (T, 8H)

    whh = whh_ref[...]   # hoisted load, closed over by the loop body

    def body(t, carry):
        h, c = carry                                   # (1, 2H) each, [fwd | bwd]
        gates = (g_scr[pl.ds(t, 1), :]
                 + jnp.dot(h.astype(bf), whh,
                           preferred_element_type=jnp.float32))            # (1, 8H)
        s = jax.nn.sigmoid(gates[:, 0:6 * H])          # i,f,o for both directions (f32 EUP: portable to v5e)
        g = jnp.tanh(gates[:, 6 * H:8 * H])            # g for both directions
        i_g = s[:, 0:2 * H]
        f_g = s[:, 2 * H:4 * H]
        o_g = s[:, 4 * H:6 * H]
        c_new = f_g * c + i_g * g
        h_new = o_g * jnp.tanh(c_new)
        return h_new, c_new

    init = (jnp.zeros((1, 2 * H), jnp.float32), jnp.zeros((1, 2 * H), jnp.float32))
    unroll = True if T <= 64 else 8
    h_fin, _ = lax.fori_loop(0, T, body, init, unroll=unroll)

    # ---- heads: hidden.view(1,-1) == [h_fwd_final | h_bwd_final] == h_fin -----
    hid = (jnp.dot(h_fin.astype(bf), whid_ref[...],
                   preferred_element_type=jnp.float32) + bhid_ref[...])     # (1, 128)
    hid = jnp.where(hid > 0, hid, LEAKY_SLOPE * hid)                        # leaky_relu
    out = (jnp.dot(hid.astype(bf), wout_ref[...],
                   preferred_element_type=jnp.float32) + bout_ref[...])     # (1, 128)
    xl = _log_softmax(out[:, 0:2])                     # head 1 logits at lanes 0:2
    ml = _log_softmax(out[:, TMP:TMP + 3])             # head 2 logits at lanes 64:67
    o_ref[...] = jnp.concatenate(
        [xl, jnp.zeros((1, 2), jnp.float32), ml, jnp.zeros((1, 1), jnp.float32)],
        axis=1).reshape(1, 1, 8)


def prepare_kernel_params(p):
    """Re-layout PyTorch-convention parameters into the fused kernel layout."""
    H = HIDDEN

    def ifgo_to_ifog(w):    # last dim (4H): i,f,g,o -> i,f,o,g
        return jnp.concatenate(
            [w[..., 0:H], w[..., H:2 * H], w[..., 3 * H:4 * H], w[..., 2 * H:3 * H]], axis=-1)

    def pad_with_bias(w, b):
        # (IN_SIZE, 4H) weights padded to K_PAD rows; bias folded into row IN_SIZE
        # (the wrapper sets input column IN_SIZE to 1.0).
        out = jnp.zeros((K_PAD, 4 * H), jnp.float32)
        out = out.at[0:IN_SIZE, :].set(w)
        out = out.at[IN_SIZE, :].set(b[0])
        return out

    z = jnp.zeros((H, H), jnp.float32)

    def fwd_slots(w):       # (H, 4H) [i,f,o,g] -> (H, 8H), fwd gates in slots 0,2,4,6
        return jnp.concatenate(
            [w[:, 0:H], z, w[:, H:2 * H], z, w[:, 2 * H:3 * H], z, w[:, 3 * H:4 * H], z], axis=1)

    def bwd_slots(w):       # bwd gates in slots 1,3,5,7
        return jnp.concatenate(
            [z, w[:, 0:H], z, w[:, H:2 * H], z, w[:, 2 * H:3 * H], z, w[:, 3 * H:4 * H]], axis=1)

    kp = {
        "wif": pad_with_bias(ifgo_to_ifog(p["wih_f"]),
                             ifgo_to_ifog(p["b_f"])).astype(jnp.bfloat16),
        "wib": pad_with_bias(ifgo_to_ifog(p["wih_b"]),
                             ifgo_to_ifog(p["b_b"])).astype(jnp.bfloat16),
        "whh": jnp.concatenate([fwd_slots(ifgo_to_ifog(p["whh_f"])),
                                bwd_slots(ifgo_to_ifog(p["whh_b"]))],
                               axis=0).astype(jnp.bfloat16),                 # (256, 1024)
        "whid": jnp.concatenate([p["w1"], p["wm1"]], axis=1).astype(jnp.bfloat16),  # (256, 128)
        "bhid": jnp.concatenate([p["b1"], p["bm1"]], axis=1).astype(jnp.float32),   # (1, 128)
    }
    # Compact fused output matrix (128, 128): head1 logits at cols 0:2 fed by
    # rows 0:64, head2 logits at cols 64:67 fed by rows 64:128.
    wout = jnp.zeros((2 * TMP, 2 * TMP), jnp.float32)
    wout = wout.at[0:TMP, 0:2].set(p["w2"])
    wout = wout.at[TMP:2 * TMP, TMP:TMP + 3].set(p["wm2"])
    bout = jnp.zeros((1, 2 * TMP), jnp.float32)
    bout = bout.at[:, 0:2].set(p["b2"])
    bout = bout.at[:, TMP:TMP + 3].set(p["bm2"])
    kp["wout"] = wout.astype(jnp.bfloat16)
    kp["bout"] = bout
    return kp


def _const_spec(arr):
    """Weight BlockSpec: full array, constant block index -> DMA'd once, stays
    resident in VMEM across all events of the grid."""
    nd = arr.ndim
    return pl.BlockSpec(arr.shape, lambda e, _n=nd: (0,) * _n)


@jax.jit
def event_evaluation_forward(composites, kp):
    """composites: (E, T, 296) float32.  Returns (x_logprob (E,2), m_logprob (E,3))."""
    E, T, F = composites.shape
    # Pad features 296 -> 384; column 296 is the bias column (1.0).
    comp = jnp.concatenate(
        [composites.astype(jnp.float32),
         jnp.ones((E, T, 1), jnp.float32),
         jnp.zeros((E, T, K_PAD - F - 1), jnp.float32)], axis=2).astype(jnp.bfloat16)

    packed = pl.pallas_call(
        _event_eval_kernel,
        out_shape=jax.ShapeDtypeStruct((E, 1, 8), jnp.float32),
        grid_spec=pltpu.PrefetchScalarGridSpec(
            num_scalar_prefetch=0,
            grid=(E,),
            in_specs=[
                pl.BlockSpec((1, T, K_PAD), lambda e: (e, 0, 0)),   # streams per event
                _const_spec(kp["wif"]), _const_spec(kp["wib"]),     # resident weights
                _const_spec(kp["whh"]),
                _const_spec(kp["whid"]), _const_spec(kp["bhid"]),
                _const_spec(kp["wout"]), _const_spec(kp["bout"]),
            ],
            out_specs=pl.BlockSpec((1, 1, 8), lambda e: (e, 0, 0)),
            scratch_shapes=[pltpu.VMEM((T, 8 * HIDDEN), jnp.float32)],
        ),
        compiler_params=pltpu.CompilerParams(
            dimension_semantics=("parallel",)),   # v7x: events split across both TCs
    )(comp, kp["wif"], kp["wib"], kp["whh"], kp["whid"], kp["bhid"],
      kp["wout"], kp["bout"])

    x_logprob = packed[:, 0, 0:2]
    m_logprob = packed[:, 0, 4:7]
    return x_logprob, m_logprob


def reference_forward(composite, p):
    """Pure-JAX reference with PyTorch-layout weights (i,f,g,o gate order).

    Mirrors the kernel's numerics (bf16 matmul inputs/weights, f32 accumulation
    and elementwise, bf16-rounded LSTM input bias) but uses the standard
    un-fused LSTM equations and un-fused heads, so it independently checks the
    gate reordering / block layouts done in prepare_kernel_params."""
    H = HIDDEN
    bf = jnp.bfloat16
    f32 = jnp.float32

    def run_dir(xs, wih, whh, b):
        wih = wih.astype(bf)
        whh = whh.astype(bf)
        b = b.astype(bf).astype(f32)   # kernel folds the bias into a bf16 weight row

        def step(carry, x_t):
            h, c = carry
            gates = (jnp.dot(x_t.astype(bf), wih, preferred_element_type=f32)
                     + jnp.dot(h.astype(bf), whh, preferred_element_type=f32)
                     + b)
            i = jax.nn.sigmoid(gates[:, 0:H])
            f = jax.nn.sigmoid(gates[:, H:2 * H])
            g = jnp.tanh(gates[:, 2 * H:3 * H])
            o = jax.nn.sigmoid(gates[:, 3 * H:4 * H])
            c = f * c + i * g
            h = o * jnp.tanh(c)
            return (h, c), None

        init = (jnp.zeros((1, H), f32), jnp.zeros((1, H), f32))
        (h, _), _ = lax.scan(step, init, xs[:, None, :])
        return h

    h_f = run_dir(composite, p["wih_f"], p["whh_f"], p["b_f"])
    h_b = run_dir(composite[::-1], p["wih_b"], p["whh_b"], p["b_b"])
    hidden = jnp.concatenate([h_f, h_b], axis=1)                     # (1, 256)

    def head(w1, b1, w2, b2):
        h1 = jax.nn.leaky_relu(
            jnp.dot(hidden.astype(bf), w1.astype(bf), preferred_element_type=f32) + b1)
        lg = jnp.dot(h1.astype(bf), w2.astype(bf), preferred_element_type=f32) + b2
        return jax.nn.log_softmax(lg, axis=1)

    x = head(p["w1"], p["b1"], p["w2"], p["b2"])
    m = head(p["wm1"], p["bm1"], p["wm2"], p["bm2"])
    return x, m


def make_params(key):
    """Deterministic synthetic parameters, PyTorch conventions (i,f,g,o gates),
    linear weights stored transposed as (in, out)."""
    ks = jax.random.split(key, 16)
    s = 0.1
    p = {
        "wih_f": jax.random.normal(ks[0], (IN_SIZE, 4 * HIDDEN), jnp.float32) * s,
        "whh_f": jax.random.normal(ks[1], (HIDDEN, 4 * HIDDEN), jnp.float32) * s,
        "b_f": jax.random.normal(ks[2], (1, 4 * HIDDEN), jnp.float32) * s,   # b_ih + b_hh
        "wih_b": jax.random.normal(ks[3], (IN_SIZE, 4 * HIDDEN), jnp.float32) * s,
        "whh_b": jax.random.normal(ks[4], (HIDDEN, 4 * HIDDEN), jnp.float32) * s,
        "b_b": jax.random.normal(ks[5], (1, 4 * HIDDEN), jnp.float32) * s,
        "w1": jax.random.normal(ks[6], (2 * HIDDEN, TMP), jnp.float32) * s,
        "b1": jax.random.normal(ks[7], (1, TMP), jnp.float32) * s,
        "w2": jax.random.normal(ks[8], (TMP, 2), jnp.float32) * s,
        "b2": jax.random.normal(ks[9], (1, 2), jnp.float32) * s,
        "wm1": jax.random.normal(ks[10], (2 * HIDDEN, TMP), jnp.float32) * s,
        "bm1": jax.random.normal(ks[11], (1, TMP), jnp.float32) * s,
        "wm2": jax.random.normal(ks[12], (TMP, 3), jnp.float32) * s,
        "bm2": jax.random.normal(ks[13], (1, 3), jnp.float32) * s,
    }
    return p, ks[14], ks[15]


def build_role_ids(T, relation_index, role_types, s_r, range_list):
    """Reproduces the role_vectors construction loop (pure Python glue)."""
    ids = np.full((T,), relation_index["NONE"], dtype=np.int32)
    for i in range(s_r[0], s_r[1] + 1):
        ids[i] = role_types - 1                      # trigger role
    for rlt_type, (dst_begin, dst_end) in range_list:
        for i in range(dst_begin, dst_end + 1):
            ids[i] = relation_index[rlt_type]
    return jnp.asarray(ids)


if __name__ == "__main__":
    # Synthetic relation index (the original is unpickled from disk).
    relation_index = {"NONE": 0, "ARG0": 1, "ARG1": 2}
    role_types = len(relation_index) + 1             # 4
    T = 8                                            # sequence length
    E = 4                                            # candidate events per launch (grid axis)

    key = jax.random.PRNGKey(0)
    params, k_emb, k_in = make_params(key)

    # role embedding table (role_types, role_size)
    role_table = jax.random.normal(k_emb, (role_types, ROLE), jnp.float32) * 0.1

    # example inputs consistent with the forward signature (batch dim = 1)
    k1, k2, k3 = jax.random.split(k_in, 3)
    bilstm_output = jax.random.normal(k1, (T, 1, ENC), jnp.float32)
    event_emb = jax.random.normal(k2, (T, 1, EVT), jnp.float32)
    entity_emb = jax.random.normal(k3, (T, 1, ENT), jnp.float32)
    # hidden = initHidden() is zeros -> matches the zero-initialized carry in-kernel.

    # Several candidate events over the same sentence, differing only in the
    # trigger span / argument ranges (the part that varies per forward call).
    candidates = [
        ([2, 3], [("ARG0", (0, 1)), ("ARG1", (5, 6))]),
        ([0, 0], [("ARG1", (3, 4))]),
        ([5, 6], [("ARG0", (1, 2))]),
        ([4, 4], []),
    ]
    assert len(candidates) == E

    comps = []
    for s_r, range_list in candidates:
        # glue: role embedding gather + feature concat (dim=2 in the torch code)
        role_ids = build_role_ids(T, relation_index, role_types, s_r, range_list)
        role_emb = role_table[role_ids]                              # (T, 8)
        comps.append(jnp.concatenate(
            [bilstm_output[:, 0, :], event_emb[:, 0, :], entity_emb[:, 0, :], role_emb],
            axis=1).astype(jnp.float32))                             # (T, 296)
    composites = jnp.stack(comps, axis=0)                            # (E, T, 296)

    kparams = prepare_kernel_params(params)
    x_logprob, m_logprob = event_evaluation_forward(composites, kparams)
    jax.block_until_ready((x_logprob, m_logprob))

    # per-event correctness check against a pure-JAX reference in the original layout
    for e in range(E):
        x_ref, m_ref = reference_forward(composites[e], params)
        np.testing.assert_allclose(np.asarray(x_logprob[e:e + 1]), np.asarray(x_ref),
                                   rtol=5e-3, atol=5e-3)
        np.testing.assert_allclose(np.asarray(m_logprob[e:e + 1]), np.asarray(m_ref),
                                   rtol=5e-3, atol=5e-3)

    assert x_logprob.shape == (E, 2) and m_logprob.shape == (E, 3)
    assert bool(jnp.all(jnp.isfinite(x_logprob))) and bool(jnp.all(jnp.isfinite(m_logprob)))
    # log-softmax sanity: probs sum to ~1 per event
    assert bool(jnp.all(jnp.abs(jnp.sum(jnp.exp(x_logprob), axis=1) - 1.0) < 1e-4))
    assert bool(jnp.all(jnp.abs(jnp.sum(jnp.exp(m_logprob), axis=1) - 1.0) < 1e-4))

    print("KERNEL_OK")
</pallas_src>

<mosaic_0001>
module attributes {stable_mosaic.version = 11 : i64} {
  func.func @_event_eval_kernel(%arg0: i32, %arg1: memref<1x8x384xbf16, #tpu.memory_space<vmem>>, %arg2: memref<384x512xbf16, #tpu.memory_space<vmem>>, %arg3: memref<384x512xbf16, #tpu.memory_space<vmem>>, %arg4: memref<256x1024xbf16, #tpu.memory_space<vmem>>, %arg5: memref<256x128xbf16, #tpu.memory_space<vmem>>, %arg6: memref<1x128xf32, #tpu.memory_space<vmem>>, %arg7: memref<128x128xbf16, #tpu.memory_space<vmem>>, %arg8: memref<1x128xf32, #tpu.memory_space<vmem>>, %arg9: memref<1x1x8xf32, #tpu.memory_space<vmem>>, %arg10: memref<8x1024xf32, #tpu.memory_space<vmem>>) attributes {dimension_semantics = [#tpu.dimension_semantics<parallel>], iteration_bounds = array<i64: 4>, scalar_prefetch = 0 : i64, scratch_operands = 1 : i64, tpu.core_type = #tpu.core_type<tc>, window_params = [{transform_indices = @transform_0, window_bounds = array<i64: 1, 8, 384>}, {pipeline_mode = #tpu.pipeline_mode<synchronous>, transform_indices = @transform_1, window_bounds = array<i64: 384, 512>}, {pipeline_mode = #tpu.pipeline_mode<synchronous>, transform_indices = @transform_2, window_bounds = array<i64: 384, 512>}, {pipeline_mode = #tpu.pipeline_mode<synchronous>, transform_indices = @transform_3, window_bounds = array<i64: 256, 1024>}, {pipeline_mode = #tpu.pipeline_mode<synchronous>, transform_indices = @transform_4, window_bounds = array<i64: 256, 128>}, {pipeline_mode = #tpu.pipeline_mode<synchronous>, transform_indices = @transform_5, window_bounds = array<i64: 1, 128>}, {pipeline_mode = #tpu.pipeline_mode<synchronous>, transform_indices = @transform_6, window_bounds = array<i64: 128, 128>}, {pipeline_mode = #tpu.pipeline_mode<synchronous>, transform_indices = @transform_7, window_bounds = array<i64: 1, 128>}, {transform_indices = @transform_8, window_bounds = array<i64: 1, 1, 8>}]} {
    %c0 = arith.constant 0 : index
    %c0_0 = arith.constant 0 : index
    %c0_1 = arith.constant 0 : index
    %0 = vector.load %arg1[%c0, %c0_0, %c0_1] : memref<1x8x384xbf16, #tpu.memory_space<vmem>>, vector<1x8x384xbf16>
    %1 = vector.shape_cast %0 : vector<1x8x384xbf16> to vector<8x384xbf16>
    %c0_2 = arith.constant 0 : index
    %c0_3 = arith.constant 0 : index
    %2 = vector.load %arg2[%c0_2, %c0_3] : memref<384x512xbf16, #tpu.memory_space<vmem>>, vector<384x512xbf16>
    %cst = arith.constant dense<0.000000e+00> : vector<8x512xf32>
    %3 = tpu.matmul %1, %2, %cst {dimension_numbers = #tpu.dot_dimension_numbers<[1], [0], [0], [1], [0, 0, 1, 1], [], []>} : vector<8x384xbf16>, vector<384x512xbf16>, vector<8x512xf32> -> vector<8x512xf32>
    %c0_4 = arith.constant 0 : index
    %c0_5 = arith.constant 0 : index
    %4 = vector.load %arg3[%c0_4, %c0_5] : memref<384x512xbf16, #tpu.memory_space<vmem>>, vector<384x512xbf16>
    %cst_6 = arith.constant dense<0.000000e+00> : vector<8x512xf32>
    %5 = tpu.matmul %1, %4, %cst_6 {dimension_numbers = #tpu.dot_dimension_numbers<[1], [0], [0], [1], [0, 0, 1, 1], [], []>} : vector<8x384xbf16>, vector<384x512xbf16>, vector<8x512xf32> -> vector<8x512xf32>
    %6 = vector.extract_strided_slice %5 {offsets = [7, 0], sizes = [1, 512], strides = [1, 1]} : vector<8x512xf32> to vector<1x512xf32>
    %7 = vector.extract_strided_slice %5 {offsets = [6, 0], sizes = [1, 512], strides = [1, 1]} : vector<8x512xf32> to vector<1x512xf32>
    %8 = vector.extract_strided_slice %5 {offsets = [5, 0], sizes = [1, 512], strides = [1, 1]} : vector<8x512xf32> to vector<1x512xf32>
    %9 = vector.extract_strided_slice %5 {offsets = [4, 0], sizes = [1, 512], strides = [1, 1]} : vector<8x512xf32> to vector<1x512xf32>
    %10 = vector.extract_strided_slice %5 {offsets = [3, 0], sizes = [1, 512], strides = [1, 1]} : vector<8x512xf32> to vector<1x512xf32>
    %11 = vector.extract_strided_slice %5 {offsets = [2, 0], sizes = [1, 512], strides = [1, 1]} : vector<8x512xf32> to vector<1x512xf32>
    %12 = vector.extract_strided_slice %5 {offsets = [1, 0], sizes = [1, 512], strides = [1, 1]} : vector<8x512xf32> to vector<1x512xf32>
    %13 = vector.extract_strided_slice %5 {offsets = [0, 0], sizes = [1, 512], strides = [1, 1]} : vector<8x512xf32> to vector<1x512xf32>
    %14 = tpu.concatenate %6, %7, %8, %9, %10, %11, %12, %13 in 0 : vector<1x512xf32>, vector<1x512xf32>, vector<1x512xf32>, vector<1x512xf32>, vector<1x512xf32>, vector<1x512xf32>, vector<1x512xf32>, vector<1x512xf32> -> vector<8x512xf32>
    %15 = vector.extract_strided_slice %3 {offsets = [0, 0], sizes = [8, 128], strides = [1, 1]} : vector<8x512xf32> to vector<8x128xf32>
    %16 = vector.extract_strided_slice %14 {offsets = [0, 0], sizes = [8, 128], strides = [1, 1]} : vector<8x512xf32> to vector<8x128xf32>
    %17 = vector.extract_strided_slice %3 {offsets = [0, 128], sizes = [8, 128], strides = [1, 1]} : vector<8x512xf32> to vector<8x128xf32>
    %18 = vector.extract_strided_slice %14 {offsets = [0, 128], sizes = [8, 128], strides = [1, 1]} : vector<8x512xf32> to vector<8x128xf32>
    %19 = vector.extract_strided_slice %3 {offsets = [0, 256], sizes = [8, 128], strides = [1, 1]} : vector<8x512xf32> to vector<8x128xf32>
    %20 = vector.extract_strided_slice %14 {offsets = [0, 256], sizes = [8, 128], strides = [1, 1]} : vector<8x512xf32> to vector<8x128xf32>
    %21 = vector.extract_strided_slice %3 {offsets = [0, 384], sizes = [8, 128], strides = [1, 1]} : vector<8x512xf32> to vector<8x128xf32>
    %22 = vector.extract_strided_slice %14 {offsets = [0, 384], sizes = [8, 128], strides = [1, 1]} : vector<8x512xf32> to vector<8x128xf32>
    %23 = tpu.concatenate %15, %16, %17, %18, %19, %20, %21, %22 in 1 : vector<8x128xf32>, vector<8x128xf32>, vector<8x128xf32>, vector<8x128xf32>, vector<8x128xf32>, vector<8x128xf32>, vector<8x128xf32>, vector<8x128xf32> -> vector<8x1024xf32>
    %c0_7 = arith.constant 0 : index
    %c0_8 = arith.constant 0 : index
    %24 = vector.load %arg10[%c0_7, %c0_8] : memref<8x1024xf32, #tpu.memory_space<vmem>>, vector<8x1024xf32>
    tpu.vector_store %arg10[%c0_7, %c0_8], %23 {strides = array<i32>} : memref<8x1024xf32, #tpu.memory_space<vmem>>, vector<8x1024xf32>,
    %c0_9 = arith.constant 0 : index
    %c0_10 = arith.constant 0 : index
    %25 = vector.load %arg4[%c0_9, %c0_10] : memref<256x1024xbf16, #tpu.memory_space<vmem>>, vector<256x1024xbf16>
    %cst_11 = arith.constant 0.000000e+00 : f32
    %26 = vector.broadcast %cst_11 : f32 to vector<1x256xf32>
    %cst_12 = arith.constant 0.000000e+00 : f32
    %27 = vector.broadcast %cst_12 : f32 to vector<1x256xf32>
    %c0_i32 = arith.constant 0 : i32
    %28 = arith.index_cast %c0_i32 : i32 to index
    %c0_13 = arith.constant 0 : index
    %29 = vector.load %arg10[%28, %c0_13] : memref<8x1024xf32, #tpu.memory_space<vmem>>, vector<1x1024xf32>
    %30 = arith.truncf %26 : vector<1x256xf32> to vector<1x256xbf16>
    %cst_14 = arith.constant dense<0.000000e+00> : vector<1x1024xf32>
    %31 = tpu.matmul %30, %25, %cst_14 {dimension_numbers = #tpu.dot_dimension_numbers<[1], [0], [0], [1], [0, 0, 1, 1], [], []>} : vector<1x256xbf16>, vector<256x1024xbf16>, vector<1x1024xf32> -> vector<1x1024xf32>
    %32 = arith.addf %29, %31 : vector<1x1024xf32>
    %33 = vector.extract_strided_slice %32 {offsets = [0, 0], sizes = [1, 768], strides = [1, 1]} : vector<1x1024xf32> to vector<1x768xf32>
    %34 = arith.negf %33 : vector<1x768xf32>
    %35 = math.exp %34 : vector<1x768xf32>
    %cst_15 = arith.constant 1.000000e+00 : f32
    %36 = vector.broadcast %cst_15 : f32 to vector<1x768xf32>
    %37 = arith.addf %36, %35 : vector<1x768xf32>
    %38 = arith.divf %36, %37 : vector<1x768xf32>
    %39 = vector.extract_strided_slice %32 {offsets = [0, 768], sizes = [1, 256], strides = [1, 1]} : vector<1x1024xf32> to vector<1x256xf32>
    %40 = math.tanh %39 : vector<1x256xf32>
    %41 = vector.extract_strided_slice %38 {offsets = [0, 0], sizes = [1, 256], strides = [1, 1]} : vector<1x768xf32> to vector<1x256xf32>
    %42 = vector.extract_strided_slice %38 {offsets = [0, 256], sizes = [1, 256], strides = [1, 1]} : vector<1x768xf32> to vector<1x256xf32>
    %43 = vector.extract_strided_slice %38 {offsets = [0, 512], sizes = [1, 256], strides = [1, 1]} : vector<1x768xf32> to vector<1x256xf32>
    %44 = arith.mulf %42, %27 : vector<1x256xf32>
    %45 = arith.mulf %41, %40 : vector<1x256xf32>
    %46 = arith.addf %44, %45 : vector<1x256xf32>
    %47 = math.tanh %46 : vector<1x256xf32>
    %48 = arith.mulf %43, %47 : vector<1x256xf32>
    %c1_i32 = arith.constant 1 : i32
    %49 = arith.index_cast %c1_i32 : i32 to index
    %c0_16 = arith.constant 0 : index
    %50 = vector.load %arg10[%49, %c0_16] : memref<8x1024xf32, #tpu.memory_space<vmem>>, vector<1x1024xf32>
    %51 = arith.truncf %48 : vector<1x256xf32> to vector<1x256xbf16>
    %cst_17 = arith.constant dense<0.000000e+00> : vector<1x1024xf32>
    %52 = tpu.matmul %51, %25, %cst_17 {dimension_numbers = #tpu.dot_dimension_numbers<[1], [0], [0], [1], [0, 0, 1, 1], [], []>} : vector<1x256xbf16>, vector<256x1024xbf16>, vector<1x1024xf32> -> vector<1x1024xf32>
    %53 = arith.addf %50, %52 : vector<1x1024xf32>
    %54 = vector.extract_strided_slice %53 {offsets = [0, 0], sizes = [1, 768], strides = [1, 1]} : vector<1x1024xf32> to vector<1x768xf32>
    %55 = arith.negf %54 : vector<1x768xf32>
    %56 = math.exp %55 : vector<1x768xf32>
    %cst_18 = arith.constant 1.000000e+00 : f32
    %57 = vector.broadcast %cst_18 : f32 to vector<1x768xf32>
    %58 = arith.addf %57, %56 : vector<1x768xf32>
    %59 = arith.divf %57, %58 : vector<1x768xf32>
    %60 = vector.extract_strided_slice %53 {offsets = [0, 768], sizes = [1, 256], strides = [1, 1]} : vector<1x1024xf32> to vector<1x256xf32>
    %61 = math.tanh %60 : vector<1x256xf32>
    %62 = vector.extract_strided_slice %59 {offsets = [0, 0], sizes = [1, 256], strides = [1, 1]} : vector<1x768xf32> to vector<1x256xf32>
    %63 = vector.extract_strided_slice %59 {offsets = [0, 256], sizes = [1, 256], strides = [1, 1]} : vector<1x768xf32> to vector<1x256xf32>
    %64 = vector.extract_strided_slice %59 {offsets = [0, 512], sizes = [1, 256], strides = [1, 1]} : vector<1x768xf32> to vector<1x256xf32>
    %65 = arith.mulf %63, %46 : vector<1x256xf32>
    %66 = arith.mulf %62, %61 : vector<1x256xf32>
    %67 = arith.addf %65, %66 : vector<1x256xf32>
    %68 = math.tanh %67 : vector<1x256xf32>
    %69 = arith.mulf %64, %68 : vector<1x256xf32>
    %c2_i32 = arith.constant 2 : i32
    %70 = arith.index_cast %c2_i32 : i32 to index
    %c0_19 = arith.constant 0 : index
    %71 = vector.load %arg10[%70, %c0_19] : memref<8x1024xf32, #tpu.memory_space<vmem>>, vector<1x1024xf32>
    %72 = arith.truncf %69 : vector<1x256xf32> to vector<1x256xbf16>
    %cst_20 = arith.constant dense<0.000000e+00> : vector<1x1024xf32>
    %73 = tpu.matmul %72, %25, %cst_20 {dimension_numbers = #tpu.dot_dimension_numbers<[1], [0], [0], [1], [0, 0, 1, 1], [], []>} : vector<1x256xbf16>, vector<256x1024xbf16>, vector<1x1024xf32> -> vector<1x1024xf32>
    %74 = arith.addf %71, %73 : vector<1x1024xf32>
    %75 = vector.extract_strided_slice %74 {offsets = [0, 0], sizes = [1, 768], strides = [1, 1]} : vector<1x1024xf32> to vector<1x768xf32>
    %76 = arith.negf %75 : vector<1x768xf32>
    %77 = math.exp %76 : vector<1x768xf32>
    %cst_21 = arith.constant 1.000000e+00 : f32
    %78 = vector.broadcast %cst_21 : f32 to vector<1x768xf32>
    %79 = arith.addf %78, %77 : vector<1x768xf32>
    %80 = arith.divf %78, %79 : vector<1x768xf32>
    %81 = vector.extract_strided_slice %74 {offsets = [0, 768], sizes = [1, 256], strides = [1, 1]} : vector<1x1024xf32> to vector<1x256xf32>
    %82 = math.tanh %81 : vector<1x256xf32>
    %83 = vector.extract_strided_slice %80 {offsets = [0, 0], sizes = [1, 256], strides = [1, 1]} : vector<1x768xf32> to vector<1x256xf32>
    %84 = vector.extract_strided_slice %80 {offsets = [0, 256], sizes = [1, 256], strides = [1, 1]} : vector<1x768xf32> to vector<1x256xf32>
    %85 = vector.extract_strided_slice %80 {offsets = [0, 512], sizes = [1, 256], strides = [1, 1]} : vector<1x768xf32> to vector<1x256xf32>
    %86 = arith.mulf %84, %67 : vector<1x256xf32>
    %87 = arith.mulf %83, %82 : vector<1x256xf32>
    %88 = arith.addf %86, %87 : vector<1x256xf32>
    %89 = math.tanh %88 : vector<1x256xf32>
    %90 = arith.mulf %85, %89 : vector<1x256xf32>
    %c3_i32 = arith.constant 3 : i32
    %91 = arith.index_cast %c3_i32 : i32 to index
    %c0_22 = arith.constant 0 : index
    %92 = vector.load %arg10[%91, %c0_22] : memref<8x1024xf32, #tpu.memory_space<vmem>>, vector<1x1024xf32>
    %93 = arith.truncf %90 : vector<1x256xf32> to vector<1x256xbf16>
    %cst_23 = arith.constant dense<0.000000e+00> : vector<1x1024xf32>
    %94 = tpu.matmul %93, %25, %cst_23 {dimension_numbers = #tpu.dot_dimension_numbers<[1], [0], [0], [1], [0, 0, 1, 1], [], []>} : vector<1x256xbf16>, vector<256x1024xbf16>, vector<1x1024xf32> -> vector<1x1024xf32>
    %95 = arith.addf %92, %94 : vector<1x1024xf32>
    %96 = vector.extract_strided_slice %95 {offsets = [0, 0], sizes = [1, 768], strides = [1, 1]} : vector<1x1024xf32> to vector<1x768xf32>
    %97 = arith.negf %96 : vector<1x768xf32>
    %98 = math.exp %97 : vector<1x768xf32>
    %cst_24 = arith.constant 1.000000e+00 : f32
    %99 = vector.broadcast %cst_24 : f32 to vector<1x768xf32>
    %100 = arith.addf %99, %98 : vector<1x768xf32>
    %101 = arith.divf %99, %100 : vector<1x768xf32>
    %102 = vector.extract_strided_slice %95 {offsets = [0, 768], sizes = [1, 256], strides = [1, 1]} : vector<1x1024xf32> to vector<1x256xf32>
    %103 = math.tanh %102 : vector<1x256xf32>
    %104 = vector.extract_strided_slice %101 {offsets = [0, 0], sizes = [1, 256], strides = [1, 1]} : vector<1x768xf32> to vector<1x256xf32>
    %105 = vector.extract_strided_slice %101 {offsets = [0, 256], sizes = [1, 256], strides = [1, 1]} : vector<1x768xf32> to vector<1x256xf32>
    %106 = vector.extract_strided_slice %101 {offsets = [0, 512], sizes = [1, 256], strides = [1, 1]} : vector<1x768xf32> to vector<1x256xf32>
    %107 = arith.mulf %105, %88 : vector<1x256xf32>
    %108 = arith.mulf %104, %103 : vector<1x256xf32>
    %109 = arith.addf %107, %108 : vector<1x256xf32>
    %110 = math.tanh %109 : vector<1x256xf32>
    %111 = arith.mulf %106, %110 : vector<1x256xf32>
    %c4_i32 = arith.constant 4 : i32
    %112 = arith.index_cast %c4_i32 : i32 to index
    %c0_25 = arith.constant 0 : index
    %113 = vector.load %arg10[%112, %c0_25] : memref<8x1024xf32, #tpu.memory_space<vmem>>, vector<1x1024xf32>
    %114 = arith.truncf %111 : vector<1x256xf32> to vector<1x256xbf16>
    %cst_26 = arith.constant dense<0.000000e+00> : vector<1x1024xf32>
    %115 = tpu.matmul %114, %25, %cst_26 {dimension_numbers = #tpu.dot_dimension_numbers<[1], [0], [0], [1], [0, 0, 1, 1], [], []>} : vector<1x256xbf16>, vector<256x1024xbf16>, vector<1x1024xf32> -> vector<1x1024xf32>
    %116 = arith.addf %113, %115 : vector<1x1024xf32>
    %117 = vector.extract_strided_slice %116 {offsets = [0, 0], sizes = [1, 768], strides = [1, 1]} : vector<1x1024xf32> to vector<1x768xf32>
    %118 = arith.negf %117 : vector<1x768xf32>
    %119 = math.exp %118 : vector<1x768xf32>
    %cst_27 = arith.constant 1.000000e+00 : f32
    %120 = vector.broadcast %cst_27 : f32 to vector<1x768xf32>
    %121 = arith.addf %120, %119 : vector<1x768xf32>
    %122 = arith.divf %120, %121 : vector<1x768xf32>
    %123 = vector.extract_strided_slice %116 {offsets = [0, 768], sizes = [1, 256], strides = [1, 1]} : vector<1x1024xf32> to vector<1x256xf32>
    %124 = math.tanh %123 : vector<1x256xf32>
    %125 = vector.extract_strided_slice %122 {offsets = [0, 0], sizes = [1, 256], strides = [1, 1]} : vector<1x768xf32> to vector<1x256xf32>
    %126 = vector.extract_strided_slice %122 {offsets = [0, 256], sizes = [1, 256], strides = [1, 1]} : vector<1x768xf32> to vector<1x256xf32>
    %127 = vector.extract_strided_slice %122 {offsets = [0, 512], sizes = [1, 256], strides = [1, 1]} : vector<1x768xf32> to vector<1x256xf32>
    %128 = arith.mulf %126, %109 : vector<1x256xf32>
    %129 = arith.mulf %125, %124 : vector<1x256xf32>
    %130 = arith.addf %128, %129 : vector<1x256xf32>
    %131 = math.tanh %130 : vector<1x256xf32>
    %132 = arith.mulf %127, %131 : vector<1x256xf32>
    %c5_i32 = arith.constant 5 : i32
    %133 = arith.index_cast %c5_i32 : i32 to index
    %c0_28 = arith.constant 0 : index
    %134 = vector.load %arg10[%133, %c0_28] : memref<8x1024xf32, #tpu.memory_space<vmem>>, vector<1x1024xf32>
    %135 = arith.truncf %132 : vector<1x256xf32> to vector<1x256xbf16>
    %cst_29 = arith.constant dense<0.000000e+00> : vector<1x1024xf32>
    %136 = tpu.matmul %135, %25, %cst_29 {dimension_numbers = #tpu.dot_dimension_numbers<[1], [0], [0], [1], [0, 0, 1, 1], [], []>} : vector<1x256xbf16>, vector<256x1024xbf16>, vector<1x1024xf32> -> vector<1x1024xf32>
    %137 = arith.addf %134, %136 : vector<1x1024xf32>
    %138 = vector.extract_strided_slice %137 {offsets = [0, 0], sizes = [1, 768], strides = [1, 1]} : vector<1x1024xf32> to vector<1x768xf32>
    %139 = arith.negf %138 : vector<1x768xf32>
    %140 = math.exp %139 : vector<1x768xf32>
    %cst_30 = arith.constant 1.000000e+00 : f32
    %141 = vector.broadcast %cst_30 : f32 to vector<1x768xf32>
    %142 = arith.addf %141, %140 : vector<1x768xf32>
    %143 = arith.divf %141, %142 : vector<1x768xf32>
    %144 = vector.extract_strided_slice %137 {offsets = [0, 768], sizes = [1, 256], strides = [1, 1]} : vector<1x1024xf32> to vector<1x256xf32>
    %145 = math.tanh %144 : vector<1x256xf32>
    %146 = vector.extract_strided_slice %143 {offsets = [0, 0], sizes = [1, 256], strides = [1, 1]} : vector<1x768xf32> to vector<1x256xf32>
    %147 = vector.extract_strided_slice %143 {offsets = [0, 256], sizes = [1, 256], strides = [1, 1]} : vector<1x768xf32> to vector<1x256xf32>
    %148 = vector.extract_strided_slice %143 {offsets = [0, 512], sizes = [1, 256], strides = [1, 1]} : vector<1x768xf32> to vector<1x256xf32>
    %149 = arith.mulf %147, %130 : vector<1x256xf32>
    %150 = arith.mulf %146, %145 : vector<1x256xf32>
    %151 = arith.addf %149, %150 : vector<1x256xf32>
    %152 = math.tanh %151 : vector<1x256xf32>
    %153 = arith.mulf %148, %152 : vector<1x256xf32>
    %c6_i32 = arith.constant 6 : i32
    %154 = arith.index_cast %c6_i32 : i32 to index
    %c0_31 = arith.constant 0 : index
    %155 = vector.load %arg10[%154, %c0_31] : memref<8x1024xf32, #tpu.memory_space<vmem>>, vector<1x1024xf32>
    %156 = arith.truncf %153 : vector<1x256xf32> to vector<1x256xbf16>
    %cst_32 = arith.constant dense<0.000000e+00> : vector<1x1024xf32>
    %157 = tpu.matmul %156, %25, %cst_32 {dimension_numbers = #tpu.dot_dimension_numbers<[1], [0], [0], [1], [0, 0, 1, 1], [], []>} : vector<1x256xbf16>, vector<256x1024xbf16>, vector<1x1024xf32> -> vector<1x1024xf32>
    %158 = arith.addf %155, %157 : vector<1x1024xf32>
    %159 = vector.extract_strided_slice %158 {offsets = [0, 0], sizes = [1, 768], strides = [1, 1]} : vector<1x1024xf32> to vector<1x768xf32>
    %160 = arith.negf %159 : vector<1x768xf32>
    %161 = math.exp %160 : vector<1x768xf32>
    %cst_33 = arith.constant 1.000000e+00 : f32
    %162 = vector.broadcast %cst_33 : f32 to vector<1x768xf32>
    %163 = arith.addf %162, %161 : vector<1x768xf32>
    %164 = arith.divf %162, %163 : vector<1x768xf32>
    %165 = vector.extract_strided_slice %158 {offsets = [0, 768], sizes = [1, 256], strides = [1, 1]} : vector<1x1024xf32> to vector<1x256xf32>
    %166 = math.tanh %165 : vector<1x256xf32>
    %167 = vector.extract_strided_slice %164 {offsets = [0, 0], sizes = [1, 256], strides = [1, 1]} : vector<1x768xf32> to vector<1x256xf32>
    %168 = vector.extract_strided_slice %164 {offsets = [0, 256], sizes = [1, 256], strides = [1, 1]} : vector<1x768xf32> to vector<1x256xf32>
    %169 = vector.extract_strided_slice %164 {offsets = [0, 512], sizes = [1, 256], strides = [1, 1]} : vector<1x768xf32> to vector<1x256xf32>
    %170 = arith.mulf %168, %151 : vector<1x256xf32>
    %171 = arith.mulf %167, %166 : vector<1x256xf32>
    %172 = arith.addf %170, %171 : vector<1x256xf32>
    %173 = math.tanh %172 : vector<1x256xf32>
    %174 = arith.mulf %169, %173 : vector<1x256xf32>
    %c7_i32 = arith.constant 7 : i32
    %175 = arith.index_cast %c7_i32 : i32 to index
    %c0_34 = arith.constant 0 : index
    %176 = vector.load %arg10[%175, %c0_34] : memref<8x1024xf32, #tpu.memory_space<vmem>>, vector<1x1024xf32>
    %177 = arith.truncf %174 : vector<1x256xf32> to vector<1x256xbf16>
    %cst_35 = arith.constant dense<0.000000e+00> : vector<1x1024xf32>
    %178 = tpu.matmul %177, %25, %cst_35 {dimension_numbers = #tpu.dot_dimension_numbers<[1], [0], [0], [1], [0, 0, 1, 1], [], []>} : vector<1x256xbf16>, vector<256x1024xbf16>, vector<1x1024xf32> -> vector<1x1024xf32>
    %179 = arith.addf %176, %178 : vector<1x1024xf32>
    %180 = vector.extract_strided_slice %179 {offsets = [0, 0], sizes = [1, 768], strides = [1, 1]} : vector<1x1024xf32> to vector<1x768xf32>
    %181 = arith.negf %180 : vector<1x768xf32>
    %182 = math.exp %181 : vector<1x768xf32>
    %cst_36 = arith.constant 1.000000e+00 : f32
    %183 = vector.broadcast %cst_36 : f32 to vector<1x768xf32>
    %184 = arith.addf %183, %182 : vector<1x768xf32>
    %185 = arith.divf %183, %184 : vector<1x768xf32>
    %186 = vector.extract_strided_slice %179 {offsets = [0, 768], sizes = [1, 256], strides = [1, 1]} : vector<1x1024xf32> to vector<1x256xf32>
    %187 = math.tanh %186 : vector<1x256xf32>
    %188 = vector.extract_strided_slice %185 {offsets = [0, 0], sizes = [1, 256], strides = [1, 1]} : vector<1x768xf32> to vector<1x256xf32>
    %189 = vector.extract_strided_slice %185 {offsets = [0, 256], sizes = [1, 256], strides = [1, 1]} : vector<1x768xf32> to vector<1x256xf32>
    %190 = vector.extract_strided_slice %185 {offsets = [0, 512], sizes = [1, 256], strides = [1, 1]} : vector<1x768xf32> to vector<1x256xf32>
    %191 = arith.mulf %189, %172 : vector<1x256xf32>
    %192 = arith.mulf %188, %187 : vector<1x256xf32>
    %193 = arith.addf %191, %192 : vector<1x256xf32>
    %194 = math.tanh %193 : vector<1x256xf32>
    %195 = arith.mulf %190, %194 : vector<1x256xf32>
    %c8_i32 = arith.constant 8 : i32
    %196 = arith.truncf %195 : vector<1x256xf32> to vector<1x256xbf16>
    %c0_37 = arith.constant 0 : index
    %c0_38 = arith.constant 0 : index
    %197 = vector.load %arg5[%c0_37, %c0_38] : memref<256x128xbf16, #tpu.memory_space<vmem>>, vector<256x128xbf16>
    %cst_39 = arith.constant dense<0.000000e+00> : vector<1x128xf32>
    %198 = tpu.matmul %196, %197, %cst_39 {dimension_numbers = #tpu.dot_dimension_numbers<[1], [0], [0], [1], [0, 0, 1, 1], [], []>} : vector<1x256xbf16>, vector<256x128xbf16>, vector<1x128xf32> -> vector<1x128xf32>
    %c0_40 = arith.constant 0 : index
    %c0_41 = arith.constant 0 : index
    %199 = vector.load %arg6[%c0_40, %c0_41] : memref<1x128xf32, #tpu.memory_space<vmem>>, vector<1x128xf32>
    %200 = arith.addf %198, %199 : vector<1x128xf32>
    %cst_42 = arith.constant 0.000000e+00 : f32
    %201 = vector.broadcast %cst_42 : f32 to vector<1x128xf32>
    %202 = arith.cmpf ogt, %200, %201 : vector<1x128xf32>
    %cst_43 = arith.constant 0.00999999977 : f32
    %203 = vector.broadcast %cst_43 : f32 to vector<1x128xf32>
    %204 = arith.mulf %203, %200 : vector<1x128xf32>
    %205 = arith.select %202, %200, %204 : vector<1x128xi1>, vector<1x128xf32>
    %206 = arith.truncf %205 : vector<1x128xf32> to vector<1x128xbf16>
    %c0_44 = arith.constant 0 : index
    %c0_45 = arith.constant 0 : index
    %207 = vector.load %arg7[%c0_44, %c0_45] : memref<128x128xbf16, #tpu.memory_space<vmem>>, vector<128x128xbf16>
    %cst_46 = arith.constant dense<0.000000e+00> : vector<1x128xf32>
    %208 = tpu.matmul %206, %207, %cst_46 {dimension_numbers = #tpu.dot_dimension_numbers<[1], [0], [0], [1], [0, 0, 1, 1], [], []>} : vector<1x128xbf16>, vector<128x128xbf16>, vector<1x128xf32> -> vector<1x128xf32>
    %c0_47 = arith.constant 0 : index
    %c0_48 = arith.constant 0 : index
    %209 = vector.load %arg8[%c0_47, %c0_48] : memref<1x128xf32, #tpu.memory_space<vmem>>, vector<1x128xf32>
    %210 = arith.addf %208, %209 : vector<1x128xf32>
    %211 = vector.extract_strided_slice %210 {offsets = [0, 0], sizes = [1, 2], strides = [1, 1]} : vector<1x128xf32> to vector<1x2xf32>
    %cst_49 = arith.constant dense<0xFF800000> : vector<1xf32>
    %212 = vector.multi_reduction <maximumf>, %211, %cst_49 [1] : vector<1x2xf32> to vector<1xf32>
    %213 = vector.shape_cast %212 : vector<1xf32> to vector<1x1xf32>
    %214 = vector.broadcast %213 : vector<1x1xf32> to vector<1x2xf32>
    %215 = arith.subf %211, %214 : vector<1x2xf32>
    %216 = math.exp %215 : vector<1x2xf32>
    %cst_50 = arith.constant dense<0.000000e+00> : vector<1xf32>
    %217 = vector.multi_reduction <add>, %216, %cst_50 [1] : vector<1x2xf32> to vector<1xf32>
    %218 = vector.shape_cast %217 : vector<1xf32> to vector<1x1xf32>
    %219 = math.log %218 : vector<1x1xf32>
    %220 = vector.broadcast %219 : vector<1x1xf32> to vector<1x2xf32>
    %221 = arith.subf %215, %220 : vector<1x2xf32>
    %222 = vector.extract_strided_slice %210 {offsets = [0, 64], sizes = [1, 3], strides = [1, 1]} : vector<1x128xf32> to vector<1x3xf32>
    %cst_51 = arith.constant dense<0xFF800000> : vector<1xf32>
    %223 = vector.multi_reduction <maximumf>, %222, %cst_51 [1] : vector<1x3xf32> to vector<1xf32>
    %224 = vector.shape_cast %223 : vector<1xf32> to vector<1x1xf32>
    %225 = vector.broadcast %224 : vector<1x1xf32> to vector<1x3xf32>
    %226 = arith.subf %222, %225 : vector<1x3xf32>
    %227 = math.exp %226 : vector<1x3xf32>
    %cst_52 = arith.constant dense<0.000000e+00> : vector<1xf32>
    %228 = vector.multi_reduction <add>, %227, %cst_52 [1] : vector<1x3xf32> to vector<1xf32>
    %229 = vector.shape_cast %228 : vector<1xf32> to vector<1x1xf32>
    %230 = math.log %229 : vector<1x1xf32>
    %231 = vector.broadcast %230 : vector<1x1xf32> to vector<1x3xf32>
    %232 = arith.subf %226, %231 : vector<1x3xf32>
    %cst_53 = arith.constant 0.000000e+00 : f32
    %233 = vector.broadcast %cst_53 : f32 to vector<1x2xf32>
    %cst_54 = arith.constant 0.000000e+00 : f32
    %234 = vector.broadcast %cst_54 : f32 to vector<1x1xf32>
    %235 = tpu.concatenate %221, %233, %232, %234 in 1 : vector<1x2xf32>, vector<1x2xf32>, vector<1x3xf32>, vector<1x1xf32> -> vector<1x8xf32>
    %236 = vector.shape_cast %235 : vector<1x8xf32> to vector<1x1x8xf32>
    %c0_55 = arith.constant 0 : index
    %c0_56 = arith.constant 0 : index
    %c0_57 = arith.constant 0 : index
    %237 = vector.load %arg9[%c0_55, %c0_56, %c0_57] : memref<1x1x8xf32, #tpu.memory_space<vmem>>, vector<1x1x8xf32>
    tpu.vector_store %arg9[%c0_55, %c0_56, %c0_57], %236 {strides = array<i32>} : memref<1x1x8xf32, #tpu.memory_space<vmem>>, vector<1x1x8xf32>,
    return
  }
  func.func @transform_0(%arg0: i32) -> (i32, i32, i32) {
    %c0_i32 = arith.constant 0 : i32
    %c0_i32_0 = arith.constant 0 : i32
    %c0_i32_1 = arith.constant 0 : i32
    return %arg0, %c0_i32, %c0_i32_0 : i32, i32, i32
  }
  func.func @transform_1(%arg0: i32) -> (i32, i32) {
    %c0_i32 = arith.constant 0 : i32
    %c0_i32_0 = arith.constant 0 : i32
    %c0_i32_1 = arith.constant 0 : i32
    return %c0_i32, %c0_i32_0 : i32, i32
  }
  func.func @transform_2(%arg0: i32) -> (i32, i32) {
    %c0_i32 = arith.constant 0 : i32
    %c0_i32_0 = arith.constant 0 : i32
    %c0_i32_1 = arith.constant 0 : i32
    return %c0_i32, %c0_i32_0 : i32, i32
  }
  func.func @transform_3(%arg0: i32) -> (i32, i32) {
    %c0_i32 = arith.constant 0 : i32
    %c0_i32_0 = arith.constant 0 : i32
    %c0_i32_1 = arith.constant 0 : i32
    return %c0_i32, %c0_i32_0 : i32, i32
  }
  func.func @transform_4(%arg0: i32) -> (i32, i32) {
    %c0_i32 = arith.constant 0 : i32
    %c0_i32_0 = arith.constant 0 : i32
    %c0_i32_1 = arith.constant 0 : i32
    return %c0_i32, %c0_i32_0 : i32, i32
  }
  func.func @transform_5(%arg0: i32) -> (i32, i32) {
    %c0_i32 = arith.constant 0 : i32
    %c0_i32_0 = arith.constant 0 : i32
    %c0_i32_1 = arith.constant 0 : i32
    return %c0_i32, %c0_i32_0 : i32, i32
  }
  func.func @transform_6(%arg0: i32) -> (i32, i32) {
    %c0_i32 = arith.constant 0 : i32
    %c0_i32_0 = arith.constant 0 : i32
    %c0_i32_1 = arith.constant 0 : i32
    return %c0_i32, %c0_i32_0 : i32, i32
  }
  func.func @transform_7(%arg0: i32) -> (i32, i32) {
    %c0_i32 = arith.constant 0 : i32
    %c0_i32_0 = arith.constant 0 : i32
    %c0_i32_1 = arith.constant 0 : i32
    return %c0_i32, %c0_i32_0 : i32, i32
  }
  func.func @transform_8(%arg0: i32) -> (i32, i32, i32) {
    %c0_i32 = arith.constant 0 : i32
    %c0_i32_0 = arith.constant 0 : i32
    %c0_i32_1 = arith.constant 0 : i32
    return %arg0, %c0_i32, %c0_i32_0 : i32, i32, i32
  }
}

</mosaic_0001>

<bundles_post_ra>
// kernel: event_evaluation_forward.1
= control target key start
LH: loop header
LB: loop body
LE: loop exit
PB: predicated region body
PF: predicated region fallthrough
CT: control target
= control target key end

     0   :  { %13 = vsyncpa [#allocation4], 0  ;;  %s7896_s0 = inlined_call_operand.vmem [shape: bf16[4,8,384], index: 0, kind: input, shape index: {}]   ;;  %s7897_s1 = inlined_call_operand.hbm [shape: bf16[384,512], index: 1, kind: input, shape index: {}]   ;;  %s7898_s2 = inlined_call_operand.hbm [shape: bf16[384,512], index: 2, kind: input, shape index: {}]   ;;  %s7899_s3 = inlined_call_operand.hbm [shape: bf16[256,1024], index: 3, kind: input, shape index: {}]   ;;  %s7900_s4 = inlined_call_operand.vmem [shape: bf16[256,128], index: 4, kind: input, shape index: {}]   ;;  %s7901_s5 = inlined_call_operand.vmem [shape: f32[1,128], index: 5, kind: input, shape index: {}]   ;;  %s7902_s6 = inlined_call_operand.vmem [shape: bf16[128,128], index: 6, kind: input, shape index: {}]   ;;  %s7903_s7 = inlined_call_operand.vmem [shape: f32[1,128], index: 7, kind: input, shape index: {}]   ;;  %s7904_s8 = inlined_call_operand.vmem [shape: f32[4,1,8], index: 8, kind: output, shape index: {}]  }
   0x1   :  { %14 = vsyncpa [#allocation6], 0  ;;  %s6196_s27 = smov 0  }
   0x2 LB: > { %s6202_s28 = sadd.s32 4294967295, %s6136_s27   ;;  %p5167_p0 = scmp.ge.s32.totalorder %s6136_s27, 1  ;;  %s6136_s27 = sphi %s6196_s27, %s20_s27  }
   0x3   : > { %p224_p1 = scmp.lt.s32.totalorder %s6136_s27, 5  ;;  %p5624_p2 = scmp.eq.s32.totalorder %s6202_s28, 0 }
   0x4   : > { %s6138_s30 = smov [#allocation5]   ;;  %s6139_s10 = smov [#allocation3]  }
   0x5   : > { %p6207_p3 = pnand %p5167_p0, %p224_p1  ;;  %s249_s9 = sshll.u32 %s6138_s30, 4  ;;  %s6211_s9 = int_to_ptr.vmem [resolvable:$true] %s249_s9 }
   0x6   : > { %s236_s11 = sshll.u32 %s6139_s10, 4  ;;  %s6140_s13 = smov [#allocation7]   ;;  %s6215_s11 = int_to_ptr.vmem [resolvable:$true] %s236_s11 }
   0x7   : > { %p5614_p4 = pneg %p6207_p3  ;;  %s262_s14 = sshll.u32 %s6140_s13, 4  ;;  %s6223_s14 = int_to_ptr.vmem [resolvable:$true] %s262_s14 }
   0x8   : > { %s6038_s17 = scalar_lea.hbm %s7898_s2, 12288 }
   0x9   : > { %p6219_p5 = pnand %p5624_p2, %p5614_p4  ;;  %p6039_p6 = scmp.ne.s32.totalorder %s7898_s2, %s6038_s17 }
   0xa   : > { %p6045_p10 = scmp.lt.u32.totalorder %s6038_s17, %s7898_s2 }
   0xb   : > { %p6233_p7 = pneg %p6219_p5 }
   0xd   : > { %p6041_p8 = pnand %p6233_p7, %p6039_p6 }
   0xf   : > { %p6042_p9 = pneg %p6041_p8 }
  0x11   : > { %p6047_p11 = pnand %p6045_p10, %p6042_p9 }
  0x13   : > { %6050 = shalt.err (!%p6047_p11)
}
  0x14   : > { %s6051_s23 = scalar_lea.vmem %s6211_s9, 12288  ;;  %p6059_p1 = scmp.lt.s32.totalorder %s6211_s9, %s6211_s9 }
  0x15   : > { %p6052_p12 = scmp.ne.s32.totalorder %s6211_s9, %s6051_s23  ;;  %p6060_p4 = scmp.lt.s32.totalorder %s6051_s23, %s6051_s23 }
  0x17   : > { %p6054_p13 = pnand %p6052_p12, %p6233_p7  ;;  %p6061_p6 = por %p6060_p4, %p6059_p1 }
  0x19   : > { %p6055_p0 = pneg %p6054_p13 }
  0x1b   : > { %p6062_p8 = pnand %p6061_p6, %p6055_p0 }
  0x1d   : > { %6065 = shalt.err (!%p6062_p8)
}
  0x1e   : > { %s6141_s24 = smov 256   ;;  %s6142_s25 = smov 16  }
  0x1f   : > { %5620 = dma.hbm_to_vmem [thread:$0]  (!%p6219_p5), %s7898_s2, 12288, %s6211_s9, [#allocation6], %s6141_s24, %s6141_s24, %s6142_s25  }
  0x20   : > { %s6066_s15 = scalar_lea.hbm %s7897_s1, 12288 }
  0x21   : > { %p6067_p9 = scmp.ne.s32.totalorder %s7897_s1, %s6066_s15  ;;  %p6073_p12 = scmp.lt.u32.totalorder %s6066_s15, %s7897_s1 }
  0x23   : > { %p6069_p10 = pnand %p6067_p9, %p6233_p7 }
  0x25   : > { %p6070_p11 = pneg %p6069_p10 }
  0x27   : > { %p6075_p13 = pnand %p6073_p12, %p6070_p11 }
  0x29   : > { %6078 = shalt.err (!%p6075_p13)
}
  0x2a   : > { %s6079_s9 = scalar_lea.vmem %s6215_s11, 12288  ;;  %p6087_p6 = scmp.lt.s32.totalorder %s6215_s11, %s6215_s11 }
  0x2b   : > { %p6080_p0 = scmp.ne.s32.totalorder %s6215_s11, %s6079_s9  ;;  %p6088_p8 = scmp.lt.s32.totalorder %s6079_s9, %s6079_s9 }
  0x2d   : > { %p6082_p1 = pnand %p6080_p0, %p6233_p7  ;;  %p6089_p9 = por %p6088_p8, %p6087_p6 }
  0x2f   : > { %p6083_p4 = pneg %p6082_p1 }
  0x31   : > { %p6090_p10 = pnand %p6089_p9, %p6083_p4 }
  0x33   : > { %6093 = shalt.err (!%p6090_p10)
}
  0x34   : > { %5617 = dma.hbm_to_vmem [thread:$0]  (!%p6219_p5), %s7897_s1, 12288, %s6215_s11, [#allocation4], %s6141_s24, %s6141_s24, %s6142_s25  }
  0x35   : > { %s6094_s30 = scalar_lea.hbm %s7899_s3, 16384 }
  0x36   : > { %p6095_p11 = scmp.ne.s32.totalorder %s7899_s3, %s6094_s30  ;;  %p6101_p0 = scmp.lt.u32.totalorder %s6094_s30, %s7899_s3 }
  0x38   : > { %p6097_p12 = pnand %p6095_p11, %p6233_p7 }
  0x3a   : > { %p6098_p13 = pneg %p6097_p12 }
  0x3c   : > { %p6103_p1 = pnand %p6101_p0, %p6098_p13 }
  0x3e   : > { %6106 = shalt.err (!%p6103_p1)
}
  0x3f   : > { %s6107_s11 = scalar_lea.vmem %s6223_s14, 16384  ;;  %p6115_p9 = scmp.lt.s32.totalorder %s6223_s14, %s6223_s14 }
  0x40   : > { %p6108_p4 = scmp.ne.s32.totalorder %s6223_s14, %s6107_s11  ;;  %p6116_p10 = scmp.lt.s32.totalorder %s6107_s11, %s6107_s11 }
  0x42   : > { %p6110_p6 = pnand %p6108_p4, %p6233_p7  ;;  %p6117_p11 = por %p6116_p10, %p6115_p9 }
  0x44   : > { %p6111_p8 = pneg %p6110_p6 }
  0x46   : > { %p6118_p12 = pnand %p6117_p11, %p6111_p8 }
  0x48   : > { %6121 = shalt.err (!%p6118_p12)
}
  0x49   : > { %s6143_s24 = smov 512   ;;  %s6144_s25 = smov 32  }
  0x4a   : > { %5623 = dma.hbm_to_vmem [thread:$0]  (!%p6219_p5), %s7899_s3, 16384, %s6223_s14, [#allocation6], %s6143_s24, %s6143_s24, %s6144_s25  }
  0x4b   : > { %298 = sbr.rel (%p6207_p3) target bundleno = 4039 (0xfc7), region = 52 }
  0x52   : > { %6127 = dma.done.wait (%p5624_p2), [#allocation4], 12288  }
  0x53   : > { %6129 = vsyncadd (%p5624_p2), [#allocation4], 4294955008 }
  0x54   : > { %6131 = dma.done.wait (%p5624_p2), [#allocation6], 28672  }
  0x55   : > { %6133 = vsyncadd (%p5624_p2), [#allocation6], 4294938624  ;;  %v5651_v0 = vld [vmem:[#allocation3 + $0x4] ss:$16 sps:$4 sm:$0xff]   ;;  %v5653_v1 = vld [vmem:[#allocation3 + $0xc] ss:$16 sps:$4 sm:$0xff]  }
  0x56   : > { %936 = vmatprep.subr.bf16.mxu0 %v5651_v0  ;;  %v5655_v2 = vld [vmem:[#allocation3] ss:$16 sps:$4 sm:$0xff]   ;;  %v5656_v3 = vld [vmem:[#allocation3 + $0x8] ss:$16 sps:$4 sm:$0xff]   ;;  %1018 = vmatprep.subr.bf16.mxu1 %v5653_v1  ;;  %v5657_v4 = vld [vmem:[#allocation3 + $0x24] ss:$16 sps:$4 sm:$0xff]  }
  0x57   : > { %937 = vmatpush1.bf16.msra.mxu0 %v5655_v2  ;;  %1019 = vmatpush1.bf16.msra.mxu1 %v5656_v3  ;;  %v5659_v5 = vld [vmem:[#allocation3 + $0x2c] ss:$16 sps:$4 sm:$0xff]   ;;  %v5661_v6 = vld [vmem:[#allocation3 + $0x20] ss:$16 sps:$4 sm:$0xff]   ;;  %v5662_v7 = vld [vmem:[#allocation3 + $0x28] ss:$16 sps:$4 sm:$0xff]  }
  0x58   : > { %938 = vmatprep.subr.bf16.mxu0 %v5657_v4  ;;  %1020 = vmatprep.subr.bf16.mxu1 %v5659_v5  ;;  %v5663_v8 = vld [vmem:[#allocation3 + $0x44] ss:$16 sps:$4 sm:$0xff]   ;;  %v5665_v9 = vld [vmem:[#allocation3 + $0x4c] ss:$16 sps:$4 sm:$0xff]   ;;  %v5667_v10 = vld [vmem:[#allocation3 + $0x40] ss:$16 sps:$4 sm:$0xff]  }
  0x59   : > { %v5668_v11 = vld [vmem:[#allocation3 + $0x48] ss:$16 sps:$4 sm:$0xff]   ;;  %v5669_v12 = vld [vmem:[#allocation3 + $0x64] ss:$16 sps:$4 sm:$0xff]   ;;  %v5671_v13 = vld [vmem:[#allocation3 + $0x6c] ss:$16 sps:$4 sm:$0xff]  }
  0x5a   : > { %v5673_v14 = vld [vmem:[#allocation3 + $0x60] ss:$16 sps:$4 sm:$0xff]   ;;  %v5674_v15 = vld [vmem:[#allocation3 + $0x68] ss:$16 sps:$4 sm:$0xff]   ;;  %v5675_v16 = vld [vmem:[#allocation3 + $0x84] ss:$16 sps:$4 sm:$0xff]  }
  0x5b   : > { %939 = vmatpush1.bf16.msra.mxu0 %v5661_v6  ;;  %1021 = vmatpush1.bf16.msra.mxu1 %v5662_v7  ;;  %v5677_v17 = vld [vmem:[#allocation3 + $0x8c] ss:$16 sps:$4 sm:$0xff]   ;;  %v5679_v18 = vld [vmem:[#allocation3 + $0x80] ss:$16 sps:$4 sm:$0xff]   ;;  %v5680_v19 = vld [vmem:[#allocation3 + $0x88] ss:$16 sps:$4 sm:$0xff]  }
  0x5c   : > { %940 = vmatprep.subr.bf16.mxu0 %v5663_v8  ;;  %1022 = vmatprep.subr.bf16.mxu1 %v5665_v9  ;;  %v5681_v20 = vld [vmem:[#allocation3 + $0xa4] ss:$16 sps:$4 sm:$0xff]   ;;  %v5683_v21 = vld [vmem:[#allocation3 + $0xac] ss:$16 sps:$4 sm:$0xff]   ;;  %v5685_v22 = vld [vmem:[#allocation3 + $0xa0] ss:$16 sps:$4 sm:$0xff]  }
  0x5d   : > { %v5686_v23 = vld [vmem:[#allocation3 + $0xa8] ss:$16 sps:$4 sm:$0xff]   ;;  %v5687_v24 = vld [vmem:[#allocation3 + $0xc4] ss:$16 sps:$4 sm:$0xff]   ;;  %v5689_v25 = vld [vmem:[#allocation3 + $0xcc] ss:$16 sps:$4 sm:$0xff]  }
  0x5e   : > { %v5691_v26 = vld [vmem:[#allocation3 + $0xc0] ss:$16 sps:$4 sm:$0xff]   ;;  %v5692_v27 = vld [vmem:[#allocation3 + $0xc8] ss:$16 sps:$4 sm:$0xff]   ;;  %v5693_v28 = vld [vmem:[#allocation3 + $0xe4] ss:$16 sps:$4 sm:$0xff]  }
  0x5f   : > { %941 = vmatpush1.bf16.msra.mxu0 %v5667_v10  ;;  %1023 = vmatpush1.bf16.msra.mxu1 %v5668_v11  ;;  %v5695_v29 = vld [vmem:[#allocation3 + $0xec] ss:$16 sps:$4 sm:$0xff]   ;;  %v5697_v30 = vld [vmem:[#allocation3 + $0xe0] ss:$16 sps:$4 sm:$0xff]   ;;  %p338_p2 = scmp.lt.s32.totalorder %s6202_s28, 3  ;;  %vm1876_vm0 = vcmask 1040384  }
  0x60   : > { %942 = vmatprep.subr.bf16.mxu0 %v5669_v12  ;;  %1024 = vmatprep.subr.bf16.mxu1 %v5671_v13  ;;  %v5698_v31 = vld [vmem:[#allocation3 + $0xe8] ss:$16 sps:$4 sm:$0xff]   ;;  %v5699_v32 = vld [vmem:[#allocation3 + $0x104] ss:$16 sps:$4 sm:$0xff]   ;;  %v5701_v33 = vld [vmem:[#allocation3 + $0x10c] ss:$16 sps:$4 sm:$0xff]  }
  0x61   : > { %v5703_v34 = vld [vmem:[#allocation3 + $0x100] ss:$16 sps:$4 sm:$0xff]   ;;  %v5704_v35 = vld [vmem:[#allocation3 + $0x108] ss:$16 sps:$4 sm:$0xff]   ;;  %s8902_s28 = smov (!%p338_p2, %s6202_s28), 3  ;;  %v7905_v13 = vmov 0  }
  0x62   : > { %v5705_v36 = vld [vmem:[#allocation3 + $0x124] ss:$16 sps:$4 sm:$0xff]   ;;  %v5707_v37 = vld [vmem:[#allocation3 + $0x12c] ss:$16 sps:$4 sm:$0xff]   ;;  %v5709_v38 = vld [vmem:[#allocation3 + $0x120] ss:$16 sps:$4 sm:$0xff]  }
  0x63   : > { %943 = vmatpush1.bf16.msra.mxu0 %v5673_v14  ;;  %1025 = vmatpush1.bf16.msra.mxu1 %v5674_v15  ;;  %s5601_s29 = smul.u32 12, %s8902_s28  ;;  %v5710_v39 = vld [vmem:[#allocation3 + $0x128] ss:$16 sps:$4 sm:$0xff]   ;;  %v5711_v40 = vld [vmem:[#allocation3 + $0x144] ss:$16 sps:$4 sm:$0xff]   ;;  %vm1881_vm1 = vcmask 1041408  }
  0x64   : > { %944 = vmatprep.subr.bf16.mxu0 %v5675_v16  ;;  %1026 = vmatprep.subr.bf16.mxu1 %v5677_v17  ;;  %v5713_v41 = vld [vmem:[#allocation3 + $0x14c] ss:$16 sps:$4 sm:$0xff]   ;;  %v5715_v42 = vld [vmem:[#allocation3 + $0x140] ss:$16 sps:$4 sm:$0xff]   ;;  %v5716_v43 = vld [vmem:[#allocation3 + $0x148] ss:$16 sps:$4 sm:$0xff]  }
  0x65   : > { %s6318_s20 = scalar_lea.vmem %s7896_s0, %s5601_s29  ;;  %v5717_v44 = vld [vmem:[#allocation3 + $0x164] ss:$16 sps:$4 sm:$0xff]   ;;  %v5719_v45 = vld [vmem:[#allocation3 + $0x16c] ss:$16 sps:$4 sm:$0xff]   ;;  %v5721_v47 = vld [vmem:[#allocation3 + $0x160] ss:$16 sps:$4 sm:$0xff]   ;;  %s345_s29 = scalar_lea.vmem %s7904_s8, %s8902_s28 }
  0x66   : > { %v347_v46 = vld [vmem:[%s6318_s20] sm:$0xff]  ;;  %v5722_v49 = vld [vmem:[#allocation3 + $0x168] ss:$16 sps:$4 sm:$0xff]   ;;  %v5725_v51 = vld [vmem:[#allocation3 + $0x18c] ss:$16 sps:$4 sm:$0xff]   ;;  %vm1886_vm2 = vcmask 1042432  }
  0x67   : > { %945 = vmatpush1.bf16.msra.mxu0 %v5679_v18  ;;  %1027 = vmatpush1.bf16.msra.mxu1 %v5680_v19  ;;  %v6321_v48 = vcombine.high %v347_v46, %v347_v46  ;;  %v5723_v50 = vld [vmem:[#allocation3 + $0x184] ss:$16 sps:$4 sm:$0xff]   ;;  %v5727_v52 = vld [vmem:[#allocation3 + $0x180] ss:$16 sps:$4 sm:$0xff]   ;;  %v5728_v53 = vld [vmem:[#allocation3 + $0x188] ss:$16 sps:$4 sm:$0xff]   ;;  %v6325_v5 = vcombine.low %v347_v46, %v347_v46 }
  0x68   : > { %946 = vmatprep.subr.bf16.mxu0 %v5681_v20  ;;  %1028 = vmatprep.subr.bf16.mxu1 %v5683_v21  ;;  %v5729_v54 = vld [vmem:[#allocation3 + $0x1a4] ss:$16 sps:$4 sm:$0xff]   ;;  %v5731_v55 = vld [vmem:[#allocation3 + $0x1ac] ss:$16 sps:$4 sm:$0xff]   ;;  %v5733_v56 = vld [vmem:[#allocation3 + $0x1a0] ss:$16 sps:$4 sm:$0xff]  }
  0x69   : > { %968 = vmatprep.mubr.bf16.mxu0 %v6321_v48  ;;  %1050 = vmatprep.mubr.bf16.mxu1 %v6321_v48  ;;  %v5734_v57 = vld [vmem:[#allocation3 + $0x1a8] ss:$16 sps:$4 sm:$0xff]   ;;  %v5735_v58 = vld [vmem:[#allocation3 + $0x1c4] ss:$16 sps:$4 sm:$0xff]   ;;  %v5737_v59 = vld [vmem:[#allocation3 + $0x1cc] ss:$16 sps:$4 sm:$0xff]  }
  0x6a   : > { %v5739_v60 = vld [vmem:[#allocation3 + $0x1c0] ss:$16 sps:$4 sm:$0xff]   ;;  %v5740_v61 = vld [vmem:[#allocation3 + $0x1c8] ss:$16 sps:$4 sm:$0xff]   ;;  %v5741_v62 = vld [vmem:[#allocation3 + $0x1e4] ss:$16 sps:$4 sm:$0xff]  }
  0x6b   : > { %947 = vmatpush1.bf16.msra.mxu0 %v5685_v22  ;;  %1029 = vmatpush1.bf16.msra.mxu1 %v5686_v23  ;;  %v5743_v63 = vld [vmem:[#allocation3 + $0x1ec] ss:$16 sps:$4 sm:$0xff]   ;;  %v5745_v0 = vld [vmem:[#allocation3 + $0x1e0] ss:$16 sps:$4 sm:$0xff]   ;;  %v5746_v1 = vld [vmem:[#allocation3 + $0x1e8] ss:$16 sps:$4 sm:$0xff]  }
  0x6c   : > { %948 = vmatprep.subr.bf16.mxu0 %v5687_v24  ;;  %1030 = vmatprep.subr.bf16.mxu1 %v5689_v25  ;;  %v5750_v2 = vld [vmem:[#allocation3 + $0x204] ss:$16 sps:$4 sm:$0xff]   ;;  %v5753_v3 = vld [vmem:[#allocation3 + $0x20c] ss:$16 sps:$4 sm:$0xff]   ;;  %v5748_v4 = vld [vmem:[#allocation3 + $0x200] ss:$16 sps:$4 sm:$0xff]  }
  0x6d   : > { %v5751_v6 = vld [vmem:[#allocation3 + $0x208] ss:$16 sps:$4 sm:$0xff]   ;;  %v5757_v7 = vld [vmem:[#allocation3 + $0x224] ss:$16 sps:$4 sm:$0xff]   ;;  %v5760_v8 = vld [vmem:[#allocation3 + $0x22c] ss:$16 sps:$4 sm:$0xff]  }
  0x6e   : > { %v5755_v9 = vld [vmem:[#allocation3 + $0x220] ss:$16 sps:$4 sm:$0xff]   ;;  %v5758_v10 = vld [vmem:[#allocation3 + $0x228] ss:$16 sps:$4 sm:$0xff]   ;;  %v5763_v11 = vld [vmem:[#allocation3 + $0x244] ss:$16 sps:$4 sm:$0xff]  }
  0x6f   : > { %949 = vmatpush1.bf16.msra.mxu0 %v5691_v26  ;;  %1031 = vmatpush1.bf16.msra.mxu1 %v5692_v27  ;;  %v5766_v12 = vld [vmem:[#allocation3 + $0x24c] ss:$16 sps:$4 sm:$0xff]   ;;  %v5761_v14 = vld [vmem:[#allocation3 + $0x240] ss:$16 sps:$4 sm:$0xff]   ;;  %v5764_v15 = vld [vmem:[#allocation3 + $0x248] ss:$16 sps:$4 sm:$0xff]  }
  0x70   : > { %950 = vmatprep.subr.bf16.mxu0 %v5693_v28  ;;  %1032 = vmatprep.subr.bf16.mxu1 %v5695_v29  ;;  %v5769_v16 = vld [vmem:[#allocation3 + $0x264] ss:$16 sps:$4 sm:$0xff]   ;;  %v5772_v17 = vld [vmem:[#allocation3 + $0x26c] ss:$16 sps:$4 sm:$0xff]   ;;  %v5767_v18 = vld [vmem:[#allocation3 + $0x260] ss:$16 sps:$4 sm:$0xff]  }
  0x71   : > { %v5770_v19 = vld [vmem:[#allocation3 + $0x268] ss:$16 sps:$4 sm:$0xff]   ;;  %v5775_v20 = vld [vmem:[#allocation3 + $0x284] ss:$16 sps:$4 sm:$0xff]   ;;  %v5778_v21 = vld [vmem:[#allocation3 + $0x28c] ss:$16 sps:$4 sm:$0xff]  }
  0x72   : > { %v5773_v22 = vld [vmem:[#allocation3 + $0x280] ss:$16 sps:$4 sm:$0xff]   ;;  %v5776_v23 = vld [vmem:[#allocation3 + $0x288] ss:$16 sps:$4 sm:$0xff]   ;;  %v5781_v24 = vld [vmem:[#allocation3 + $0x2a4] ss:$16 sps:$4 sm:$0xff]  }
  0x73   : > { %951 = vmatpush1.bf16.msra.mxu0 %v5697_v30  ;;  %1033 = vmatpush1.bf16.msra.mxu1 %v5698_v31  ;;  %v5784_v25 = vld [vmem:[#allocation3 + $0x2ac] ss:$16 sps:$4 sm:$0xff]   ;;  %v5779_v26 = vld [vmem:[#allocation3 + $0x2a0] ss:$16 sps:$4 sm:$0xff]   ;;  %v5782_v27 = vld [vmem:[#allocation3 + $0x2a8] ss:$16 sps:$4 sm:$0xff]  }
  0x74   : > { %952 = vmatprep.subr.bf16.mxu0 %v5699_v32  ;;  %1034 = vmatprep.subr.bf16.mxu1 %v5701_v33  ;;  %v5787_v28 = vld [vmem:[#allocation3 + $0x2c4] ss:$16 sps:$4 sm:$0xff]   ;;  %v5790_v29 = vld [vmem:[#allocation3 + $0x2cc] ss:$16 sps:$4 sm:$0xff]   ;;  %v5785_v30 = vld [vmem:[#allocation3 + $0x2c0] ss:$16 sps:$4 sm:$0xff]  }
  0x75   : > { %v5788_v31 = vld [vmem:[#allocation3 + $0x2c8] ss:$16 sps:$4 sm:$0xff]   ;;  %v5793_v32 = vld [vmem:[#allocation3 + $0x2e4] ss:$16 sps:$4 sm:$0xff]   ;;  %v5796_v33 = vld [vmem:[#allocation3 + $0x2ec] ss:$16 sps:$4 sm:$0xff]  }
  0x76   : > { %v5815_v46 = vld [vmem:[#allocation5 + $0x4c] ss:$16 sps:$4 sm:$0xff]   ;;  %vm1891_vm3 = vcmask 1043456   ;;  %vm1896_vm4 = vcmask 1044480   ;;  %vm1901_vm5 = vcmask 1045504   ;;  %vm1906_vm6 = vcmask 1046528  }
  0x77   : > { %953 = vmatpush1.bf16.msra.mxu0 %v5703_v34  ;;  %1035 = vmatpush1.bf16.msra.mxu1 %v5704_v35  ;;  %v5791_v34 = vld [vmem:[#allocation3 + $0x2e0] ss:$16 sps:$4 sm:$0xff]   ;;  %v5794_v35 = vld [vmem:[#allocation3 + $0x2e8] ss:$16 sps:$4 sm:$0xff]   ;;  %vm6148_vm7 = vmmov 0   ;;  %vm5057_vm9 = vcmask 541184  }
  0x78   : > { %954 = vmatprep.subr.bf16.mxu0 %v5705_v36  ;;  %1036 = vmatprep.subr.bf16.mxu1 %v5707_v37  ;;  %v5800_v36 = vld [vmem:[#allocation5 + $0x4] ss:$16 sps:$4 sm:$0xff]   ;;  %v5803_v37 = vld [vmem:[#allocation5 + $0xc] ss:$16 sps:$4 sm:$0xff]   ;;  %vm5044_vm10 = vcmask 8192   ;;  %s6149_s24 = smov 64  }
  0x79   : > { %vm5068_vm11 = vcmask 16384   ;;  %s6150_s25 = smov 68   ;;  %vm5079_vm12 = vcmask 15360   ;;  %vm5081_vm13 = vcmask 31744   ;;  %vm5083_vm14 = vcmask 56320  }
  0x7a   : > { %vm5085_vm15 = vcmask 57344  }
  0x7b   : > { %955 = vmatpush1.bf16.msra.mxu0 %v5709_v38  ;;  %1037 = vmatpush1.bf16.msra.mxu1 %v5710_v39  ;;  %v6332_v38 = vld [vmem:[%s6318_s20 + $0x8] ss:$0 sps:$4 sm:$0xff]   ;;  %v5798_v39 = vld [vmem:[#allocation5] ss:$16 sps:$4 sm:$0xff]  }
  0x7c   : > { %956 = vmatprep.subr.bf16.mxu0 %v5711_v40  ;;  %1038 = vmatprep.subr.bf16.mxu1 %v5713_v41  ;;  %v5801_v40 = vld [vmem:[#allocation5 + $0x8] ss:$16 sps:$4 sm:$0xff]   ;;  %v5806_v41 = vld [vmem:[#allocation5 + $0x24] ss:$16 sps:$4 sm:$0xff]  }
  0x7f   : > { %957 = vmatpush1.bf16.msra.mxu0 %v5715_v42  ;;  %1039 = vmatpush1.bf16.msra.mxu1 %v5716_v43  ;;  %v5809_v42 = vld [vmem:[#allocation5 + $0x2c] ss:$16 sps:$4 sm:$0xff]   ;;  %v5804_v43 = vld [vmem:[#allocation5 + $0x20] ss:$16 sps:$4 sm:$0xff]  }
  0x80   : > { %958 = vmatprep.subr.bf16.mxu0 %v5717_v44  ;;  %1040 = vmatprep.subr.bf16.mxu1 %v5719_v45  ;;  %v5807_v44 = vld [vmem:[#allocation5 + $0x28] ss:$16 sps:$4 sm:$0xff]   ;;  %v5812_v45 = vld [vmem:[#allocation5 + $0x44] ss:$16 sps:$4 sm:$0xff]  }
  0x83   : > { %959 = vmatpush1.bf16.msra.mxu0 %v5721_v47  ;;  %1041 = vmatpush1.bf16.msra.mxu1 %v5722_v49  ;;  %v5810_v47 = vld [vmem:[#allocation5 + $0x40] ss:$16 sps:$4 sm:$0xff]   ;;  %v5813_v49 = vld [vmem:[#allocation5 + $0x48] ss:$16 sps:$4 sm:$0xff]  }
  0x84   : > { %960 = vmatprep.subr.bf16.mxu0 %v5723_v50  ;;  %1042 = vmatprep.subr.bf16.mxu1 %v5725_v51  ;;  %v5818_v50 = vld [vmem:[#allocation5 + $0x64] ss:$16 sps:$4 sm:$0xff]   ;;  %v5821_v51 = vld [vmem:[#allocation5 + $0x6c] ss:$16 sps:$4 sm:$0xff]  }
  0x87   : > { %961 = vmatpush1.bf16.msra.mxu0 %v5727_v52  ;;  %1043 = vmatpush1.bf16.msra.mxu1 %v5728_v53  ;;  %v5816_v52 = vld [vmem:[#allocation5 + $0x60] ss:$16 sps:$4 sm:$0xff]   ;;  %v5819_v53 = vld [vmem:[#allocation5 + $0x68] ss:$16 sps:$4 sm:$0xff]  }
  0x88   : > { %962 = vmatprep.subr.bf16.mxu0 %v5729_v54  ;;  %1044 = vmatprep.subr.bf16.mxu1 %v5731_v55  ;;  %v5824_v54 = vld [vmem:[#allocation5 + $0x84] ss:$16 sps:$4 sm:$0xff]   ;;  %v5827_v55 = vld [vmem:[#allocation5 + $0x8c] ss:$16 sps:$4 sm:$0xff]  }
  0x8b   : > { %963 = vmatpush1.bf16.msra.mxu0 %v5733_v56  ;;  %1045 = vmatpush1.bf16.msra.mxu1 %v5734_v57  ;;  %v5822_v56 = vld [vmem:[#allocation5 + $0x80] ss:$16 sps:$4 sm:$0xff]   ;;  %v5830_v57 = vld [vmem:[#allocation5 + $0xa4] ss:$16 sps:$4 sm:$0xff]  }
  0x8c   : > { %964 = vmatprep.subr.bf16.mxu0 %v5735_v58  ;;  %1046 = vmatprep.subr.bf16.mxu1 %v5737_v59  ;;  %v5833_v58 = vld [vmem:[#allocation5 + $0xac] ss:$16 sps:$4 sm:$0xff]   ;;  %v5828_v59 = vld [vmem:[#allocation5 + $0xa0] ss:$16 sps:$4 sm:$0xff]  }
  0x8f   : > { %965 = vmatpush1.bf16.msra.mxu0 %v5739_v60  ;;  %1047 = vmatpush1.bf16.msra.mxu1 %v5740_v61  ;;  %v5831_v60 = vld [vmem:[#allocation5 + $0xa8] ss:$16 sps:$4 sm:$0xff]   ;;  %v5836_v61 = vld [vmem:[#allocation5 + $0xc4] ss:$16 sps:$4 sm:$0xff]  }
  0x90   : > { %966 = vmatprep.subr.bf16.mxu0 %v5741_v62  ;;  %1048 = vmatprep.subr.bf16.mxu1 %v5743_v63  ;;  %v5839_v62 = vld [vmem:[#allocation5 + $0xcc] ss:$16 sps:$4 sm:$0xff]   ;;  %v5834_v63 = vld [vmem:[#allocation5 + $0xc0] ss:$16 sps:$4 sm:$0xff]  }
  0x93   : > { %967 = vmatpush1.bf16.msra.mxu0 %v5745_v0  ;;  %1049 = vmatpush1.bf16.msra.mxu1 %v5746_v1  ;;  %v5837_v0 = vld [vmem:[#allocation5 + $0xc8] ss:$16 sps:$4 sm:$0xff]   ;;  %v5842_v1 = vld [vmem:[#allocation5 + $0xe4] ss:$16 sps:$4 sm:$0xff]  }
  0x94   : > { %977 = vmatprep.subr.bf16.mxu0 %v5750_v2  ;;  %1059 = vmatprep.subr.bf16.mxu1 %v5753_v3  ;;  %v5845_v2 = vld [vmem:[#allocation5 + $0xec] ss:$16 sps:$4 sm:$0xff]   ;;  %v5840_v3 = vld [vmem:[#allocation5 + $0xe0] ss:$16 sps:$4 sm:$0xff]  }
  0x96   : > { %969 = vmatmul.mubr.bf16.vlgmr.msra.gmra.mrb[0].mxu0 %v6325_v5  ;;  %1051 = vmatmul.mubr.bf16.vlgmr.msra.gmra.mrb[0].mxu1 %v6325_v5 }
  0x97   : > { %978 = vmatpush1.bf16.msra.mxu0 %v5748_v4  ;;  %1060 = vmatpush1.bf16.msra.mxu1 %v5751_v6  ;;  %v5843_v4 = vld [vmem:[#allocation5 + $0xe8] ss:$16 sps:$4 sm:$0xff]   ;;  %v5848_v6 = vld [vmem:[#allocation5 + $0x104] ss:$16 sps:$4 sm:$0xff]  }
  0x98   : > { %979 = vmatprep.subr.bf16.mxu0 %v5757_v7  ;;  %1061 = vmatprep.subr.bf16.mxu1 %v5760_v8  ;;  %v5851_v7 = vld [vmem:[#allocation5 + $0x10c] ss:$16 sps:$4 sm:$0xff]   ;;  %v5846_v8 = vld [vmem:[#allocation5 + $0x100] ss:$16 sps:$4 sm:$0xff]  }
  0x99   : > { %1009 = vmatprep.mubr.bf16.mxu0 %v7905_v13  ;;  %1091 = vmatprep.mubr.bf16.mxu1 %v7905_v13 }
  0x9b   : > { %980 = vmatpush1.bf16.msra.mxu0 %v5755_v9  ;;  %1062 = vmatpush1.bf16.msra.mxu1 %v5758_v10  ;;  %v5849_v9 = vld [vmem:[#allocation5 + $0x108] ss:$16 sps:$4 sm:$0xff]   ;;  %v5854_v10 = vld [vmem:[#allocation5 + $0x124] ss:$16 sps:$4 sm:$0xff]  }
  0x9c   : > { %981 = vmatprep.subr.bf16.mxu0 %v5763_v11  ;;  %1063 = vmatprep.subr.bf16.mxu1 %v5766_v12  ;;  %v5857_v11 = vld [vmem:[#allocation5 + $0x12c] ss:$16 sps:$4 sm:$0xff]   ;;  %v5852_v12 = vld [vmem:[#allocation5 + $0x120] ss:$16 sps:$4 sm:$0xff]  }
  0x9f   : > { %982 = vmatpush1.bf16.msra.mxu0 %v5761_v14  ;;  %1064 = vmatpush1.bf16.msra.mxu1 %v5764_v15  ;;  %v5855_v14 = vld [vmem:[#allocation5 + $0x128] ss:$16 sps:$4 sm:$0xff]   ;;  %v5860_v15 = vld [vmem:[#allocation5 + $0x144] ss:$16 sps:$4 sm:$0xff]  }
  0xa0   : > { %983 = vmatprep.subr.bf16.mxu0 %v5769_v16  ;;  %1065 = vmatprep.subr.bf16.mxu1 %v5772_v17  ;;  %v5863_v16 = vld [vmem:[#allocation5 + $0x14c] ss:$16 sps:$4 sm:$0xff]   ;;  %v5858_v17 = vld [vmem:[#allocation5 + $0x140] ss:$16 sps:$4 sm:$0xff]  }
  0xa3   : > { %984 = vmatpush1.bf16.msra.mxu0 %v5767_v18  ;;  %1066 = vmatpush1.bf16.msra.mxu1 %v5770_v19  ;;  %v5861_v18 = vld [vmem:[#allocation5 + $0x148] ss:$16 sps:$4 sm:$0xff]   ;;  %v5866_v19 = vld [vmem:[#allocation5 + $0x164] ss:$16 sps:$4 sm:$0xff]  }
  0xa4   : > { %985 = vmatprep.subr.bf16.mxu0 %v5775_v20  ;;  %1067 = vmatprep.subr.bf16.mxu1 %v5778_v21  ;;  %v5869_v20 = vld [vmem:[#allocation5 + $0x16c] ss:$16 sps:$4 sm:$0xff]   ;;  %v5864_v21 = vld [vmem:[#allocation5 + $0x160] ss:$16 sps:$4 sm:$0xff]  }
  0xa7   : > { %986 = vmatpush1.bf16.msra.mxu0 %v5773_v22  ;;  %1068 = vmatpush1.bf16.msra.mxu1 %v5776_v23  ;;  %v5867_v22 = vld [vmem:[#allocation5 + $0x168] ss:$16 sps:$4 sm:$0xff]   ;;  %v5872_v23 = vld [vmem:[#allocation5 + $0x184] ss:$16 sps:$4 sm:$0xff]  }
  0xa8   : > { %987 = vmatprep.subr.bf16.mxu0 %v5781_v24  ;;  %1069 = vmatprep.subr.bf16.mxu1 %v5784_v25  ;;  %v5875_v24 = vld [vmem:[#allocation5 + $0x18c] ss:$16 sps:$4 sm:$0xff]   ;;  %v5870_v25 = vld [vmem:[#allocation5 + $0x180] ss:$16 sps:$4 sm:$0xff]  }
  0xab   : > { %988 = vmatpush1.bf16.msra.mxu0 %v5779_v26  ;;  %1070 = vmatpush1.bf16.msra.mxu1 %v5782_v27  ;;  %v5873_v26 = vld [vmem:[#allocation5 + $0x188] ss:$16 sps:$4 sm:$0xff]   ;;  %v5878_v27 = vld [vmem:[#allocation5 + $0x1a4] ss:$16 sps:$4 sm:$0xff]  }
  0xac   : > { %989 = vmatprep.subr.bf16.mxu0 %v5787_v28  ;;  %1071 = vmatprep.subr.bf16.mxu1 %v5790_v29  ;;  %v5881_v28 = vld [vmem:[#allocation5 + $0x1ac] ss:$16 sps:$4 sm:$0xff]   ;;  %v5876_v29 = vld [vmem:[#allocation5 + $0x1a0] ss:$16 sps:$4 sm:$0xff]  }
  0xaf   : > { %990 = vmatpush1.bf16.msra.mxu0 %v5785_v30  ;;  %1072 = vmatpush1.bf16.msra.mxu1 %v5788_v31  ;;  %v5879_v30 = vld [vmem:[#allocation5 + $0x1a8] ss:$16 sps:$4 sm:$0xff]   ;;  %v5884_v31 = vld [vmem:[#allocation5 + $0x1c4] ss:$16 sps:$4 sm:$0xff]  }
  0xb0   : > { %991 = vmatprep.subr.bf16.mxu0 %v5793_v32  ;;  %1073 = vmatprep.subr.bf16.mxu1 %v5796_v33  ;;  %v5887_v32 = vld [vmem:[#allocation5 + $0x1cc] ss:$16 sps:$4 sm:$0xff]   ;;  %v5882_v33 = vld [vmem:[#allocation5 + $0x1c0] ss:$16 sps:$4 sm:$0xff]  }
  0xb3   : > { %992 = vmatpush1.bf16.msra.mxu0 %v5791_v34  ;;  %1074 = vmatpush1.bf16.msra.mxu1 %v5794_v35  ;;  %v5885_v34 = vld [vmem:[#allocation5 + $0x1c8] ss:$16 sps:$4 sm:$0xff]   ;;  %v5890_v35 = vld [vmem:[#allocation5 + $0x1e4] ss:$16 sps:$4 sm:$0xff]  }
  0xb4   : > { %1676 = vmatprep.subr.bf16.mxu0 %v5800_v36  ;;  %1758 = vmatprep.subr.bf16.mxu1 %v5803_v37  ;;  %v5893_v36 = vld [vmem:[#allocation5 + $0x1ec] ss:$16 sps:$4 sm:$0xff]   ;;  %v5888_v37 = vld [vmem:[#allocation5 + $0x1e0] ss:$16 sps:$4 sm:$0xff]  }
  0xb6   : > { %1010 = vmatmul.mubr.bf16.vlgmr.msra.gmra.mrb[0].mxu0 %v6332_v38  ;;  %1092 = vmatmul.mubr.bf16.vlgmr.msra.gmra.mrb[0].mxu1 %v6332_v38 }
  0xb7   : > { %1677 = vmatpush1.bf16.msra.mxu0 %v5798_v39  ;;  %1759 = vmatpush1.bf16.msra.mxu1 %v5801_v40  ;;  %v5891_v39 = vld [vmem:[#allocation5 + $0x1e8] ss:$16 sps:$4 sm:$0xff]   ;;  %v5896_v40 = vld [vmem:[#allocation5 + $0x204] ss:$16 sps:$4 sm:$0xff]  }
  0xb8   : > { %1678 = vmatprep.subr.bf16.mxu0 %v5806_v41  ;;  %1760 = vmatprep.subr.bf16.mxu1 %v5809_v42  ;;  %v5899_v41 = vld [vmem:[#allocation5 + $0x20c] ss:$16 sps:$4 sm:$0xff]   ;;  %v5894_v42 = vld [vmem:[#allocation5 + $0x200] ss:$16 sps:$4 sm:$0xff]  }
  0xb9   : > { %1708 = vmatprep.mubr.bf16.mxu0 %v6321_v48  ;;  %1790 = vmatprep.mubr.bf16.mxu1 %v6321_v48  ;;  %v5825_v48 = vld [vmem:[#allocation5 + $0x88] ss:$16 sps:$4 sm:$0xff]  }
  0xbb   : > { %1679 = vmatpush1.bf16.msra.mxu0 %v5804_v43  ;;  %1761 = vmatpush1.bf16.msra.mxu1 %v5807_v44  ;;  %v5897_v43 = vld [vmem:[#allocation5 + $0x208] ss:$16 sps:$4 sm:$0xff]   ;;  %v5902_v44 = vld [vmem:[#allocation5 + $0x224] ss:$16 sps:$4 sm:$0xff]  }
  0xbc   : > { %1680 = vmatprep.subr.bf16.mxu0 %v5812_v45  ;;  %1762 = vmatprep.subr.bf16.mxu1 %v5815_v46  ;;  %v5905_v45 = vld [vmem:[#allocation5 + $0x22c] ss:$16 sps:$4 sm:$0xff]   ;;  %v5900_v46 = vld [vmem:[#allocation5 + $0x220] ss:$16 sps:$4 sm:$0xff]  }
  0xbf   : > { %1681 = vmatpush1.bf16.msra.mxu0 %v5810_v47  ;;  %1763 = vmatpush1.bf16.msra.mxu1 %v5813_v49  ;;  %v5903_v47 = vld [vmem:[#allocation5 + $0x228] ss:$16 sps:$4 sm:$0xff]   ;;  %v5908_v49 = vld [vmem:[#allocation5 + $0x244] ss:$16 sps:$4 sm:$0xff]  }
  0xc0   : > { %1682 = vmatprep.subr.bf16.mxu0 %v5818_v50  ;;  %1764 = vmatprep.subr.bf16.mxu1 %v5821_v51  ;;  %v5911_v50 = vld [vmem:[#allocation5 + $0x24c] ss:$16 sps:$4 sm:$0xff]   ;;  %v5906_v51 = vld [vmem:[#allocation5 + $0x240] ss:$16 sps:$4 sm:$0xff]  }
  0xc3   : > { %1683 = vmatpush1.bf16.msra.mxu0 %v5816_v52  ;;  %1765 = vmatpush1.bf16.msra.mxu1 %v5819_v53  ;;  %v5909_v52 = vld [vmem:[#allocation5 + $0x248] ss:$16 sps:$4 sm:$0xff]   ;;  %v5914_v53 = vld [vmem:[#allocation5 + $0x264] ss:$16 sps:$4 sm:$0xff]  }
  0xc4   : > { %1684 = vmatprep.subr.bf16.mxu0 %v5824_v54  ;;  %1766 = vmatprep.subr.bf16.mxu1 %v5827_v55  ;;  %v5912_v54 = vld [vmem:[#allocation5 + $0x260] ss:$16 sps:$4 sm:$0xff]   ;;  %v5915_v55 = vld [vmem:[#allocation5 + $0x268] ss:$16 sps:$4 sm:$0xff]  }
  0xc7   : > { %1685 = vmatpush1.bf16.msra.mxu0 %v5822_v56  ;;  %1767 = vmatpush1.bf16.msra.mxu1 %v5825_v48  ;;  %v5920_v56 = vld [vmem:[#allocation5 + $0x284] ss:$16 sps:$4 sm:$0xff]   ;;  %v5923_v48 = vld [vmem:[#allocation5 + $0x28c] ss:$16 sps:$4 sm:$0xff]  }
  0xc8   : > { %1686 = vmatprep.subr.bf16.mxu0 %v5830_v57  ;;  %1768 = vmatprep.subr.bf16.mxu1 %v5833_v58  ;;  %v5918_v57 = vld [vmem:[#allocation5 + $0x280] ss:$16 sps:$4 sm:$0xff]   ;;  %v5921_v58 = vld [vmem:[#allocation5 + $0x288] ss:$16 sps:$4 sm:$0xff]  }
  0xcb   : > { %1687 = vmatpush1.bf16.msra.mxu0 %v5828_v59  ;;  %1769 = vmatpush1.bf16.msra.mxu1 %v5831_v60  ;;  %v5926_v59 = vld [vmem:[#allocation5 + $0x2a4] ss:$16 sps:$4 sm:$0xff]   ;;  %v5929_v60 = vld [vmem:[#allocation5 + $0x2ac] ss:$16 sps:$4 sm:$0xff]  }
  0xcc   : > { %1688 = vmatprep.subr.bf16.mxu0 %v5836_v61  ;;  %1770 = vmatprep.subr.bf16.mxu1 %v5839_v62  ;;  %v5924_v61 = vld [vmem:[#allocation5 + $0x2a0] ss:$16 sps:$4 sm:$0xff]   ;;  %v5927_v62 = vld [vmem:[#allocation5 + $0x2a8] ss:$16 sps:$4 sm:$0xff]  }
  0xcf   : > { %1689 = vmatpush1.bf16.msra.mxu0 %v5834_v63  ;;  %1771 = vmatpush1.bf16.msra.mxu1 %v5837_v0  ;;  %v5932_v63 = vld [vmem:[#allocation5 + $0x2c4] ss:$16 sps:$4 sm:$0xff]   ;;  %v5935_v0 = vld [vmem:[#allocation5 + $0x2cc] ss:$16 sps:$4 sm:$0xff]  }
  0xd0   : > { %1690 = vmatprep.subr.bf16.mxu0 %v5842_v1  ;;  %1772 = vmatprep.subr.bf16.mxu1 %v5845_v2  ;;  %v5930_v1 = vld [vmem:[#allocation5 + $0x2c0] ss:$16 sps:$4 sm:$0xff]   ;;  %v5933_v2 = vld [vmem:[#allocation5 + $0x2c8] ss:$16 sps:$4 sm:$0xff]  }
  0xd3   : > { %1691 = vmatpush1.bf16.msra.mxu0 %v5840_v3  ;;  %1773 = vmatpush1.bf16.msra.mxu1 %v5843_v4  ;;  %v5938_v3 = vld [vmem:[#allocation5 + $0x2e4] ss:$16 sps:$4 sm:$0xff]   ;;  %v5941_v4 = vld [vmem:[#allocation5 + $0x2ec] ss:$16 sps:$4 sm:$0xff]  }
  0xd4   : > { %1692 = vmatprep.subr.bf16.mxu0 %v5848_v6  ;;  %1774 = vmatprep.subr.bf16.mxu1 %v5851_v7  ;;  %v1919_v6 = vld [vmem:[#allocation7] sm:$0xff] }
  0xd5   : > { %v1923_v7 = vld [vmem:[#allocation7 + $0x20] sm:$0xff] }
  0xd7   : > { %1693 = vmatpush1.bf16.msra.mxu0 %v5846_v8  ;;  %1775 = vmatpush1.bf16.msra.mxu1 %v5849_v9  ;;  %v1920_v8 = vld [vmem:[#allocation7 + $0x8] sm:$0xff] }
  0xd8   : > { %1694 = vmatprep.subr.bf16.mxu0 %v5854_v10  ;;  %1776 = vmatprep.subr.bf16.mxu1 %v5857_v11  ;;  %v1924_v9 = vld [vmem:[#allocation7 + $0x28] sm:$0xff]  ;;  %v5936_v10 = vld [vmem:[#allocation5 + $0x2e0] ss:$16 sps:$4 sm:$0xff]  }
  0xd9   : > { %v5939_v11 = vld [vmem:[#allocation5 + $0x2e8] ss:$16 sps:$4 sm:$0xff]  }
  0xdb   : > { %1695 = vmatpush1.bf16.msra.mxu0 %v5852_v12  ;;  %1777 = vmatpush1.bf16.msra.mxu1 %v5855_v14  ;;  %v6342_v12 = vcombine.high %v1919_v6, %v1923_v7  ;;  %v6344_v14 = vcombine.high %v1920_v8, %v1924_v9 }
  0xdc   : > { %1696 = vmatprep.subr.bf16.mxu0 %v5860_v15  ;;  %1778 = vmatprep.subr.bf16.mxu1 %v5863_v16  ;;  %v1927_v15 = vld [vmem:[#allocation7 + $0x40] sm:$0xff] }
  0xdd   : > { %8180 = vst [vmem:[#allocation10_spill] sm:$0xff] %v6342_v12  ;;  %8181 = vst [vmem:[#allocation11_spill] sm:$0xff] %v6344_v14  ;;  %v1931_v16 = vld [vmem:[#allocation7 + $0x60] sm:$0xff] }
  0xdf   : > { %1697 = vmatpush1.bf16.msra.mxu0 %v5858_v17  ;;  %1779 = vmatpush1.bf16.msra.mxu1 %v5861_v18  ;;  %v1928_v17 = vld [vmem:[#allocation7 + $0x48] sm:$0xff] }
  0xe0   : > { %1698 = vmatprep.subr.bf16.mxu0 %v5866_v19  ;;  %1780 = vmatprep.subr.bf16.mxu1 %v5869_v20  ;;  %v1932_v18 = vld [vmem:[#allocation7 + $0x68] sm:$0xff]  ;;  %v6346_v19 = vcombine.low %v1919_v6, %v1923_v7  ;;  %v6348_v20 = vcombine.low %v1920_v8, %v1924_v9  ;;  %v1983_v7 = vld [vmem:[#allocation7 + $0x200] sm:$0xff] }
  0xe1   : > { %v1987_v8 = vld [vmem:[#allocation7 + $0x220] sm:$0xff]  ;;  %v1984_v9 = vld [vmem:[#allocation7 + $0x208] sm:$0xff] }
  0xe2   : > { %8182 = vst [vmem:[#allocation12_spill] sm:$0xff] %v6346_v19  ;;  %8183 = vst [vmem:[#allocation13_spill] sm:$0xff] %v6348_v20 }
  0xe3   : > { %1699 = vmatpush1.bf16.msra.mxu0 %v5864_v21  ;;  %1781 = vmatpush1.bf16.msra.mxu1 %v5867_v22  ;;  %v6352_v21 = vcombine.high %v1927_v15, %v1931_v16  ;;  %v6354_v22 = vcombine.high %v1928_v17, %v1932_v18 }
  0xe4   : > { %1700 = vmatprep.subr.bf16.mxu0 %v5872_v23  ;;  %1782 = vmatprep.subr.bf16.mxu1 %v5875_v24  ;;  %v1935_v23 = vld [vmem:[#allocation7 + $0x80] sm:$0xff] }
  0xe5   : > { %8184 = vst [vmem:[#allocation14_spill] sm:$0xff] %v6352_v21  ;;  %8185 = vst [vmem:[#allocation15_spill] sm:$0xff] %v6354_v22  ;;  %v1939_v24 = vld [vmem:[#allocation7 + $0xa0] sm:$0xff] }
  0xe7   : > { %1701 = vmatpush1.bf16.msra.mxu0 %v5870_v25  ;;  %1783 = vmatpush1.bf16.msra.mxu1 %v5873_v26  ;;  %v1936_v25 = vld [vmem:[#allocation7 + $0x88] sm:$0xff] }
  0xe8   : > { %1702 = vmatprep.subr.bf16.mxu0 %v5878_v27  ;;  %1784 = vmatprep.subr.bf16.mxu1 %v5881_v28  ;;  %v1940_v26 = vld [vmem:[#allocation7 + $0xa8] sm:$0xff]  ;;  %v6360_v27 = vcombine.low %v1927_v15, %v1931_v16  ;;  %v6362_v28 = vcombine.low %v1928_v17, %v1932_v18  ;;  %v6440_v16 = vcombine.high %v1983_v7, %v1987_v8  ;;  %v1991_v18 = vld [vmem:[#allocation7 + $0x240] sm:$0xff] }
  0xea   : > { %8186 = vst [vmem:[#allocation16_spill] sm:$0xff] %v6360_v27  ;;  %8187 = vst [vmem:[#allocation17_spill] sm:$0xff] %v6362_v28 }
  0xeb   : > { %1703 = vmatpush1.bf16.msra.mxu0 %v5876_v29  ;;  %1785 = vmatpush1.bf16.msra.mxu1 %v5879_v30  ;;  %v6366_v29 = vcombine.high %v1935_v23, %v1939_v24  ;;  %v6368_v30 = vcombine.high %v1936_v25, %v1940_v26  ;;  %8212 = vst [vmem:[#allocation42_spill] sm:$0xff] %v6440_v16 }
  0xec   : > { %1704 = vmatprep.subr.bf16.mxu0 %v5884_v31  ;;  %1786 = vmatprep.subr.bf16.mxu1 %v5887_v32  ;;  %v1943_v31 = vld [vmem:[#allocation7 + $0xc0] sm:$0xff] }
  0xed   : > { %8188 = vst [vmem:[#allocation18_spill] sm:$0xff] %v6366_v29  ;;  %8189 = vst [vmem:[#allocation19_spill] sm:$0xff] %v6368_v30  ;;  %v1947_v32 = vld [vmem:[#allocation7 + $0xe0] sm:$0xff] }
  0xef   : > { %1705 = vmatpush1.bf16.msra.mxu0 %v5882_v33  ;;  %1787 = vmatpush1.bf16.msra.mxu1 %v5885_v34  ;;  %v1944_v33 = vld [vmem:[#allocation7 + $0xc8] sm:$0xff]  ;;  %v6374_v34 = vcombine.low %v1935_v23, %v1939_v24  ;;  %v1995_v23 = vld [vmem:[#allocation7 + $0x260] sm:$0xff] }
  0xf0   : > { %1706 = vmatprep.subr.bf16.mxu0 %v5890_v35  ;;  %1788 = vmatprep.subr.bf16.mxu1 %v5893_v36  ;;  %v6376_v35 = vcombine.low %v1936_v25, %v1940_v26  ;;  %v6380_v36 = vcombine.high %v1943_v31, %v1947_v32  ;;  %v1992_v24 = vld [vmem:[#allocation7 + $0x248] sm:$0xff]  ;;  %v6446_v26 = vcombine.low %v1983_v7, %v1987_v8  ;;  %v2019_v7 = vld [vmem:[#allocation7 + $0x320] sm:$0xff] }
  0xf1   : > { %8190 = vst [vmem:[#allocation20_spill] sm:$0xff] %v6374_v34  ;;  %v1996_v25 = vld [vmem:[#allocation7 + $0x268] sm:$0xff] }
  0xf2   : > { %8191 = vst [vmem:[#allocation21_spill] sm:$0xff] %v6376_v35  ;;  %8192 = vst [vmem:[#allocation22_spill] sm:$0xff] %v6380_v36  ;;  %v2016_v8 = vld [vmem:[#allocation7 + $0x308] sm:$0xff] }
  0xf3   : > { %1707 = vmatpush1.bf16.msra.mxu0 %v5888_v37  ;;  %1789 = vmatpush1.bf16.msra.mxu1 %v5891_v39  ;;  %v1951_v39 = vld [vmem:[#allocation7 + $0x100] sm:$0xff]  ;;  %8214 = vst [vmem:[#allocation44_spill] sm:$0xff] %v6446_v26 }
  0xf4   : > { %1717 = vmatprep.subr.bf16.mxu0 %v5896_v40  ;;  %1799 = vmatprep.subr.bf16.mxu1 %v5899_v41  ;;  %v1955_v40 = vld [vmem:[#allocation7 + $0x120] sm:$0xff]  ;;  %v1952_v41 = vld [vmem:[#allocation7 + $0x108] sm:$0xff] }
  0xf6   : > { %1709 = vmatmul.mubr.bf16.vlgmr.msra.gmra.mrb[4].mxu0 %v6325_v5  ;;  %1791 = vmatmul.mubr.bf16.vlgmr.msra.gmra.mrb[4].mxu1 %v6325_v5  ;;  %v5917_v5 = vld [vmem:[#allocation5 + $0x26c] ss:$16 sps:$4 sm:$0xff]  }
  0xf7   : > { %1718 = vmatpush1.bf16.msra.mxu0 %v5894_v42  ;;  %1800 = vmatpush1.bf16.msra.mxu1 %v5897_v43  ;;  %v1956_v42 = vld [vmem:[#allocation7 + $0x128] sm:$0xff]  ;;  %v6386_v43 = vcombine.low %v1943_v31, %v1947_v32  ;;  %v6452_v32 = vcombine.high %v1991_v18, %v1995_v23 }
  0xf8   : > { %1719 = vmatprep.subr.bf16.mxu0 %v5902_v44  ;;  %1801 = vmatprep.subr.bf16.mxu1 %v5905_v45  ;;  %v6392_v45 = vcombine.high %v1951_v39, %v1955_v40 }
  0xf9   : > { %1749 = vmatprep.mubr.bf16.mxu0 %v7905_v13  ;;  %1831 = vmatprep.mubr.bf16.mxu1 %v7905_v13  ;;  %8194 = vst [vmem:[#allocation24_spill] sm:$0xff] %v6386_v43  ;;  %8216 = vst [vmem:[#allocation46_spill] sm:$0xff] %v6452_v32 }
  0xfa   : > { %8196 = vst [vmem:[#allocation26_spill] sm:$0xff] %v6392_v45 }
  0xfb   : > { %1720 = vmatpush1.bf16.msra.mxu0 %v5900_v46  ;;  %1802 = vmatpush1.bf16.msra.mxu1 %v5903_v47  ;;  %v6394_v46 = vcombine.high %v1952_v41, %v1956_v42  ;;  %v1959_v47 = vld [vmem:[#allocation7 + $0x140] sm:$0xff] }
  0xfc   : > { %1721 = vmatprep.subr.bf16.mxu0 %v5908_v49  ;;  %1803 = vmatprep.subr.bf16.mxu1 %v5911_v50  ;;  %v1963_v49 = vld [vmem:[#allocation7 + $0x160] sm:$0xff]  ;;  %v1960_v50 = vld [vmem:[#allocation7 + $0x148] sm:$0xff] }
  0xfd   : > { %8197 = vst [vmem:[#allocation27_spill] sm:$0xff] %v6394_v46 }
  0xff   : > { %1722 = vmatpush1.bf16.msra.mxu0 %v5906_v51  ;;  %1804 = vmatpush1.bf16.msra.mxu1 %v5909_v52  ;;  %v1964_v51 = vld [vmem:[#allocation7 + $0x168] sm:$0xff]  ;;  %v6398_v52 = vcombine.low %v1951_v39, %v1955_v40  ;;  %v2003_v39 = vld [vmem:[#allocation7 + $0x2a0] sm:$0xff] }
 0x100   : > { %1723 = vmatprep.subr.bf16.mxu0 %v5914_v53  ;;  %1805 = vmatprep.subr.bf16.mxu1 %v5917_v5  ;;  %v6400_v53 = vcombine.low %v1952_v41, %v1956_v42  ;;  %v6404_v5 = vcombine.high %v1959_v47, %v1963_v49  ;;  %v2000_v40 = vld [vmem:[#allocation7 + $0x288] sm:$0xff]  ;;  %v6458_v42 = vcombine.low %v1991_v18, %v1995_v23 }
 0x101   : > { %8198 = vst [vmem:[#allocation28_spill] sm:$0xff] %v6398_v52  ;;  %v2004_v41 = vld [vmem:[#allocation7 + $0x2a8] sm:$0xff] }
 0x102   : > { %8199 = vst [vmem:[#allocation29_spill] sm:$0xff] %v6400_v53  ;;  %8200 = vst [vmem:[#allocation30_spill] sm:$0xff] %v6404_v5 }
 0x103   : > { %1724 = vmatpush1.bf16.msra.mxu0 %v5912_v54  ;;  %1806 = vmatpush1.bf16.msra.mxu1 %v5915_v55  ;;  %v6406_v54 = vcombine.high %v1960_v50, %v1964_v51  ;;  %v1967_v55 = vld [vmem:[#allocation7 + $0x180] sm:$0xff]  ;;  %8218 = vst [vmem:[#allocation48_spill] sm:$0xff] %v6458_v42 }
 0x104   : > { %1725 = vmatprep.subr.bf16.mxu0 %v5920_v56  ;;  %1807 = vmatprep.subr.bf16.mxu1 %v5923_v48  ;;  %v1971_v56 = vld [vmem:[#allocation7 + $0x1a0] sm:$0xff]  ;;  %v1968_v48 = vld [vmem:[#allocation7 + $0x188] sm:$0xff] }
 0x105   : > { %8201 = vst [vmem:[#allocation31_spill] sm:$0xff] %v6406_v54 }
 0x107   : > { %1726 = vmatpush1.bf16.msra.mxu0 %v5918_v57  ;;  %1808 = vmatpush1.bf16.msra.mxu1 %v5921_v58  ;;  %v1972_v57 = vld [vmem:[#allocation7 + $0x1a8] sm:$0xff]  ;;  %v6410_v58 = vcombine.low %v1959_v47, %v1963_v49  ;;  %v6460_v47 = vcombine.low %v1992_v24, %v1996_v25 }
 0x108   : > { %1727 = vmatprep.subr.bf16.mxu0 %v5926_v59  ;;  %1809 = vmatprep.subr.bf16.mxu1 %v5929_v60  ;;  %v6412_v59 = vcombine.low %v1960_v50, %v1964_v51  ;;  %v6416_v60 = vcombine.high %v1967_v55, %v1971_v56  ;;  %v6466_v50 = vcombine.high %v2000_v40, %v2004_v41  ;;  %v2007_v51 = vld [vmem:[#allocation7 + $0x2c0] sm:$0xff] }
 0x109   : > { %8202 = vst [vmem:[#allocation32_spill] sm:$0xff] %v6410_v58  ;;  %8219 = vst [vmem:[#allocation49_spill] sm:$0xff] %v6460_v47 }
 0x10a   : > { %8203 = vst [vmem:[#allocation33_spill] sm:$0xff] %v6412_v59  ;;  %8204 = vst [vmem:[#allocation34_spill] sm:$0xff] %v6416_v60 }
 0x10b   : > { %1728 = vmatpush1.bf16.msra.mxu0 %v5924_v61  ;;  %1810 = vmatpush1.bf16.msra.mxu1 %v5927_v62  ;;  %v6418_v61 = vcombine.high %v1968_v48, %v1972_v57  ;;  %v1975_v62 = vld [vmem:[#allocation7 + $0x1c0] sm:$0xff]  ;;  %8221 = vst [vmem:[#allocation51_spill] sm:$0xff] %v6466_v50 }
 0x10c   : > { %1729 = vmatprep.subr.bf16.mxu0 %v5932_v63  ;;  %1811 = vmatprep.subr.bf16.mxu1 %v5935_v0  ;;  %v1979_v63 = vld [vmem:[#allocation7 + $0x1e0] sm:$0xff]  ;;  %v1976_v0 = vld [vmem:[#allocation7 + $0x1c8] sm:$0xff] }
 0x10d   : > { %8205 = vst [vmem:[#allocation35_spill] sm:$0xff] %v6418_v61 }
 0x10f   : > { %1730 = vmatpush1.bf16.msra.mxu0 %v5930_v1  ;;  %1812 = vmatpush1.bf16.msra.mxu1 %v5933_v2  ;;  %v1980_v1 = vld [vmem:[#allocation7 + $0x1e8] sm:$0xff]  ;;  %v6422_v2 = vcombine.low %v1967_v55, %v1971_v56  ;;  %v2011_v55 = vld [vmem:[#allocation7 + $0x2e0] sm:$0xff] }
 0x110   : > { %1731 = vmatprep.subr.bf16.mxu0 %v5938_v3  ;;  %1813 = vmatprep.subr.bf16.mxu1 %v5941_v4  ;;  %v6424_v3 = vcombine.low %v1968_v48, %v1972_v57  ;;  %v6428_v4 = vcombine.high %v1975_v62, %v1979_v63  ;;  %v6430_v6 = vcombine.high %v1976_v0, %v1980_v1  ;;  %v2008_v56 = vld [vmem:[#allocation7 + $0x2c8] sm:$0xff] }
 0x111   : > { %8206 = vst [vmem:[#allocation36_spill] sm:$0xff] %v6422_v2  ;;  %v6436_v15 = vcombine.low %v1976_v0, %v1980_v1  ;;  %v2012_v48 = vld [vmem:[#allocation7 + $0x2e8] sm:$0xff]  ;;  %v2015_v1 = vld [vmem:[#allocation7 + $0x300] sm:$0xff] }
 0x112   : > { %8207 = vst [vmem:[#allocation37_spill] sm:$0xff] %v6424_v3  ;;  %8208 = vst [vmem:[#allocation38_spill] sm:$0xff] %v6428_v4  ;;  %v6478_v0 = vcombine.high %v2008_v56, %v2012_v48  ;;  %v6484_v18 = vcombine.low %v2008_v56, %v2012_v48  ;;  %v6488_v23 = vcombine.high %v2015_v1, %v2019_v7  ;;  %v2031_v48 = vld [vmem:[#allocation7 + $0x380] sm:$0xff] }
 0x113   : > { %1732 = vmatpush1.bf16.msra.mxu0 %v5936_v10  ;;  %1814 = vmatpush1.bf16.msra.mxu1 %v5939_v11  ;;  %8209 = vst [vmem:[#allocation39_spill] sm:$0xff] %v6430_v6  ;;  %v1988_v10 = vld [vmem:[#allocation7 + $0x228] sm:$0xff]  ;;  %v6434_v11 = vcombine.low %v1975_v62, %v1979_v63  ;;  %8211 = vst [vmem:[#allocation41_spill] sm:$0xff] %v6436_v15  ;;  %v6472_v62 = vcombine.low %v2000_v40, %v2004_v41 }
 0x114   : > { %2690 = vmatprep.subr.bf16.mxu0 %v6342_v12  ;;  %2731 = vmatprep.subr.bf16.mxu1 %v6344_v14  ;;  %v6442_v17 = vcombine.high %v1984_v9, %v1988_v10  ;;  %v6448_v31 = vcombine.low %v1984_v9, %v1988_v10  ;;  %v6476_v63 = vcombine.high %v2007_v51, %v2011_v55  ;;  %v2020_v9 = vld [vmem:[#allocation7 + $0x328] sm:$0xff] }
 0x115   : > { %8210 = vst [vmem:[#allocation40_spill] sm:$0xff] %v6434_v11  ;;  %8223 = vst [vmem:[#allocation53_spill] sm:$0xff] %v6472_v62  ;;  %v6482_v10 = vcombine.low %v2007_v51, %v2011_v55  ;;  %v2028_v40 = vld [vmem:[#allocation7 + $0x368] sm:$0xff]  ;;  %v6494_v41 = vcombine.low %v2015_v1, %v2019_v7  ;;  %v6496_v51 = vcombine.low %v2016_v8, %v2020_v9 }
 0x116   : > { %1750 = vmatmul.mubr.bf16.vlgmr.msra.gmra.mrb[4].mxu0 %v6332_v38  ;;  %1832 = vmatmul.mubr.bf16.vlgmr.msra.gmra.mrb[4].mxu1 %v6332_v38  ;;  %v1948_v38 = vld [vmem:[#allocation7 + $0xe8] sm:$0xff]  ;;  %8213 = vst [vmem:[#allocation43_spill] sm:$0xff] %v6442_v17  ;;  %8215 = vst [vmem:[#allocation45_spill] sm:$0xff] %v6448_v31 }
 0x117   : > { %2691 = vmatpush1.bf16.msra.mxu0 %v6346_v19  ;;  %2732 = vmatpush1.bf16.msra.mxu1 %v6348_v20  ;;  %v6382_v37 = vcombine.high %v1944_v33, %v1948_v38  ;;  %v6388_v44 = vcombine.low %v1944_v33, %v1948_v38  ;;  %v6454_v33 = vcombine.high %v1992_v24, %v1996_v25  ;;  %v1999_v38 = vld [vmem:[#allocation7 + $0x280] sm:$0xff] }
 0x118   : > { %2692 = vmatprep.subr.bf16.mxu0 %v6352_v21  ;;  %2733 = vmatprep.subr.bf16.mxu1 %v6354_v22  ;;  %v6464_v49 = vcombine.high %v1999_v38, %v2003_v39  ;;  %v6470_v57 = vcombine.low %v1999_v38, %v2003_v39  ;;  %8224 = vst [vmem:[#allocation54_spill] sm:$0xff] %v6476_v63  ;;  %8225 = vst [vmem:[#allocation55_spill] sm:$0xff] %v6478_v0  ;;  %v2023_v25 = vld [vmem:[#allocation7 + $0x340] sm:$0xff]  ;;  %v2024_v39 = vld [vmem:[#allocation7 + $0x348] sm:$0xff] }
 0x119   : > { %2722 = vmatprep.mubr.bf16.mxu0 %v7905_v13  ;;  %2763 = vmatprep.mubr.bf16.mxu1 %v7905_v13  ;;  %8193 = vst [vmem:[#allocation23_spill] sm:$0xff] %v6382_v37  ;;  %8195 = vst [vmem:[#allocation25_spill] sm:$0xff] %v6388_v44  ;;  %v6490_v24 = vcombine.high %v2016_v8, %v2020_v9  ;;  %v2027_v38 = vld [vmem:[#allocation7 + $0x360] sm:$0xff]  ;;  %v6502_v56 = vcombine.high %v2024_v39, %v2028_v40 }
 0x11a   : > { %8217 = vst [vmem:[#allocation47_spill] sm:$0xff] %v6454_v33  ;;  %8220 = vst [vmem:[#allocation50_spill] sm:$0xff] %v6464_v49  ;;  %v6500_v55 = vcombine.high %v2023_v25, %v2027_v38  ;;  %v2035_v13 = vld [vmem:[#allocation7 + $0x3a0] sm:$0xff]  ;;  %v6506_v1 = vcombine.low %v2023_v25, %v2027_v38  ;;  %v6508_v7 = vcombine.low %v2024_v39, %v2028_v40 }
 0x11b   : > { %2693 = vmatpush1.bf16.msra.mxu0 %v6360_v27  ;;  %2734 = vmatpush1.bf16.msra.mxu1 %v6362_v28  ;;  %8222 = vst [vmem:[#allocation52_spill] sm:$0xff] %v6470_v57  ;;  %8226 = vst [vmem:[#allocation56_spill] sm:$0xff] %v6482_v10  ;;  %v6512_v8 = vcombine.high %v2031_v48, %v2035_v13  ;;  %v6518_v25 = vcombine.low %v2031_v48, %v2035_v13 }
 0x11c   : > { %2694 = vmatprep.subr.bf16.mxu0 %v6366_v29  ;;  %2735 = vmatprep.subr.bf16.mxu1 %v6368_v30  ;;  %8227 = vst [vmem:[#allocation57_spill] sm:$0xff] %v6484_v18  ;;  %8228 = vst [vmem:[#allocation58_spill] sm:$0xff] %v6488_v23 }
 0x11d   : > { %8229 = vst [vmem:[#allocation59_spill] sm:$0xff] %v6490_v24  ;;  %8230 = vst [vmem:[#allocation60_spill] sm:$0xff] %v6494_v41 }
 0x11e   : > { %8231 = vst [vmem:[#allocation61_spill] sm:$0xff] %v6496_v51  ;;  %8232 = vst [vmem:[#allocation62_spill] sm:$0xff] %v6500_v55 }
 0x11f   : > { %2695 = vmatpush1.bf16.msra.mxu0 %v6374_v34  ;;  %2736 = vmatpush1.bf16.msra.mxu1 %v6376_v35  ;;  %8233 = vst [vmem:[#allocation63_spill] sm:$0xff] %v6502_v56  ;;  %8234 = vst [vmem:[#allocation64_spill] sm:$0xff] %v6506_v1 }
 0x120   : > { %2696 = vmatprep.subr.bf16.mxu0 %v6380_v36  ;;  %2737 = vmatprep.subr.bf16.mxu1 %v6382_v37  ;;  %8235 = vst [vmem:[#allocation65_spill] sm:$0xff] %v6508_v7  ;;  %8236 = vst [vmem:[#allocation66_spill] sm:$0xff] %v6512_v8 }
 0x121   : > { %8238 = vst [vmem:[#allocation68_spill] sm:$0xff] %v6518_v25 }
 0x123   : > { %2697 = vmatpush1.bf16.msra.mxu0 %v6386_v43  ;;  %2738 = vmatpush1.bf16.msra.mxu1 %v6388_v44 }
 0x124   : > { %2698 = vmatprep.subr.bf16.mxu0 %v6392_v45  ;;  %2739 = vmatprep.subr.bf16.mxu1 %v6394_v46 }
 0x127   : > { %2699 = vmatpush1.bf16.msra.mxu0 %v6398_v52  ;;  %2740 = vmatpush1.bf16.msra.mxu1 %v6400_v53 }
 0x128   : > { %2700 = vmatprep.subr.bf16.mxu0 %v6404_v5  ;;  %2741 = vmatprep.subr.bf16.mxu1 %v6406_v54 }
 0x12b   : > { %2701 = vmatpush1.bf16.msra.mxu0 %v6410_v58  ;;  %2742 = vmatpush1.bf16.msra.mxu1 %v6412_v59 }
 0x12c   : > { %2702 = vmatprep.subr.bf16.mxu0 %v6416_v60  ;;  %2743 = vmatprep.subr.bf16.mxu1 %v6418_v61 }
 0x12f   : > { %2703 = vmatpush1.bf16.msra.mxu0 %v6422_v2  ;;  %2744 = vmatpush1.bf16.msra.mxu1 %v6424_v3 }
 0x130   : > { %2704 = vmatprep.subr.bf16.mxu0 %v6428_v4  ;;  %2745 = vmatprep.subr.bf16.mxu1 %v6430_v6 }
 0x133   : > { %2705 = vmatpush1.bf16.msra.mxu0 %v6434_v11  ;;  %2746 = vmatpush1.bf16.msra.mxu1 %v6436_v15 }
 0x134   : > { %2706 = vmatprep.subr.bf16.mxu0 %v6440_v16  ;;  %2747 = vmatprep.subr.bf16.mxu1 %v6442_v17 }
 0x137   : > { %2707 = vmatpush1.bf16.msra.mxu0 %v6446_v26  ;;  %2748 = vmatpush1.bf16.msra.mxu1 %v6448_v31 }
 0x138   : > { %2708 = vmatprep.subr.bf16.mxu0 %v6452_v32  ;;  %2749 = vmatprep.subr.bf16.mxu1 %v6454_v33 }
 0x13b   : > { %2709 = vmatpush1.bf16.msra.mxu0 %v6458_v42  ;;  %2750 = vmatpush1.bf16.msra.mxu1 %v6460_v47 }
 0x13c   : > { %2710 = vmatprep.subr.bf16.mxu0 %v6464_v49  ;;  %2751 = vmatprep.subr.bf16.mxu1 %v6466_v50 }
 0x13f   : > { %2711 = vmatpush1.bf16.msra.mxu0 %v6470_v57  ;;  %2752 = vmatpush1.bf16.msra.mxu1 %v6472_v62  ;;  %v8250_v62 = vmov 0   ;;  %v2042_v57 = vld [vmem:[#allocation7 + $0x3d8] sm:$0xff] }
 0x140   : > { %2712 = vmatprep.subr.bf16.mxu0 %v6476_v63  ;;  %2753 = vmatprep.subr.bf16.mxu1 %v6478_v0  ;;  %v2032_v0 = vld [vmem:[#allocation7 + $0x388] sm:$0xff] }
 0x141   : > { %v2036_v63 = vld [vmem:[#allocation7 + $0x3a8] sm:$0xff] }
 0x142   : > { %v6514_v9 = vcombine.high %v2032_v0, %v2036_v63  ;;  %v6520_v38 = vcombine.low %v2032_v0, %v2036_v63 }
 0x143   : > { %2713 = vmatpush1.bf16.msra.mxu0 %v6482_v10  ;;  %2754 = vmatpush1.bf16.msra.mxu1 %v6484_v18  ;;  %v2040_v18 = vld [vmem:[#allocation7 + $0x3c8] sm:$0xff] }
 0x144   : > { %2714 = vmatprep.subr.bf16.mxu0 %v6488_v23  ;;  %2755 = vmatprep.subr.bf16.mxu1 %v6490_v24  ;;  %8237 = vst [vmem:[#allocation67_spill] sm:$0xff] %v6514_v9  ;;  %v2039_v24 = vld [vmem:[#allocation7 + $0x3c0] sm:$0xff]  ;;  %v2044_v10 = vld [vmem:[#allocation7 + $0x3e8] sm:$0xff]  ;;  %8239 = vst [vmem:[#allocation69_spill] sm:$0xff] %v6520_v38 }
 0x145   : > { %v2043_v23 = vld [vmem:[#allocation7 + $0x3e0] sm:$0xff]  ;;  %v6526_v40 = vcombine.high %v2040_v18, %v2044_v10  ;;  %v6532_v63 = vcombine.low %v2040_v18, %v2044_v10 }
 0x146   : > { %v6524_v39 = vcombine.high %v2039_v24, %v2043_v23  ;;  %v6530_v13 = vcombine.low %v2039_v24, %v2043_v23 }
 0x147   : > { %2715 = vmatpush1.bf16.msra.mxu0 %v6494_v41  ;;  %2756 = vmatpush1.bf16.msra.mxu1 %v6496_v51  ;;  %8241 = vst [vmem:[#allocation71_spill] sm:$0xff] %v6526_v40  ;;  %v1922_v51 = vld [vmem:[#allocation7 + $0x18] sm:$0xff]  ;;  %8243 = vst [vmem:[#allocation73_spill] sm:$0xff] %v6532_v63 }
 0x148   : > { %2716 = vmatprep.subr.bf16.mxu0 %v6500_v55  ;;  %2757 = vmatprep.subr.bf16.mxu1 %v6502_v56  ;;  %8240 = vst [vmem:[#allocation70_spill] sm:$0xff] %v6524_v39  ;;  %v1921_v56 = vld [vmem:[#allocation7 + $0x10] sm:$0xff]  ;;  %v1926_v41 = vld [vmem:[#allocation7 + $0x38] sm:$0xff]  ;;  %8242 = vst [vmem:[#allocation72_spill] sm:$0xff] %v6530_v13 }
 0x149   : > { %v1925_v55 = vld [vmem:[#allocation7 + $0x30] sm:$0xff]  ;;  %v6538_v48 = vcombine.high %v1922_v51, %v1926_v41  ;;  %v6544_v10 = vcombine.low %v1922_v51, %v1926_v41 }
 0x14a   : > { %v6536_v0 = vcombine.high %v1921_v56, %v1925_v55  ;;  %v6542_v23 = vcombine.low %v1921_v56, %v1925_v55 }
 0x14b   : > { %2717 = vmatpush1.bf16.msra.mxu0 %v6506_v1  ;;  %2758 = vmatpush1.bf16.msra.mxu1 %v6508_v7  ;;  %8245 = vst [vmem:[#allocation75_spill] sm:$0xff] %v6538_v48  ;;  %v1930_v7 = vld [vmem:[#allocation7 + $0x58] sm:$0xff]  ;;  %8247 = vst [vmem:[#allocation77_spill] sm:$0xff] %v6544_v10 }
 0x14c   : > { %2718 = vmatprep.subr.bf16.mxu0 %v6512_v8  ;;  %2759 = vmatprep.subr.bf16.mxu1 %v6514_v9  ;;  %8244 = vst [vmem:[#allocation74_spill] sm:$0xff] %v6536_v0  ;;  %v1929_v9 = vld [vmem:[#allocation7 + $0x50] sm:$0xff]  ;;  %v1934_v1 = vld [vmem:[#allocation7 + $0x78] sm:$0xff]  ;;  %8246 = vst [vmem:[#allocation76_spill] sm:$0xff] %v6542_v23 }
 0x14d   : > { %v1933_v8 = vld [vmem:[#allocation7 + $0x70] sm:$0xff]  ;;  %v6550_v24 = vcombine.high %v1930_v7, %v1934_v1  ;;  %v6558_v51 = vcombine.low %v1930_v7, %v1934_v1 }
 0x14e   : > { %v6548_v18 = vcombine.high %v1929_v9, %v1933_v8  ;;  %v6556_v41 = vcombine.low %v1929_v9, %v1933_v8 }
 0x14f   : > { %2719 = vmatpush1.bf16.msra.mxu0 %v6518_v25  ;;  %2760 = vmatpush1.bf16.msra.mxu1 %v6520_v38  ;;  %8249 = vst [vmem:[#allocation79_spill] sm:$0xff] %v6550_v24  ;;  %v1938_v38 = vld [vmem:[#allocation7 + $0x98] sm:$0xff]  ;;  %8252 = vst [vmem:[#allocation81_spill] sm:$0xff] %v6558_v51 }
 0x150   : > { %2720 = vmatprep.subr.bf16.mxu0 %v6524_v39  ;;  %2761 = vmatprep.subr.bf16.mxu1 %v6526_v40  ;;  %8248 = vst [vmem:[#allocation78_spill] sm:$0xff] %v6548_v18  ;;  %v1937_v40 = vld [vmem:[#allocation7 + $0x90] sm:$0xff]  ;;  %v1942_v25 = vld [vmem:[#allocation7 + $0xb8] sm:$0xff]  ;;  %8251 = vst [vmem:[#allocation80_spill] sm:$0xff] %v6556_v41 }
 0x151   : > { %v1941_v39 = vld [vmem:[#allocation7 + $0xb0] sm:$0xff]  ;;  %v6564_v56 = vcombine.high %v1938_v38, %v1942_v25  ;;  %v6572_v7 = vcombine.low %v1938_v38, %v1942_v25 }
 0x152   : > { %v6562_v55 = vcombine.high %v1937_v40, %v1941_v39  ;;  %v6570_v1 = vcombine.low %v1937_v40, %v1941_v39 }
 0x153   : > { %2721 = vmatpush1.bf16.msra.mxu0 %v6530_v13  ;;  %2762 = vmatpush1.bf16.msra.mxu1 %v6532_v63  ;;  %8254 = vst [vmem:[#allocation83_spill] sm:$0xff] %v6564_v56  ;;  %v1946_v63 = vld [vmem:[#allocation7 + $0xd8] sm:$0xff]  ;;  %8256 = vst [vmem:[#allocation85_spill] sm:$0xff] %v6572_v7 }
 0x154   : > { %2772 = vmatprep.subr.bf16.mxu0 %v6536_v0  ;;  %2813 = vmatprep.subr.bf16.mxu1 %v6538_v48  ;;  %8253 = vst [vmem:[#allocation82_spill] sm:$0xff] %v6562_v55  ;;  %v1945_v48 = vld [vmem:[#allocation7 + $0xd0] sm:$0xff]  ;;  %v1950_v13 = vld [vmem:[#allocation7 + $0xf8] sm:$0xff]  ;;  %8255 = vst [vmem:[#allocation84_spill] sm:$0xff] %v6570_v1 }
 0x155   : > { %v1949_v0 = vld [vmem:[#allocation7 + $0xf0] sm:$0xff]  ;;  %v6578_v9 = vcombine.high %v1946_v63, %v1950_v13  ;;  %v6584_v25 = vcombine.low %v1946_v63, %v1950_v13 }
 0x156   : > { %2723 = vmatmul.mubr.bf16.vlgmr.msra.gmra.mrb[8].mxu0 %v8250_v62  ;;  %2764 = vmatmul.mubr.bf16.vlgmr.msra.gmra.mrb[8].mxu1 %v8250_v62  ;;  %v6576_v8 = vcombine.high %v1945_v48, %v1949_v0  ;;  %v6582_v39 = vcombine.low %v1945_v48, %v1949_v0 }
 0x157   : > { %2773 = vmatpush1.bf16.msra.mxu0 %v6542_v23  ;;  %2814 = vmatpush1.bf16.msra.mxu1 %v6544_v10  ;;  %8258 = vst [vmem:[#allocation87_spill] sm:$0xff] %v6578_v9  ;;  %v1954_v10 = vld [vmem:[#allocation7 + $0x118] sm:$0xff]  ;;  %8260 = vst [vmem:[#allocation89_spill] sm:$0xff] %v6584_v25 }
 0x158   : > { %2774 = vmatprep.subr.bf16.mxu0 %v6548_v18  ;;  %2815 = vmatprep.subr.bf16.mxu1 %v6550_v24  ;;  %8257 = vst [vmem:[#allocation86_spill] sm:$0xff] %v6576_v8  ;;  %v1953_v24 = vld [vmem:[#allocation7 + $0x110] sm:$0xff]  ;;  %v1958_v23 = vld [vmem:[#allocation7 + $0x138] sm:$0xff]  ;;  %8259 = vst [vmem:[#allocation88_spill] sm:$0xff] %v6582_v39 }
 0x159   : > { %2804 = vmatprep.mubr.bf16.mxu0 %v8250_v62  ;;  %2845 = vmatprep.mubr.bf16.mxu1 %v8250_v62  ;;  %v1957_v18 = vld [vmem:[#allocation7 + $0x130] sm:$0xff]  ;;  %v6590_v40 = vcombine.high %v1954_v10, %v1958_v23  ;;  %v6596_v13 = vcombine.low %v1954_v10, %v1958_v23 }
 0x15a   : > { %v6588_v38 = vcombine.high %v1953_v24, %v1957_v18  ;;  %v6594_v0 = vcombine.low %v1953_v24, %v1957_v18 }
 0x15b   : > { %2775 = vmatpush1.bf16.msra.mxu0 %v6556_v41  ;;  %2816 = vmatpush1.bf16.msra.mxu1 %v6558_v51  ;;  %8262 = vst [vmem:[#allocation91_spill] sm:$0xff] %v6590_v40  ;;  %v1962_v51 = vld [vmem:[#allocation7 + $0x158] sm:$0xff]  ;;  %8264 = vst [vmem:[#allocation93_spill] sm:$0xff] %v6596_v13 }
 0x15c   : > { %2776 = vmatprep.subr.bf16.mxu0 %v6562_v55  ;;  %2817 = vmatprep.subr.bf16.mxu1 %v6564_v56  ;;  %8261 = vst [vmem:[#allocation90_spill] sm:$0xff] %v6588_v38  ;;  %v1961_v56 = vld [vmem:[#allocation7 + $0x150] sm:$0xff]  ;;  %v1966_v41 = vld [vmem:[#allocation7 + $0x178] sm:$0xff]  ;;  %8263 = vst [vmem:[#allocation92_spill] sm:$0xff] %v6594_v0 }
 0x15d   : > { %v1965_v55 = vld [vmem:[#allocation7 + $0x170] sm:$0xff]  ;;  %v6602_v48 = vcombine.high %v1962_v51, %v1966_v41  ;;  %v6608_v23 = vcombine.low %v1962_v51, %v1966_v41 }
 0x15e   : > { %v6600_v63 = vcombine.high %v1961_v56, %v1965_v55  ;;  %v6606_v18 = vcombine.low %v1961_v56, %v1965_v55 }
 0x15f   : > { %2777 = vmatpush1.bf16.msra.mxu0 %v6570_v1  ;;  %2818 = vmatpush1.bf16.msra.mxu1 %v6572_v7  ;;  %8266 = vst [vmem:[#allocation95_spill] sm:$0xff] %v6602_v48  ;;  %v1970_v7 = vld [vmem:[#allocation7 + $0x198] sm:$0xff]  ;;  %8268 = vst [vmem:[#allocation97_spill] sm:$0xff] %v6608_v23 }
 0x160   : > { %2778 = vmatprep.subr.bf16.mxu0 %v6576_v8  ;;  %2819 = vmatprep.subr.bf16.mxu1 %v6578_v9  ;;  %8265 = vst [vmem:[#allocation94_spill] sm:$0xff] %v6600_v63  ;;  %v1969_v9 = vld [vmem:[#allocation7 + $0x190] sm:$0xff]  ;;  %v1974_v1 = vld [vmem:[#allocation7 + $0x1b8] sm:$0xff]  ;;  %8267 = vst [vmem:[#allocation96_spill] sm:$0xff] %v6606_v18 }
 0x161   : > { %v1973_v8 = vld [vmem:[#allocation7 + $0x1b0] sm:$0xff]  ;;  %v6614_v24 = vcombine.high %v1970_v7, %v1974_v1  ;;  %v6620_v41 = vcombine.low %v1970_v7, %v1974_v1 }
 0x162   : > { %v6612_v10 = vcombine.high %v1969_v9, %v1973_v8  ;;  %v6618_v55 = vcombine.low %v1969_v9, %v1973_v8 }
 0x163   : > { %2779 = vmatpush1.bf16.msra.mxu0 %v6582_v39  ;;  %2820 = vmatpush1.bf16.msra.mxu1 %v6584_v25  ;;  %8270 = vst [vmem:[#allocation99_spill] sm:$0xff] %v6614_v24  ;;  %v1978_v25 = vld [vmem:[#allocation7 + $0x1d8] sm:$0xff]  ;;  %8272 = vst [vmem:[#allocation101_spill] sm:$0xff] %v6620_v41 }
 0x164   : > { %2780 = vmatprep.subr.bf16.mxu0 %v6588_v38  ;;  %2821 = vmatprep.subr.bf16.mxu1 %v6590_v40  ;;  %8269 = vst [vmem:[#allocation98_spill] sm:$0xff] %v6612_v10  ;;  %v1977_v40 = vld [vmem:[#allocation7 + $0x1d0] sm:$0xff]  ;;  %v1982_v39 = vld [vmem:[#allocation7 + $0x1f8] sm:$0xff]  ;;  %8271 = vst [vmem:[#allocation100_spill] sm:$0xff] %v6618_v55 }
 0x165   : > { %v1981_v38 = vld [vmem:[#allocation7 + $0x1f0] sm:$0xff]  ;;  %v6626_v56 = vcombine.high %v1978_v25, %v1982_v39  ;;  %v6632_v1 = vcombine.low %v1978_v25, %v1982_v39 }
 0x166   : > { %v6624_v51 = vcombine.high %v1977_v40, %v1981_v38  ;;  %v6630_v8 = vcombine.low %v1977_v40, %v1981_v38 }
 0x167   : > { %2781 = vmatpush1.bf16.msra.mxu0 %v6594_v0  ;;  %2822 = vmatpush1.bf16.msra.mxu1 %v6596_v13  ;;  %8274 = vst [vmem:[#allocation103_spill] sm:$0xff] %v6626_v56  ;;  %v1986_v13 = vld [vmem:[#allocation7 + $0x218] sm:$0xff]  ;;  %8276 = vst [vmem:[#allocation105_spill] sm:$0xff] %v6632_v1 }
 0x168   : > { %2782 = vmatprep.subr.bf16.mxu0 %v6600_v63  ;;  %2823 = vmatprep.subr.bf16.mxu1 %v6602_v48  ;;  %8273 = vst [vmem:[#allocation102_spill] sm:$0xff] %v6624_v51  ;;  %v1985_v48 = vld [vmem:[#allocation7 + $0x210] sm:$0xff]  ;;  %v1990_v0 = vld [vmem:[#allocation7 + $0x238] sm:$0xff]  ;;  %8275 = vst [vmem:[#allocation104_spill] sm:$0xff] %v6630_v8 }
 0x169   : > { %v1989_v63 = vld [vmem:[#allocation7 + $0x230] sm:$0xff]  ;;  %v6638_v9 = vcombine.high %v1986_v13, %v1990_v0  ;;  %v6644_v39 = vcombine.low %v1986_v13, %v1990_v0 }
 0x16a   : > { %v6636_v7 = vcombine.high %v1985_v48, %v1989_v63  ;;  %v6642_v38 = vcombine.low %v1985_v48, %v1989_v63 }
 0x16b   : > { %2783 = vmatpush1.bf16.msra.mxu0 %v6606_v18  ;;  %2824 = vmatpush1.bf16.msra.mxu1 %v6608_v23  ;;  %8278 = vst [vmem:[#allocation107_spill] sm:$0xff] %v6638_v9  ;;  %v1994_v23 = vld [vmem:[#allocation7 + $0x258] sm:$0xff]  ;;  %8280 = vst [vmem:[#allocation109_spill] sm:$0xff] %v6644_v39 }
 0x16c   : > { %2784 = vmatprep.subr.bf16.mxu0 %v6612_v10  ;;  %2825 = vmatprep.subr.bf16.mxu1 %v6614_v24  ;;  %8277 = vst [vmem:[#allocation106_spill] sm:$0xff] %v6636_v7  ;;  %v1993_v24 = vld [vmem:[#allocation7 + $0x250] sm:$0xff]  ;;  %v1998_v18 = vld [vmem:[#allocation7 + $0x278] sm:$0xff]  ;;  %8279 = vst [vmem:[#allocation108_spill] sm:$0xff] %v6642_v38 }
 0x16d   : > { %v1997_v10 = vld [vmem:[#allocation7 + $0x270] sm:$0xff]  ;;  %v6650_v40 = vcombine.high %v1994_v23, %v1998_v18  ;;  %v6656_v0 = vcombine.low %v1994_v23, %v1998_v18 }
 0x16e   : > { %v6648_v25 = vcombine.high %v1993_v24, %v1997_v10  ;;  %v6654_v63 = vcombine.low %v1993_v24, %v1997_v10 }
 0x16f   : > { %2785 = vmatpush1.bf16.msra.mxu0 %v6618_v55  ;;  %2826 = vmatpush1.bf16.msra.mxu1 %v6620_v41  ;;  %8282 = vst [vmem:[#allocation111_spill] sm:$0xff] %v6650_v40  ;;  %v2002_v41 = vld [vmem:[#allocation7 + $0x298] sm:$0xff]  ;;  %8284 = vst [vmem:[#allocation113_spill] sm:$0xff] %v6656_v0 }
 0x170   : > { %2786 = vmatprep.subr.bf16.mxu0 %v6624_v51  ;;  %2827 = vmatprep.subr.bf16.mxu1 %v6626_v56  ;;  %8281 = vst [vmem:[#allocation110_spill] sm:$0xff] %v6648_v25  ;;  %v2001_v56 = vld [vmem:[#allocation7 + $0x290] sm:$0xff]  ;;  %v2006_v55 = vld [vmem:[#allocation7 + $0x2b8] sm:$0xff]  ;;  %8283 = vst [vmem:[#allocation112_spill] sm:$0xff] %v6654_v63 }
 0x171   : > { %v2005_v51 = vld [vmem:[#allocation7 + $0x2b0] sm:$0xff]  ;;  %v6662_v48 = vcombine.high %v2002_v41, %v2006_v55  ;;  %v6668_v18 = vcombine.low %v2002_v41, %v2006_v55 }
 0x172   : > { %v6660_v13 = vcombine.high %v2001_v56, %v2005_v51  ;;  %v6666_v10 = vcombine.low %v2001_v56, %v2005_v51 }
 0x173   : > { %2787 = vmatpush1.bf16.msra.mxu0 %v6630_v8  ;;  %2828 = vmatpush1.bf16.msra.mxu1 %v6632_v1  ;;  %8286 = vst [vmem:[#allocation115_spill] sm:$0xff] %v6662_v48  ;;  %v2010_v1 = vld [vmem:[#allocation7 + $0x2d8] sm:$0xff]  ;;  %8288 = vst [vmem:[#allocation117_spill] sm:$0xff] %v6668_v18 }
 0x174   : > { %2788 = vmatprep.subr.bf16.mxu0 %v6636_v7  ;;  %2829 = vmatprep.subr.bf16.mxu1 %v6638_v9  ;;  %8285 = vst [vmem:[#allocation114_spill] sm:$0xff] %v6660_v13  ;;  %v2009_v9 = vld [vmem:[#allocation7 + $0x2d0] sm:$0xff]  ;;  %v2014_v8 = vld [vmem:[#allocation7 + $0x2f8] sm:$0xff]  ;;  %8287 = vst [vmem:[#allocation116_spill] sm:$0xff] %v6666_v10 }
 0x175   : > { %v2013_v7 = vld [vmem:[#allocation7 + $0x2f0] sm:$0xff]  ;;  %v6674_v24 = vcombine.high %v2010_v1, %v2014_v8  ;;  %v6680_v55 = vcombine.low %v2010_v1, %v2014_v8 }
 0x176   : > { %v6672_v23 = vcombine.high %v2009_v9, %v2013_v7  ;;  %v6678_v51 = vcombine.low %v2009_v9, %v2013_v7 }
 0x177   : > { %2789 = vmatpush1.bf16.msra.mxu0 %v6642_v38  ;;  %2830 = vmatpush1.bf16.msra.mxu1 %v6644_v39  ;;  %8290 = vst [vmem:[#allocation119_spill] sm:$0xff] %v6674_v24  ;;  %v2018_v39 = vld [vmem:[#allocation7 + $0x318] sm:$0xff]  ;;  %8292 = vst [vmem:[#allocation121_spill] sm:$0xff] %v6680_v55 }
 0x178   : > { %2790 = vmatprep.subr.bf16.mxu0 %v6648_v25  ;;  %2831 = vmatprep.subr.bf16.mxu1 %v6650_v40  ;;  %8289 = vst [vmem:[#allocation118_spill] sm:$0xff] %v6672_v23  ;;  %v2017_v40 = vld [vmem:[#allocation7 + $0x310] sm:$0xff]  ;;  %v2022_v38 = vld [vmem:[#allocation7 + $0x338] sm:$0xff]  ;;  %8291 = vst [vmem:[#allocation120_spill] sm:$0xff] %v6678_v51 }
 0x179   : > { %v2021_v25 = vld [vmem:[#allocation7 + $0x330] sm:$0xff]  ;;  %v6686_v56 = vcombine.high %v2018_v39, %v2022_v38  ;;  %v6692_v8 = vcombine.low %v2018_v39, %v2022_v38 }
 0x17a   : > { %v6684_v41 = vcombine.high %v2017_v40, %v2021_v25  ;;  %v6690_v7 = vcombine.low %v2017_v40, %v2021_v25 }
 0x17b   : > { %2791 = vmatpush1.bf16.msra.mxu0 %v6654_v63  ;;  %2832 = vmatpush1.bf16.msra.mxu1 %v6656_v0  ;;  %8294 = vst [vmem:[#allocation123_spill] sm:$0xff] %v6686_v56  ;;  %v2026_v0 = vld [vmem:[#allocation7 + $0x358] sm:$0xff]  ;;  %8296 = vst [vmem:[#allocation125_spill] sm:$0xff] %v6692_v8 }
 0x17c   : > { %2792 = vmatprep.subr.bf16.mxu0 %v6660_v13  ;;  %2833 = vmatprep.subr.bf16.mxu1 %v6662_v48  ;;  %8293 = vst [vmem:[#allocation122_spill] sm:$0xff] %v6684_v41  ;;  %v2025_v48 = vld [vmem:[#allocation7 + $0x350] sm:$0xff]  ;;  %v2030_v63 = vld [vmem:[#allocation7 + $0x378] sm:$0xff]  ;;  %8295 = vst [vmem:[#allocation124_spill] sm:$0xff] %v6690_v7 }
 0x17d   : > { %v2029_v13 = vld [vmem:[#allocation7 + $0x370] sm:$0xff]  ;;  %v6698_v9 = vcombine.high %v2026_v0, %v2030_v63  ;;  %v6704_v38 = vcombine.low %v2026_v0, %v2030_v63 }
 0x17e   : > { %v6696_v1 = vcombine.high %v2025_v48, %v2029_v13  ;;  %v6702_v25 = vcombine.low %v2025_v48, %v2029_v13 }
 0x17f   : > { %2793 = vmatpush1.bf16.msra.mxu0 %v6666_v10  ;;  %2834 = vmatpush1.bf16.msra.mxu1 %v6668_v18  ;;  %8298 = vst [vmem:[#allocation127_spill] sm:$0xff] %v6698_v9  ;;  %v2034_v18 = vld [vmem:[#allocation7 + $0x398] sm:$0xff]  ;;  %8300 = vst [vmem:[#allocation129_spill] sm:$0xff] %v6704_v38 }
 0x180   : > { %2794 = vmatprep.subr.bf16.mxu0 %v6672_v23  ;;  %2835 = vmatprep.subr.bf16.mxu1 %v6674_v24  ;;  %8297 = vst [vmem:[#allocation126_spill] sm:$0xff] %v6696_v1  ;;  %v2033_v24 = vld [vmem:[#allocation7 + $0x390] sm:$0xff]  ;;  %v2038_v10 = vld [vmem:[#allocation7 + $0x3b8] sm:$0xff]  ;;  %8299 = vst [vmem:[#allocation128_spill] sm:$0xff] %v6702_v25 }
 0x181   : > { %v2037_v23 = vld [vmem:[#allocation7 + $0x3b0] sm:$0xff]  ;;  %v6710_v40 = vcombine.high %v2034_v18, %v2038_v10 }
 0x182   : > { %v6708_v39 = vcombine.high %v2033_v24, %v2037_v23 }
 0x183   : > { %2795 = vmatpush1.bf16.msra.mxu0 %v6678_v51  ;;  %2836 = vmatpush1.bf16.msra.mxu1 %v6680_v55  ;;  %8302 = vst [vmem:[#allocation131_spill] sm:$0xff] %v6710_v40  ;;  %v2045_v51 = vld [vmem:[#allocation7 + $0x3f0] sm:$0xff] }
 0x184   : > { %2796 = vmatprep.subr.bf16.mxu0 %v6684_v41  ;;  %2837 = vmatprep.subr.bf16.mxu1 %v6686_v56  ;;  %8301 = vst [vmem:[#allocation130_spill] sm:$0xff] %v6708_v39  ;;  %v2041_v56 = vld [vmem:[#allocation7 + $0x3d0] sm:$0xff] }
 0x187   : > { %2797 = vmatpush1.bf16.msra.mxu0 %v6690_v7  ;;  %2838 = vmatpush1.bf16.msra.mxu1 %v6692_v8  ;;  %v2046_v7 = vld [vmem:[#allocation7 + $0x3f8] sm:$0xff] }
 0x188   : > { %2798 = vmatprep.subr.bf16.mxu0 %v6696_v1  ;;  %2839 = vmatprep.subr.bf16.mxu1 %v6698_v9  ;;  %v6714_v9 = vcombine.low %v2033_v24, %v2037_v23  ;;  %v6716_v1 = vcombine.low %v2034_v18, %v2038_v10  ;;  %v6728_v23 = vcombine.low %v2042_v57, %v2046_v7  ;;  %v8312_v10 = vld [vmem:[#allocation54_spill] sm:$0xff]  ;;  %v8313_v18 = vld [vmem:[#allocation55_spill] sm:$0xff]  ;;  %v8314_v24 = vld [vmem:[#allocation56_spill] sm:$0xff] }
 0x189   : > { %v1011_v41 = vpop.f32.mrb[0].mxu0  ;;  %v1093_v55 = vpop.f32.mrb[0].mxu1 }
 0x18a   : > { %1911 = vst [vmem:[#allocation2] sm:$0xff] %v1011_v41  ;;  %1915 = vst [vmem:[#allocation2 + $0x20] sm:$0xff] %v1093_v55  ;;  %v1013_v13 = vpop.f32.mrb[1].mxu0  ;;  %v1095_v48 = vpop.f32.mrb[1].mxu1  ;;  %v6720_v55 = vcombine.high %v2041_v56, %v2045_v51  ;;  %v6722_v41 = vcombine.high %v2042_v57, %v2046_v7  ;;  %v8310_v57 = vld [vmem:[#allocation52_spill] sm:$0xff]  ;;  %v8317_v7 = vld [vmem:[#allocation59_spill] sm:$0xff] }
 0x18b   : > { %1913 = vst [vmem:[#allocation2 + $0x10] sm:$0xff] %v1013_v13  ;;  %1917 = vst [vmem:[#allocation2 + $0x30] sm:$0xff] %v1095_v48  ;;  %v1015_v63 = vpop.f32.mrb[2].mxu0  ;;  %v1097_v0 = vpop.f32.mrb[2].mxu1  ;;  %2799 = vmatpush1.bf16.msra.mxu0 %v6702_v25  ;;  %2840 = vmatpush1.bf16.msra.mxu1 %v6704_v38  ;;  %v6726_v13 = vcombine.low %v2041_v56, %v2045_v51  ;;  %v8315_v51 = vld [vmem:[#allocation57_spill] sm:$0xff]  ;;  %v8316_v56 = vld [vmem:[#allocation58_spill] sm:$0xff] }
 0x18c   : > { %8303 = vst [vmem:[#allocation132_spill] sm:$0xff] %v6714_v9  ;;  %8304 = vst [vmem:[#allocation133_spill] sm:$0xff] %v6716_v1  ;;  %v1016_v8 = vpop.f32.mrb[3].mxu0  ;;  %v1098_v50 = vpop.f32.mrb[3].mxu1  ;;  %2800 = vmatprep.subr.bf16.mxu0 %v6708_v39  ;;  %2841 = vmatprep.subr.bf16.mxu1 %v6710_v40  ;;  %v8319_v48 = vld [vmem:[#allocation61_spill] sm:$0xff]  ;;  %v8320_v63 = vld [vmem:[#allocation62_spill] sm:$0xff] }
 0x18d   : > { %8305 = vst [vmem:[#allocation134_spill] sm:$0xff] %v6720_v55  ;;  %8306 = vst [vmem:[#allocation135_spill] sm:$0xff] %v6722_v41  ;;  %v8309_v50 = vld [vmem:[#allocation51_spill] sm:$0xff]  ;;  %v8318_v8 = vld [vmem:[#allocation60_spill] sm:$0xff] }
 0x18e   : > { %8307 = vst [vmem:[#allocation136_spill] sm:$0xff] %v6726_v13  ;;  %8308 = vst [vmem:[#allocation137_spill] sm:$0xff] %v6728_v23  ;;  %v8321_v0 = vld [vmem:[#allocation63_spill] sm:$0xff] }
 0x18f   : > { %2801 = vmatpush1.bf16.msra.mxu0 %v6714_v9  ;;  %2842 = vmatpush1.bf16.msra.mxu1 %v6716_v1 }
 0x190   : > { %2802 = vmatprep.subr.bf16.mxu0 %v6720_v55  ;;  %2843 = vmatprep.subr.bf16.mxu1 %v6722_v41 }
 0x193   : > { %2803 = vmatpush1.bf16.msra.mxu0 %v6726_v13  ;;  %2844 = vmatpush1.bf16.msra.mxu1 %v6728_v23 }
 0x194   : > { %2950 = vmatprep.subr.bf16.mxu0 %v6342_v12  ;;  %2991 = vmatprep.subr.bf16.mxu1 %v6344_v14 }
 0x196   : > { %2805 = vmatmul.mubr.bf16.vlgmr.msra.gmra.mrb[12].mxu0 %v8250_v62  ;;  %2846 = vmatmul.mubr.bf16.vlgmr.msra.gmra.mrb[12].mxu1 %v8250_v62  ;;  %v8311_v62 = vld [vmem:[#allocation53_spill] sm:$0xff] }
 0x197   : > { %2951 = vmatpush1.bf16.msra.mxu0 %v6346_v19  ;;  %2992 = vmatpush1.bf16.msra.mxu1 %v6348_v20 }
 0x198   : > { %2952 = vmatprep.subr.bf16.mxu0 %v6352_v21  ;;  %2993 = vmatprep.subr.bf16.mxu1 %v6354_v22 }
 0x19b   : > { %2953 = vmatpush1.bf16.msra.mxu0 %v6360_v27  ;;  %2994 = vmatpush1.bf16.msra.mxu1 %v6362_v28 }
 0x19c   : > { %2954 = vmatprep.subr.bf16.mxu0 %v6366_v29  ;;  %2995 = vmatprep.subr.bf16.mxu1 %v6368_v30 }
 0x19f   : > { %2955 = vmatpush1.bf16.msra.mxu0 %v6374_v34  ;;  %2996 = vmatpush1.bf16.msra.mxu1 %v6376_v35 }
 0x1a0   : > { %2956 = vmatprep.subr.bf16.mxu0 %v6380_v36  ;;  %2997 = vmatprep.subr.bf16.mxu1 %v6382_v37 }
 0x1a3   : > { %2957 = vmatpush1.bf16.msra.mxu0 %v6386_v43  ;;  %2998 = vmatpush1.bf16.msra.mxu1 %v6388_v44 }
 0x1a4   : > { %2958 = vmatprep.subr.bf16.mxu0 %v6392_v45  ;;  %2999 = vmatprep.subr.bf16.mxu1 %v6394_v46 }
 0x1a7   : > { %2959 = vmatpush1.bf16.msra.mxu0 %v6398_v52  ;;  %3000 = vmatpush1.bf16.msra.mxu1 %v6400_v53 }
 0x1a8   : > { %2960 = vmatprep.subr.bf16.mxu0 %v6404_v5  ;;  %3001 = vmatprep.subr.bf16.mxu1 %v6406_v54 }
 0x1ab   : > { %2961 = vmatpush1.bf16.msra.mxu0 %v6410_v58  ;;  %3002 = vmatpush1.bf16.msra.mxu1 %v6412_v59 }
 0x1ac   : > { %2962 = vmatprep.subr.bf16.mxu0 %v6416_v60  ;;  %3003 = vmatprep.subr.bf16.mxu1 %v6418_v61 }
 0x1af   : > { %2963 = vmatpush1.bf16.msra.mxu0 %v6422_v2  ;;  %3004 = vmatpush1.bf16.msra.mxu1 %v6424_v3 }
 0x1b0   : > { %2964 = vmatprep.subr.bf16.mxu0 %v6428_v4  ;;  %3005 = vmatprep.subr.bf16.mxu1 %v6430_v6 }
 0x1b3   : > { %2965 = vmatpush1.bf16.msra.mxu0 %v6434_v11  ;;  %3006 = vmatpush1.bf16.msra.mxu1 %v6436_v15 }
 0x1b4   : > { %2966 = vmatprep.subr.bf16.mxu0 %v6440_v16  ;;  %3007 = vmatprep.subr.bf16.mxu1 %v6442_v17 }
 0x1b7   : > { %2967 = vmatpush1.bf16.msra.mxu0 %v6446_v26  ;;  %3008 = vmatpush1.bf16.msra.mxu1 %v6448_v31 }
 0x1b8   : > { %2968 = vmatprep.subr.bf16.mxu0 %v6452_v32  ;;  %3009 = vmatprep.subr.bf16.mxu1 %v6454_v33 }
 0x1bb   : > { %2969 = vmatpush1.bf16.msra.mxu0 %v6458_v42  ;;  %3010 = vmatpush1.bf16.msra.mxu1 %v6460_v47 }
 0x1bc   : > { %2970 = vmatprep.subr.bf16.mxu0 %v6464_v49  ;;  %3011 = vmatprep.subr.bf16.mxu1 %v8309_v50 }
 0x1bf   : > { %2971 = vmatpush1.bf16.msra.mxu0 %v8310_v57  ;;  %3012 = vmatpush1.bf16.msra.mxu1 %v8311_v62  ;;  %v8322_v62 = vld [vmem:[#allocation64_spill] sm:$0xff] }
 0x1c0   : > { %2972 = vmatprep.subr.bf16.mxu0 %v8312_v10  ;;  %3013 = vmatprep.subr.bf16.mxu1 %v8313_v18  ;;  %v8323_v10 = vld [vmem:[#allocation65_spill] sm:$0xff]  ;;  %v8324_v18 = vld [vmem:[#allocation66_spill] sm:$0xff] }
 0x1c3   : > { %2973 = vmatpush1.bf16.msra.mxu0 %v8314_v24  ;;  %3014 = vmatpush1.bf16.msra.mxu1 %v8315_v51  ;;  %v8325_v24 = vld [vmem:[#allocation67_spill] sm:$0xff]  ;;  %v8326_v51 = vld [vmem:[#allocation68_spill] sm:$0xff] }
 0x1c4   : > { %2974 = vmatprep.subr.bf16.mxu0 %v8316_v56  ;;  %3015 = vmatprep.subr.bf16.mxu1 %v8317_v7  ;;  %v8327_v56 = vld [vmem:[#allocation69_spill] sm:$0xff]  ;;  %v8328_v7 = vld [vmem:[#allocation70_spill] sm:$0xff] }
 0x1c7   : > { %2975 = vmatpush1.bf16.msra.mxu0 %v8318_v8  ;;  %3016 = vmatpush1.bf16.msra.mxu1 %v8319_v48  ;;  %v8329_v8 = vld [vmem:[#allocation71_spill] sm:$0xff]  ;;  %v8330_v48 = vld [vmem:[#allocation72_spill] sm:$0xff] }
 0x1c8   : > { %2976 = vmatprep.subr.bf16.mxu0 %v8320_v63  ;;  %3017 = vmatprep.subr.bf16.mxu1 %v8321_v0  ;;  %v8331_v63 = vld [vmem:[#allocation73_spill] sm:$0xff]  ;;  %v8332_v0 = vld [vmem:[#allocation74_spill] sm:$0xff] }
 0x1cb   : > { %2977 = vmatpush1.bf16.msra.mxu0 %v8322_v62  ;;  %3018 = vmatpush1.bf16.msra.mxu1 %v8323_v10  ;;  %v8333_v62 = vld [vmem:[#allocation75_spill] sm:$0xff] }
 0x1cc   : > { %2978 = vmatprep.subr.bf16.mxu0 %v8324_v18  ;;  %3019 = vmatprep.subr.bf16.mxu1 %v8325_v24 }
 0x1cf   : > { %2979 = vmatpush1.bf16.msra.mxu0 %v8326_v51  ;;  %3020 = vmatpush1.bf16.msra.mxu1 %v8327_v56 }
 0x1d0   : > { %2980 = vmatprep.subr.bf16.mxu0 %v8328_v7  ;;  %3021 = vmatprep.subr.bf16.mxu1 %v8329_v8 }
 0x1d3   : > { %2981 = vmatpush1.bf16.msra.mxu0 %v8330_v48  ;;  %3022 = vmatpush1.bf16.msra.mxu1 %v8331_v63 }
 0x1d4   : > { %3032 = vmatprep.subr.bf16.mxu0 %v8332_v0  ;;  %3073 = vmatprep.subr.bf16.mxu1 %v8333_v62 }
 0x1e9   : > { %v1751_v24 = vpop.f32.mrb[4].mxu0  ;;  %v1833_v56 = vpop.f32.mrb[4].mxu1 }
 0x1ea   : > { %v1844_v7 = vrot.slane %v1751_v24, 7  ;;  %v1852_v51 = vrot.slane %v1751_v24, 5  ;;  %v1860_v8 = vrot.slane %v1751_v24, 3  ;;  %v1868_v18 = vrot.slane %v1751_v24, 1  ;;  %v1753_v48 = vpop.f32.mrb[5].mxu0  ;;  %v1835_v10 = vpop.f32.mrb[5].mxu1 }
 0x1eb   : > { %v1846_v63 = vrot.slane %v1833_v56, 7  ;;  %v1854_v57 = vrot.slane %v1833_v56, 5  ;;  %v1862_v0 = vrot.slane %v1833_v56, 3  ;;  %v1870_v50 = vrot.slane %v1833_v56, 1  ;;  %v1755_v62 = vpop.f32.mrb[6].mxu0  ;;  %v1837_v49 = vpop.f32.mrb[6].mxu1 }
 0x1ec   : > { %v1877_v47 = vsel %vm1876_vm0, %v1844_v7, %v1852_v51  ;;  %v1845_v42 = vrot.slane %v1753_v48, 7  ;;  %v1853_v33 = vrot.slane %v1753_v48, 5  ;;  %v1861_v32 = vrot.slane %v1753_v48, 3  ;;  %v1756_v31 = vpop.f32.mrb[7].mxu0  ;;  %v1838_v26 = vpop.f32.mrb[7].mxu1 }
 0x1ed   : > { %v1882_v17 = vsel %vm1881_vm1, %v1877_v47, %v1860_v8  ;;  %v1879_v16 = vsel %vm1876_vm0, %v1846_v63, %v1854_v57  ;;  %v1869_v24 = vrot.slane %v1753_v48, 1  ;;  %v1847_v15 = vrot.slane %v1835_v10, 7 }
 0x1ee   : > { %v1887_v11 = vsel %vm1886_vm2, %v1882_v17, %v1868_v18  ;;  %v1884_v6 = vsel %vm1881_vm1, %v1879_v16, %v1862_v0  ;;  %v1878_v62 = vsel %vm1876_vm0, %v1845_v42, %v1853_v33  ;;  %v1855_v49 = vrot.slane %v1835_v10, 5 }
 0x1ef   : > { %v1892_v56 = vsel %vm1891_vm3, %v1887_v11, %v1844_v7  ;;  %v1889_v4 = vsel %vm1886_vm2, %v1884_v6, %v1870_v50  ;;  %v1883_v31 = vsel %vm1881_vm1, %v1878_v62, %v1861_v32  ;;  %v1863_v26 = vrot.slane %v1835_v10, 3 }
 0x1f0   : > { %v1897_v47 = vsel %vm1896_vm4, %v1892_v56, %v1852_v51  ;;  %v1894_v3 = vsel %vm1891_vm3, %v1889_v4, %v1846_v63  ;;  %v1888_v48 = vsel %vm1886_vm2, %v1883_v31, %v1869_v24  ;;  %v1871_v2 = vrot.slane %v1835_v10, 1 }
 0x1f1   : > { %v1902_v17 = vsel %vm1901_vm5, %v1897_v47, %v1860_v8  ;;  %v1899_v16 = vsel %vm1896_vm4, %v1894_v3, %v1854_v57  ;;  %v1893_v61 = vsel %vm1891_vm3, %v1888_v48, %v1845_v42  ;;  %v1880_v11 = vsel %vm1876_vm0, %v1847_v15, %v1855_v49 }
 0x1f2   : > { %v1907_v6 = vsel %vm1906_vm6, %v1902_v17, %v1868_v18  ;;  %v1904_v7 = vsel %vm1901_vm5, %v1899_v16, %v1862_v0  ;;  %v1898_v62 = vsel %vm1896_vm4, %v1893_v61, %v1853_v33  ;;  %v1885_v51 = vsel %vm1881_vm1, %v1880_v11, %v1863_v26 }
 0x1f3   : > { %1912 = vst [vmem:[#allocation2 + $0x8] sm:$0xff] %v1907_v6  ;;  %v1909_v4 = vsel %vm1906_vm6, %v1904_v7, %v1870_v50  ;;  %v1903_v10 = vsel %vm1901_vm5, %v1898_v62, %v1861_v32  ;;  %v1890_v8 = vsel %vm1886_vm2, %v1885_v51, %v1871_v2  ;;  %v6146_v33 = vmov 1966171168  }
 0x1f4   : > { %1916 = vst [vmem:[#allocation2 + $0x28] sm:$0xff] %v1909_v4  ;;  %v1908_v3 = vsel %vm1906_vm6, %v1903_v10, %v1869_v24  ;;  %v1895_v42 = vsel %vm1891_vm3, %v1890_v8, %v1847_v15  ;;  %v2867_v63 = vunpack.c.l.s4 %v6146_v33  ;;  %v2869_v50 = vlaneseq }
 0x1f5   : > { %1914 = vst [vmem:[#allocation2 + $0x18] sm:$0xff] %v1908_v3  ;;  %v1900_v57 = vsel %vm1896_vm4, %v1895_v42, %v1855_v49 }
 0x1f6   : > { %v1905_v18 = vsel %vm1901_vm5, %v1900_v57, %v1863_v26  ;;  %v2868_v0 = vunpack.c.0.s8 %v2867_v63  ;;  %v2870_v32 = vshrl.u32 %v2869_v50, 7 }
 0x1f7   : > { %v1910_v61 = vsel %vm1906_vm6, %v1905_v18, %v1871_v2 }
 0x1f8   : > { %1918 = vst [vmem:[#allocation2 + $0x38] sm:$0xff] %v1910_v61  ;;  %v6830_v47 = vsub.s32 %v2868_v0, %v2870_v32 }
 0x1fc   : > { %v2047_v0 = vld [vmem:[#allocation2] ss:$8 sm:$0xf] }
 0x229   : > { %v2724_v56 = vpop.f32.mrb[8].mxu0  ;;  %v2765_v31 = vpop.f32.mrb[8].mxu1 }
 0x22a   : > { %v2726_v24 = vpop.f32.mrb[9].mxu0  ;;  %v2767_v48 = vpop.f32.mrb[9].mxu1 }
 0x22b   : > { %v2862_v15 = vcombine.low %v2724_v56, %v2726_v24  ;;  %v2863_v17 = vcombine.low %v2765_v31, %v2767_v48  ;;  %v2728_v16 = vpop.f32.mrb[10].mxu0  ;;  %v2769_v49 = vpop.f32.mrb[10].mxu1  ;;  %v2048_v56 = vld [vmem:[#allocation2] ss:$8 sm:$0xf0] }
 0x22c   : > { %v2729_v11 = vpop.f32.mrb[11].mxu0  ;;  %v2770_v26 = vpop.f32.mrb[11].mxu1  ;;  %v2049_v48 = vor.u32 %v2048_v56, %v2047_v0  ;;  %v8335_v0 = vld [vmem:[#allocation77_spill] sm:$0xff]  ;;  %v8337_v56 = vld [vmem:[#allocation79_spill] sm:$0xff] }
 0x22d   : > { %v2872_v2 = vrot.slane %v2862_v15, %v6830_v47  ;;  %v2879_v6 = vrot.slane %v2863_v17, %v6830_v47 }
 0x22f   : > { %v2894_v7 = vcombine.low %v2872_v2, %v2879_v6 }
 0x231   : > { %v2902_v31 = vrot.slane %v2894_v7, %v6830_v47 }
 0x269   : > { %v2806_v62 = vpop.f32.mrb[12].mxu0  ;;  %v2847_v51 = vpop.f32.mrb[12].mxu1 }
 0x26a   : > { %v2808_v4 = vpop.f32.mrb[13].mxu0  ;;  %v2849_v10 = vpop.f32.mrb[13].mxu1 }
 0x26b   : > { %v2864_v8 = vcombine.low %v2806_v62, %v2808_v4  ;;  %v2865_v3 = vcombine.low %v2847_v51, %v2849_v10  ;;  %v2810_v42 = vpop.f32.mrb[14].mxu0  ;;  %v2851_v57 = vpop.f32.mrb[14].mxu1 }
 0x26c   : > { %v2811_v18 = vpop.f32.mrb[15].mxu0  ;;  %v2852_v61 = vpop.f32.mrb[15].mxu1 }
 0x26d   : > { %v2886_v33 = vrot.slane %v2864_v8, %v6830_v47  ;;  %v2893_v63 = vrot.slane %v2865_v3, %v6830_v47  ;;  %v6841_v8 = vsub.s32 1, %v2870_v32  ;;  %v6843_v3 = vsub.s32 0, %v2870_v32  ;;  %v8336_v32 = vld [vmem:[#allocation78_spill] sm:$0xff] }
 0x26f   : > { %v2895_v50 = vcombine.low %v2886_v33, %v2893_v63 }
 0x271   : > { %v2909_v24 = vrot.slane %v2895_v50, %v6830_v47  ;;  %v8334_v50 = vld [vmem:[#allocation76_spill] sm:$0xff] }
 0x273   : > { %v2910_v15 = vcombine.low %v2902_v31, %v2909_v24  ;;  %v8338_v31 = vld [vmem:[#allocation80_spill] sm:$0xff]  ;;  %v8339_v24 = vld [vmem:[#allocation81_spill] sm:$0xff] }
 0x275   : > { %v2912_v17 = vadd.f32 %v2910_v15, %v2049_v48  ;;  %v8340_v48 = vld [vmem:[#allocation82_spill] sm:$0xff]  ;;  %v8341_v15 = vld [vmem:[#allocation83_spill] sm:$0xff] }
 0x277   : > { %v5500_v16 = vmul.f32 -1.442695, %v2912_v17  ;;  %v2920_v26 = vrot.slane %v2912_v17, 6  ;;  %v8342_v17 = vld [vmem:[#allocation84_spill] sm:$0xff] }
 0x279   : > { %5966 = vpow2.f32 %v5500_v16  ;;  %v8343_v16 = vld [vmem:[#allocation85_spill] sm:$0xff] }
 0x283   : > { %v5967_v49 = vpop.eup %5966 }
 0x284   : > { %v2916_v11 = vadd.f32 1.0, %v5967_v49  ;;  %v8344_v49 = vld [vmem:[#allocation86_spill] sm:$0xff] }
 0x286   : > { %5968 = vrcp.f32 %v2916_v11  ;;  %v8345_v11 = vld [vmem:[#allocation87_spill] sm:$0xff] }
 0x287   : > { %5970 = vtanh.f32 %v2920_v26  ;;  %v8346_v26 = vld [vmem:[#allocation88_spill] sm:$0xff] }
 0x290   : > { %v5969_v2 = vpop.eup %5968 }
 0x291   : > { %v2924_v6 = vrot.slane %v5969_v2, 2  ;;  %v5971_v62 = vpop.eup %5970  ;;  %v2930_v7 = vrot.slane %v5969_v2, 4 }
 0x292   : > { %v2927_v51 = vmul.f32 %v5971_v62, %v5969_v2  ;;  %v8347_v2 = vld [vmem:[#allocation89_spill] sm:$0xff]  ;;  %v8349_v62 = vld [vmem:[#allocation91_spill] sm:$0xff] }
 0x293   : > { %v2926_v4 = vmul.f32 0.0, %v2924_v6  ;;  %v8348_v6 = vld [vmem:[#allocation90_spill] sm:$0xff] }
 0x295   : > { %v6838_v10 = vadd.f32 %v2927_v51, %v2926_v4  ;;  %v8350_v51 = vld [vmem:[#allocation92_spill] sm:$0xff]  ;;  %v8351_v4 = vld [vmem:[#allocation93_spill] sm:$0xff] }
 0x297   : > { %5972 = vtanh.f32 %v6838_v10 }
 0x2a1   : > { %v5973_v42 = vpop.eup %5972 }
 0x2a2   : > { %v2932_v57 = vmul.f32 %v5973_v42, %v2930_v7  ;;  %v8352_v7 = vld [vmem:[#allocation94_spill] sm:$0xff]  ;;  %v8353_v42 = vld [vmem:[#allocation95_spill] sm:$0xff] }
 0x2a4   : > { %v2945_v18 = vrot.slane %v2932_v57, %v6841_v8  ;;  %v2941_v61 = vrot.slane %v2932_v57, %v6843_v3  ;;  %v8354_v57 = vld [vmem:[#allocation96_spill] sm:$0xff] }
 0x2a6   : > { %v2949_v33 = vpack.c.bf16 %v2945_v18, %v2945_v18  ;;  %v6847_v63 = vpack.c.bf16 %v2941_v61, %v2941_v61  ;;  %v8355_v18 = vld [vmem:[#allocation97_spill] sm:$0xff]  ;;  %v8356_v61 = vld [vmem:[#allocation98_spill] sm:$0xff] }
 0x2a8   : > { %2982 = vmatprep.mubr.bf16.mxu0 %v2949_v33  ;;  %3023 = vmatprep.mubr.bf16.mxu1 %v2949_v33 }
 0x2a9   : > { %2983 = vmatmul.mubr.bf16.vlgmr.msra.gmra.mrb[16].mxu0 %v6847_v63  ;;  %3024 = vmatmul.mubr.bf16.vlgmr.msra.gmra.mrb[16].mxu1 %v6847_v63 }
 0x2aa   : > { %3033 = vmatpush1.bf16.msra.mxu0 %v8334_v50  ;;  %3074 = vmatpush1.bf16.msra.mxu1 %v8335_v0 }
 0x2ab   : > { %3064 = vmatprep.mubr.bf16.mxu0 %v2949_v33  ;;  %3105 = vmatprep.mubr.bf16.mxu1 %v2949_v33  ;;  %v8357_v33 = vld [vmem:[#allocation99_spill] sm:$0xff] }
 0x2ac   : > { %3034 = vmatprep.subr.bf16.mxu0 %v8336_v32  ;;  %3075 = vmatprep.subr.bf16.mxu1 %v8337_v56 }
 0x2ae   : > { %3035 = vmatpush1.bf16.msra.mxu0 %v8338_v31  ;;  %3076 = vmatpush1.bf16.msra.mxu1 %v8339_v24 }
 0x2af   : > { %3036 = vmatprep.subr.bf16.mxu0 %v8340_v48  ;;  %3077 = vmatprep.subr.bf16.mxu1 %v8341_v15 }
 0x2b2   : > { %3037 = vmatpush1.bf16.msra.mxu0 %v8342_v17  ;;  %3078 = vmatpush1.bf16.msra.mxu1 %v8343_v16 }
 0x2b3   : > { %3038 = vmatprep.subr.bf16.mxu0 %v8344_v49  ;;  %3079 = vmatprep.subr.bf16.mxu1 %v8345_v11 }
 0x2b6   : > { %3039 = vmatpush1.bf16.msra.mxu0 %v8346_v26  ;;  %3080 = vmatpush1.bf16.msra.mxu1 %v8347_v2  ;;  %v8358_v2 = vld [vmem:[#allocation100_spill] sm:$0xff] }
 0x2b7   : > { %3040 = vmatprep.subr.bf16.mxu0 %v8348_v6  ;;  %3081 = vmatprep.subr.bf16.mxu1 %v8349_v62  ;;  %v8359_v6 = vld [vmem:[#allocation101_spill] sm:$0xff]  ;;  %v8360_v62 = vld [vmem:[#allocation102_spill] sm:$0xff] }
 0x2ba   : > { %3041 = vmatpush1.bf16.msra.mxu0 %v8350_v51  ;;  %3082 = vmatpush1.bf16.msra.mxu1 %v8351_v4  ;;  %v8361_v51 = vld [vmem:[#allocation103_spill] sm:$0xff]  ;;  %v8362_v4 = vld [vmem:[#allocation104_spill] sm:$0xff] }
 0x2bb   : > { %3042 = vmatprep.subr.bf16.mxu0 %v8352_v7  ;;  %3083 = vmatprep.subr.bf16.mxu1 %v8353_v42  ;;  %v8363_v7 = vld [vmem:[#allocation105_spill] sm:$0xff]  ;;  %v8364_v42 = vld [vmem:[#allocation106_spill] sm:$0xff] }
 0x2be   : > { %3043 = vmatpush1.bf16.msra.mxu0 %v8354_v57  ;;  %3084 = vmatpush1.bf16.msra.mxu1 %v8355_v18  ;;  %v8365_v57 = vld [vmem:[#allocation107_spill] sm:$0xff]  ;;  %v8366_v18 = vld [vmem:[#allocation108_spill] sm:$0xff] }
 0x2bf   : > { %3044 = vmatprep.subr.bf16.mxu0 %v8356_v61  ;;  %3085 = vmatprep.subr.bf16.mxu1 %v8357_v33  ;;  %v8367_v61 = vld [vmem:[#allocation109_spill] sm:$0xff]  ;;  %v8368_v33 = vld [vmem:[#allocation110_spill] sm:$0xff] }
 0x2c2   : > { %3045 = vmatpush1.bf16.msra.mxu0 %v8358_v2  ;;  %3086 = vmatpush1.bf16.msra.mxu1 %v8359_v6  ;;  %v8369_v2 = vld [vmem:[#allocation111_spill] sm:$0xff]  ;;  %v8370_v6 = vld [vmem:[#allocation112_spill] sm:$0xff] }
 0x2c3   : > { %3046 = vmatprep.subr.bf16.mxu0 %v8360_v62  ;;  %3087 = vmatprep.subr.bf16.mxu1 %v8361_v51  ;;  %v8371_v62 = vld [vmem:[#allocation113_spill] sm:$0xff]  ;;  %v8372_v51 = vld [vmem:[#allocation114_spill] sm:$0xff] }
 0x2c6   : > { %3047 = vmatpush1.bf16.msra.mxu0 %v8362_v4  ;;  %3088 = vmatpush1.bf16.msra.mxu1 %v8363_v7  ;;  %v8373_v4 = vld [vmem:[#allocation115_spill] sm:$0xff]  ;;  %v8374_v7 = vld [vmem:[#allocation116_spill] sm:$0xff] }
 0x2c7   : > { %3048 = vmatprep.subr.bf16.mxu0 %v8364_v42  ;;  %3089 = vmatprep.subr.bf16.mxu1 %v8365_v57  ;;  %v8375_v42 = vld [vmem:[#allocation117_spill] sm:$0xff]  ;;  %v8376_v57 = vld [vmem:[#allocation118_spill] sm:$0xff] }
 0x2ca   : > { %3049 = vmatpush1.bf16.msra.mxu0 %v8366_v18  ;;  %3090 = vmatpush1.bf16.msra.mxu1 %v8367_v61  ;;  %v8377_v18 = vld [vmem:[#allocation119_spill] sm:$0xff]  ;;  %v8378_v61 = vld [vmem:[#allocation120_spill] sm:$0xff] }
 0x2cb   : > { %3050 = vmatprep.subr.bf16.mxu0 %v8368_v33  ;;  %3091 = vmatprep.subr.bf16.mxu1 %v8369_v2  ;;  %v8379_v33 = vld [vmem:[#allocation121_spill] sm:$0xff]  ;;  %v8380_v2 = vld [vmem:[#allocation122_spill] sm:$0xff] }
 0x2ce   : > { %3051 = vmatpush1.bf16.msra.mxu0 %v8370_v6  ;;  %3092 = vmatpush1.bf16.msra.mxu1 %v8371_v62  ;;  %v8381_v6 = vld [vmem:[#allocation123_spill] sm:$0xff]  ;;  %v8382_v62 = vld [vmem:[#allocation124_spill] sm:$0xff] }
 0x2cf   : > { %3052 = vmatprep.subr.bf16.mxu0 %v8372_v51  ;;  %3093 = vmatprep.subr.bf16.mxu1 %v8373_v4  ;;  %v8383_v51 = vld [vmem:[#allocation125_spill] sm:$0xff]  ;;  %v8384_v4 = vld [vmem:[#allocation126_spill] sm:$0xff] }
 0x2d2   : > { %3053 = vmatpush1.bf16.msra.mxu0 %v8374_v7  ;;  %3094 = vmatpush1.bf16.msra.mxu1 %v8375_v42  ;;  %v8385_v7 = vld [vmem:[#allocation127_spill] sm:$0xff] }
 0x2d3   : > { %3054 = vmatprep.subr.bf16.mxu0 %v8376_v57  ;;  %3095 = vmatprep.subr.bf16.mxu1 %v8377_v18 }
 0x2d6   : > { %3055 = vmatpush1.bf16.msra.mxu0 %v8378_v61  ;;  %3096 = vmatpush1.bf16.msra.mxu1 %v8379_v33 }
 0x2d7   : > { %3056 = vmatprep.subr.bf16.mxu0 %v8380_v2  ;;  %3097 = vmatprep.subr.bf16.mxu1 %v8381_v6 }
 0x2da   : > { %3057 = vmatpush1.bf16.msra.mxu0 %v8382_v62  ;;  %3098 = vmatpush1.bf16.msra.mxu1 %v8383_v51 }
 0x2db   : > { %3058 = vmatprep.subr.bf16.mxu0 %v8384_v4  ;;  %3099 = vmatprep.subr.bf16.mxu1 %v8385_v7 }
 0x2de   : > { %3059 = vmatpush1.bf16.msra.mxu0 %v6702_v25  ;;  %3100 = vmatpush1.bf16.msra.mxu1 %v6704_v38 }
 0x2df   : > { %3060 = vmatprep.subr.bf16.mxu0 %v6708_v39  ;;  %3101 = vmatprep.subr.bf16.mxu1 %v6710_v40 }
 0x2e2   : > { %3061 = vmatpush1.bf16.msra.mxu0 %v6714_v9  ;;  %3102 = vmatpush1.bf16.msra.mxu1 %v6716_v1 }
 0x2e3   : > { %3062 = vmatprep.subr.bf16.mxu0 %v6720_v55  ;;  %3103 = vmatprep.subr.bf16.mxu1 %v6722_v41 }
 0x2e6   : > { %3063 = vmatpush1.bf16.msra.mxu0 %v6726_v13  ;;  %3104 = vmatpush1.bf16.msra.mxu1 %v6728_v23 }
 0x2e7   : > { %3210 = vmatprep.subr.bf16.mxu0 %v6342_v12  ;;  %3251 = vmatprep.subr.bf16.mxu1 %v6344_v14 }
 0x2e9   : > { %3065 = vmatmul.mubr.bf16.vlgmr.msra.gmra.mrb[20].mxu0 %v6847_v63  ;;  %3106 = vmatmul.mubr.bf16.vlgmr.msra.gmra.mrb[20].mxu1 %v6847_v63  ;;  %v8386_v63 = vld [vmem:[#allocation35_spill] sm:$0xff] }
 0x2ea   : > { %3211 = vmatpush1.bf16.msra.mxu0 %v6346_v19  ;;  %3252 = vmatpush1.bf16.msra.mxu1 %v6348_v20 }
 0x2eb   : > { %3212 = vmatprep.subr.bf16.mxu0 %v6352_v21  ;;  %3253 = vmatprep.subr.bf16.mxu1 %v6354_v22 }
 0x2ee   : > { %3213 = vmatpush1.bf16.msra.mxu0 %v6360_v27  ;;  %3254 = vmatpush1.bf16.msra.mxu1 %v6362_v28 }
 0x2ef   : > { %3214 = vmatprep.subr.bf16.mxu0 %v6366_v29  ;;  %3255 = vmatprep.subr.bf16.mxu1 %v6368_v30 }
 0x2f2   : > { %3215 = vmatpush1.bf16.msra.mxu0 %v6374_v34  ;;  %3256 = vmatpush1.bf16.msra.mxu1 %v6376_v35 }
 0x2f3   : > { %3216 = vmatprep.subr.bf16.mxu0 %v6380_v36  ;;  %3257 = vmatprep.subr.bf16.mxu1 %v6382_v37 }
 0x2f6   : > { %3217 = vmatpush1.bf16.msra.mxu0 %v6386_v43  ;;  %3258 = vmatpush1.bf16.msra.mxu1 %v6388_v44  ;;  %v8387_v44 = vld [vmem:[#allocation36_spill] sm:$0xff] }
 0x2f7   : > { %3218 = vmatprep.subr.bf16.mxu0 %v6392_v45  ;;  %3259 = vmatprep.subr.bf16.mxu1 %v6394_v46  ;;  %v8388_v45 = vld [vmem:[#allocation37_spill] sm:$0xff]  ;;  %v8389_v46 = vld [vmem:[#allocation38_spill] sm:$0xff] }
 0x2fa   : > { %3219 = vmatpush1.bf16.msra.mxu0 %v6398_v52  ;;  %3260 = vmatpush1.bf16.msra.mxu1 %v6400_v53  ;;  %v8390_v52 = vld [vmem:[#allocation39_spill] sm:$0xff]  ;;  %v8391_v53 = vld [vmem:[#allocation40_spill] sm:$0xff] }
 0x2fb   : > { %3220 = vmatprep.subr.bf16.mxu0 %v6404_v5  ;;  %3261 = vmatprep.subr.bf16.mxu1 %v6406_v54  ;;  %v8392_v5 = vld [vmem:[#allocation41_spill] sm:$0xff]  ;;  %v8393_v54 = vld [vmem:[#allocation42_spill] sm:$0xff] }
 0x2fe   : > { %3221 = vmatpush1.bf16.msra.mxu0 %v6410_v58  ;;  %3262 = vmatpush1.bf16.msra.mxu1 %v6412_v59  ;;  %v8394_v58 = vld [vmem:[#allocation43_spill] sm:$0xff]  ;;  %v8395_v59 = vld [vmem:[#allocation44_spill] sm:$0xff] }
 0x2ff   : > { %3222 = vmatprep.subr.bf16.mxu0 %v6416_v60  ;;  %3263 = vmatprep.subr.bf16.mxu1 %v8386_v63  ;;  %v8396_v60 = vld [vmem:[#allocation45_spill] sm:$0xff]  ;;  %v8397_v63 = vld [vmem:[#allocation46_spill] sm:$0xff] }
 0x302   : > { %3223 = vmatpush1.bf16.msra.mxu0 %v8387_v44  ;;  %3264 = vmatpush1.bf16.msra.mxu1 %v8388_v45  ;;  %v8398_v44 = vld [vmem:[#allocation47_spill] sm:$0xff]  ;;  %v8399_v45 = vld [vmem:[#allocation48_spill] sm:$0xff] }
 0x303   : > { %3224 = vmatprep.subr.bf16.mxu0 %v8389_v46  ;;  %3265 = vmatprep.subr.bf16.mxu1 %v8390_v52  ;;  %v8400_v46 = vld [vmem:[#allocation49_spill] sm:$0xff]  ;;  %v8401_v52 = vld [vmem:[#allocation50_spill] sm:$0xff] }
 0x306   : > { %3225 = vmatpush1.bf16.msra.mxu0 %v8391_v53  ;;  %3266 = vmatpush1.bf16.msra.mxu1 %v8392_v5  ;;  %v8402_v53 = vld [vmem:[#allocation51_spill] sm:$0xff]  ;;  %v8403_v5 = vld [vmem:[#allocation52_spill] sm:$0xff] }
 0x307   : > { %3226 = vmatprep.subr.bf16.mxu0 %v8393_v54  ;;  %3267 = vmatprep.subr.bf16.mxu1 %v8394_v58  ;;  %v8404_v54 = vld [vmem:[#allocation53_spill] sm:$0xff]  ;;  %v8405_v58 = vld [vmem:[#allocation54_spill] sm:$0xff] }
 0x30a   : > { %3227 = vmatpush1.bf16.msra.mxu0 %v8395_v59  ;;  %3268 = vmatpush1.bf16.msra.mxu1 %v8396_v60  ;;  %v8406_v59 = vld [vmem:[#allocation55_spill] sm:$0xff]  ;;  %v8407_v60 = vld [vmem:[#allocation56_spill] sm:$0xff] }
 0x30b   : > { %3228 = vmatprep.subr.bf16.mxu0 %v8397_v63  ;;  %3269 = vmatprep.subr.bf16.mxu1 %v8398_v44  ;;  %v8408_v63 = vld [vmem:[#allocation57_spill] sm:$0xff]  ;;  %v8409_v44 = vld [vmem:[#allocation58_spill] sm:$0xff] }
 0x30e   : > { %3229 = vmatpush1.bf16.msra.mxu0 %v8399_v45  ;;  %3270 = vmatpush1.bf16.msra.mxu1 %v8400_v46  ;;  %v8410_v45 = vld [vmem:[#allocation59_spill] sm:$0xff]  ;;  %v8411_v46 = vld [vmem:[#allocation60_spill] sm:$0xff] }
 0x30f   : > { %3230 = vmatprep.subr.bf16.mxu0 %v8401_v52  ;;  %3271 = vmatprep.subr.bf16.mxu1 %v8402_v53  ;;  %v8412_v52 = vld [vmem:[#allocation61_spill] sm:$0xff]  ;;  %v8413_v53 = vld [vmem:[#allocation62_spill] sm:$0xff] }
 0x312   : > { %3231 = vmatpush1.bf16.msra.mxu0 %v8403_v5  ;;  %3272 = vmatpush1.bf16.msra.mxu1 %v8404_v54  ;;  %v8414_v5 = vld [vmem:[#allocation63_spill] sm:$0xff]  ;;  %v8415_v54 = vld [vmem:[#allocation64_spill] sm:$0xff] }
 0x313   : > { %3232 = vmatprep.subr.bf16.mxu0 %v8405_v58  ;;  %3273 = vmatprep.subr.bf16.mxu1 %v8406_v59  ;;  %v8416_v58 = vld [vmem:[#allocation65_spill] sm:$0xff]  ;;  %v8417_v59 = vld [vmem:[#allocation66_spill] sm:$0xff] }
 0x316   : > { %3233 = vmatpush1.bf16.msra.mxu0 %v8407_v60  ;;  %3274 = vmatpush1.bf16.msra.mxu1 %v8408_v63  ;;  %v8418_v60 = vld [vmem:[#allocation67_spill] sm:$0xff]  ;;  %v8419_v63 = vld [vmem:[#allocation68_spill] sm:$0xff] }
 0x317   : > { %3234 = vmatprep.subr.bf16.mxu0 %v8409_v44  ;;  %3275 = vmatprep.subr.bf16.mxu1 %v8410_v45  ;;  %v8420_v44 = vld [vmem:[#allocation69_spill] sm:$0xff]  ;;  %v8421_v45 = vld [vmem:[#allocation70_spill] sm:$0xff] }
 0x31a   : > { %3235 = vmatpush1.bf16.msra.mxu0 %v8411_v46  ;;  %3276 = vmatpush1.bf16.msra.mxu1 %v8412_v52  ;;  %v8422_v46 = vld [vmem:[#allocation71_spill] sm:$0xff]  ;;  %v8423_v52 = vld [vmem:[#allocation72_spill] sm:$0xff] }
 0x31b   : > { %3236 = vmatprep.subr.bf16.mxu0 %v8413_v53  ;;  %3277 = vmatprep.subr.bf16.mxu1 %v8414_v5  ;;  %v8424_v53 = vld [vmem:[#allocation73_spill] sm:$0xff]  ;;  %v8425_v5 = vld [vmem:[#allocation74_spill] sm:$0xff] }
 0x31e   : > { %3237 = vmatpush1.bf16.msra.mxu0 %v8415_v54  ;;  %3278 = vmatpush1.bf16.msra.mxu1 %v8416_v58  ;;  %v8426_v54 = vld [vmem:[#allocation75_spill] sm:$0xff] }
 0x31f   : > { %3238 = vmatprep.subr.bf16.mxu0 %v8417_v59  ;;  %3279 = vmatprep.subr.bf16.mxu1 %v8418_v60 }
 0x322   : > { %3239 = vmatpush1.bf16.msra.mxu0 %v8419_v63  ;;  %3280 = vmatpush1.bf16.msra.mxu1 %v8420_v44 }
 0x323   : > { %3240 = vmatprep.subr.bf16.mxu0 %v8421_v45  ;;  %3281 = vmatprep.subr.bf16.mxu1 %v8422_v46 }
 0x326   : > { %3241 = vmatpush1.bf16.msra.mxu0 %v8423_v52  ;;  %3282 = vmatpush1.bf16.msra.mxu1 %v8424_v53 }
 0x327   : > { %3292 = vmatprep.subr.bf16.mxu0 %v8425_v5  ;;  %3333 = vmatprep.subr.bf16.mxu1 %v8426_v54 }
 0x37c   : > { %v2984_v58 = vpop.f32.mrb[16].mxu0  ;;  %v3025_v59 = vpop.f32.mrb[16].mxu1 }
 0x37d   : > { %v2986_v43 = vpop.f32.mrb[17].mxu0  ;;  %v3027_v60 = vpop.f32.mrb[17].mxu1 }
 0x37e   : > { %v3122_v37 = vcombine.low %v2984_v58, %v2986_v43  ;;  %v3123_v63 = vcombine.low %v3025_v59, %v3027_v60  ;;  %v2988_v36 = vpop.f32.mrb[18].mxu0  ;;  %v3029_v44 = vpop.f32.mrb[18].mxu1 }
 0x37f   : > { %v2989_v35 = vpop.f32.mrb[19].mxu0  ;;  %v3030_v45 = vpop.f32.mrb[19].mxu1 }
 0x380   : > { %v3132_v46 = vrot.slane %v3122_v37, %v6830_v47  ;;  %v3139_v52 = vrot.slane %v3123_v63, %v6830_v47  ;;  %v2934_v45 = vld [vmem:[#allocation2 + $0x1] ss:$8 sm:$0xf] }
 0x381   : > { %v2935_v37 = vld [vmem:[#allocation2 + $0x1] ss:$8 sm:$0xf0] }
 0x382   : > { %v3154_v34 = vcombine.low %v3132_v46, %v3139_v52  ;;  %v2936_v52 = vor.u32 %v2935_v37, %v2934_v45 }
 0x384   : > { %v3162_v58 = vrot.slane %v3154_v34, %v6830_v47 }
 0x3bc   : > { %v3066_v53 = vpop.f32.mrb[20].mxu0  ;;  %v3107_v30 = vpop.f32.mrb[20].mxu1 }
 0x3bd   : > { %v3068_v5 = vpop.f32.mrb[21].mxu0  ;;  %v3109_v29 = vpop.f32.mrb[21].mxu1 }
 0x3be   : > { %v3124_v54 = vcombine.low %v3066_v53, %v3068_v5  ;;  %v3125_v28 = vcombine.low %v3107_v30, %v3109_v29  ;;  %v3070_v27 = vpop.f32.mrb[22].mxu0  ;;  %v3111_v22 = vpop.f32.mrb[22].mxu1 }
 0x3bf   : > { %v3071_v21 = vpop.f32.mrb[23].mxu0  ;;  %v3112_v43 = vpop.f32.mrb[23].mxu1 }
 0x3c0   : > { %v3146_v36 = vrot.slane %v3124_v54, %v6830_v47  ;;  %v3153_v35 = vrot.slane %v3125_v28, %v6830_v47 }
 0x3c2   : > { %v3155_v44 = vcombine.low %v3146_v36, %v3153_v35 }
 0x3c4   : > { %v3169_v46 = vrot.slane %v3155_v44, %v6830_v47 }
 0x3c6   : > { %v3170_v59 = vcombine.low %v3162_v58, %v3169_v46  ;;  %v8428_v58 = vld [vmem:[#allocation90_spill] sm:$0xff]  ;;  %v8429_v46 = vld [vmem:[#allocation91_spill] sm:$0xff] }
 0x3c8   : > { %v3172_v60 = vadd.f32 %v3170_v59, %v2936_v52  ;;  %v8430_v52 = vld [vmem:[#allocation92_spill] sm:$0xff]  ;;  %v8431_v59 = vld [vmem:[#allocation93_spill] sm:$0xff] }
 0x3ca   : > { %v5501_v53 = vmul.f32 -1.442695, %v3172_v60  ;;  %v3180_v21 = vrot.slane %v3172_v60, 6  ;;  %v8432_v60 = vld [vmem:[#allocation94_spill] sm:$0xff] }
 0x3cc   : > { %5974 = vpow2.f32 %v5501_v53  ;;  %v8433_v53 = vld [vmem:[#allocation95_spill] sm:$0xff] }
 0x3d6   : > { %v5975_v27 = vpop.eup %5974 }
 0x3d7   : > { %v3176_v22 = vadd.f32 1.0, %v5975_v27  ;;  %v8434_v27 = vld [vmem:[#allocation96_spill] sm:$0xff] }
 0x3d9   : > { %5976 = vrcp.f32 %v3176_v22  ;;  %v8435_v22 = vld [vmem:[#allocation97_spill] sm:$0xff] }
 0x3da   : > { %5978 = vtanh.f32 %v3180_v21  ;;  %v8436_v21 = vld [vmem:[#allocation98_spill] sm:$0xff] }
 0x3e3   : > { %v5977_v29 = vpop.eup %5976 }
 0x3e4   : > { %v3184_v30 = vrot.slane %v5977_v29, 2  ;;  %v5979_v28 = vpop.eup %5978  ;;  %v3190_v34 = vrot.slane %v5977_v29, 4 }
 0x3e5   : > { %v3187_v5 = vmul.f32 %v5979_v28, %v5977_v29  ;;  %v8437_v29 = vld [vmem:[#allocation99_spill] sm:$0xff]  ;;  %v8439_v28 = vld [vmem:[#allocation101_spill] sm:$0xff] }
 0x3e6   : > { %v3186_v54 = vmul.f32 %v3184_v30, %v6838_v10  ;;  %v8427_v10 = vld [vmem:[#allocation89_spill] sm:$0xff]  ;;  %v8438_v30 = vld [vmem:[#allocation100_spill] sm:$0xff] }
 0x3e8   : > { %v6988_v63 = vadd.f32 %v3187_v5, %v3186_v54  ;;  %v8440_v5 = vld [vmem:[#allocation102_spill] sm:$0xff]  ;;  %v8441_v54 = vld [vmem:[#allocation103_spill] sm:$0xff] }
 0x3ea   : > { %5980 = vtanh.f32 %v6988_v63 }
 0x3f4   : > { %v5981_v43 = vpop.eup %5980 }
 0x3f5   : > { %v3192_v36 = vmul.f32 %v5981_v43, %v3190_v34  ;;  %v8442_v34 = vld [vmem:[#allocation104_spill] sm:$0xff]  ;;  %v8443_v43 = vld [vmem:[#allocation105_spill] sm:$0xff] }
 0x3f7   : > { %v3205_v35 = vrot.slane %v3192_v36, %v6841_v8  ;;  %v3201_v44 = vrot.slane %v3192_v36, %v6843_v3  ;;  %v8444_v36 = vld [vmem:[#allocation106_spill] sm:$0xff] }
 0x3f9   : > { %v3209_v45 = vpack.c.bf16 %v3205_v35, %v3205_v35  ;;  %v6993_v37 = vpack.c.bf16 %v3201_v44, %v3201_v44  ;;  %v8445_v35 = vld [vmem:[#allocation107_spill] sm:$0xff]  ;;  %v8446_v44 = vld [vmem:[#allocation108_spill] sm:$0xff] }
 0x3fb   : > { %3242 = vmatprep.mubr.bf16.mxu0 %v3209_v45  ;;  %3283 = vmatprep.mubr.bf16.mxu1 %v3209_v45 }
 0x3fc   : > { %3243 = vmatmul.mubr.bf16.vlgmr.msra.gmra.mrb[24].mxu0 %v6993_v37  ;;  %3284 = vmatmul.mubr.bf16.vlgmr.msra.gmra.mrb[24].mxu1 %v6993_v37 }
 0x3fd   : > { %3293 = vmatpush1.bf16.msra.mxu0 %v8334_v50  ;;  %3334 = vmatpush1.bf16.msra.mxu1 %v8335_v0 }
 0x3fe   : > { %3324 = vmatprep.mubr.bf16.mxu0 %v3209_v45  ;;  %3365 = vmatprep.mubr.bf16.mxu1 %v3209_v45  ;;  %v8447_v45 = vld [vmem:[#allocation109_spill] sm:$0xff] }
 0x3ff   : > { %3294 = vmatprep.subr.bf16.mxu0 %v8336_v32  ;;  %3335 = vmatprep.subr.bf16.mxu1 %v8337_v56 }
 0x401   : > { %3295 = vmatpush1.bf16.msra.mxu0 %v8338_v31  ;;  %3336 = vmatpush1.bf16.msra.mxu1 %v8339_v24 }
 0x402   : > { %3296 = vmatprep.subr.bf16.mxu0 %v8340_v48  ;;  %3337 = vmatprep.subr.bf16.mxu1 %v8341_v15 }
 0x405   : > { %3297 = vmatpush1.bf16.msra.mxu0 %v8342_v17  ;;  %3338 = vmatpush1.bf16.msra.mxu1 %v8343_v16 }
 0x406   : > { %3298 = vmatprep.subr.bf16.mxu0 %v8344_v49  ;;  %3339 = vmatprep.subr.bf16.mxu1 %v8345_v11 }
 0x409   : > { %3299 = vmatpush1.bf16.msra.mxu0 %v8346_v26  ;;  %3340 = vmatpush1.bf16.msra.mxu1 %v8427_v10 }
 0x40a   : > { %3300 = vmatprep.subr.bf16.mxu0 %v8428_v58  ;;  %3341 = vmatprep.subr.bf16.mxu1 %v8429_v46 }
 0x40d   : > { %3301 = vmatpush1.bf16.msra.mxu0 %v8430_v52  ;;  %3342 = vmatpush1.bf16.msra.mxu1 %v8431_v59 }
 0x40e   : > { %3302 = vmatprep.subr.bf16.mxu0 %v8432_v60  ;;  %3343 = vmatprep.subr.bf16.mxu1 %v8433_v53 }
 0x411   : > { %3303 = vmatpush1.bf16.msra.mxu0 %v8434_v27  ;;  %3344 = vmatpush1.bf16.msra.mxu1 %v8435_v22 }
 0x412   : > { %3304 = vmatprep.subr.bf16.mxu0 %v8436_v21  ;;  %3345 = vmatprep.subr.bf16.mxu1 %v8437_v29  ;;  %v8448_v29 = vld [vmem:[#allocation110_spill] sm:$0xff] }
 0x415   : > { %3305 = vmatpush1.bf16.msra.mxu0 %v8438_v30  ;;  %3346 = vmatpush1.bf16.msra.mxu1 %v8439_v28  ;;  %v8449_v30 = vld [vmem:[#allocation111_spill] sm:$0xff]  ;;  %v8450_v28 = vld [vmem:[#allocation112_spill] sm:$0xff] }
 0x416   : > { %3306 = vmatprep.subr.bf16.mxu0 %v8440_v5  ;;  %3347 = vmatprep.subr.bf16.mxu1 %v8441_v54  ;;  %v8451_v5 = vld [vmem:[#allocation113_spill] sm:$0xff]  ;;  %v8452_v54 = vld [vmem:[#allocation114_spill] sm:$0xff] }
 0x419   : > { %3307 = vmatpush1.bf16.msra.mxu0 %v8442_v34  ;;  %3348 = vmatpush1.bf16.msra.mxu1 %v8443_v43  ;;  %v8453_v34 = vld [vmem:[#allocation115_spill] sm:$0xff]  ;;  %v8454_v43 = vld [vmem:[#allocation116_spill] sm:$0xff] }
 0x41a   : > { %3308 = vmatprep.subr.bf16.mxu0 %v8444_v36  ;;  %3349 = vmatprep.subr.bf16.mxu1 %v8445_v35 }
 0x41d   : > { %3309 = vmatpush1.bf16.msra.mxu0 %v8446_v44  ;;  %3350 = vmatpush1.bf16.msra.mxu1 %v8447_v45 }
 0x41e   : > { %3310 = vmatprep.subr.bf16.mxu0 %v8448_v29  ;;  %3351 = vmatprep.subr.bf16.mxu1 %v8449_v30 }
 0x421   : > { %3311 = vmatpush1.bf16.msra.mxu0 %v8450_v28  ;;  %3352 = vmatpush1.bf16.msra.mxu1 %v8451_v5 }
 0x422   : > { %3312 = vmatprep.subr.bf16.mxu0 %v8452_v54  ;;  %3353 = vmatprep.subr.bf16.mxu1 %v8453_v34 }
 0x425   : > { %3313 = vmatpush1.bf16.msra.mxu0 %v8454_v43  ;;  %3354 = vmatpush1.bf16.msra.mxu1 %v8375_v42 }
 0x426   : > { %3314 = vmatprep.subr.bf16.mxu0 %v8376_v57  ;;  %3355 = vmatprep.subr.bf16.mxu1 %v8377_v18 }
 0x429   : > { %3315 = vmatpush1.bf16.msra.mxu0 %v8378_v61  ;;  %3356 = vmatpush1.bf16.msra.mxu1 %v8379_v33 }
 0x42a   : > { %3316 = vmatprep.subr.bf16.mxu0 %v8380_v2  ;;  %3357 = vmatprep.subr.bf16.mxu1 %v8381_v6 }
 0x42d   : > { %3317 = vmatpush1.bf16.msra.mxu0 %v8382_v62  ;;  %3358 = vmatpush1.bf16.msra.mxu1 %v8383_v51 }
 0x42e   : > { %3318 = vmatprep.subr.bf16.mxu0 %v8384_v4  ;;  %3359 = vmatprep.subr.bf16.mxu1 %v8385_v7 }
 0x431   : > { %3319 = vmatpush1.bf16.msra.mxu0 %v6702_v25  ;;  %3360 = vmatpush1.bf16.msra.mxu1 %v6704_v38 }
 0x432   : > { %3320 = vmatprep.subr.bf16.mxu0 %v6708_v39  ;;  %3361 = vmatprep.subr.bf16.mxu1 %v6710_v40 }
 0x435   : > { %3321 = vmatpush1.bf16.msra.mxu0 %v6714_v9  ;;  %3362 = vmatpush1.bf16.msra.mxu1 %v6716_v1  ;;  %v8455_v1 = vld [vmem:[#allocation14_spill] sm:$0xff]  ;;  %v8462_v9 = vld [vmem:[#allocation21_spill] sm:$0xff] }
 0x436   : > { %3322 = vmatprep.subr.bf16.mxu0 %v6720_v55  ;;  %3363 = vmatprep.subr.bf16.mxu1 %v6722_v41  ;;  %v8456_v55 = vld [vmem:[#allocation15_spill] sm:$0xff]  ;;  %v8457_v41 = vld [vmem:[#allocation16_spill] sm:$0xff] }
 0x439   : > { %3323 = vmatpush1.bf16.msra.mxu0 %v6726_v13  ;;  %3364 = vmatpush1.bf16.msra.mxu1 %v6728_v23  ;;  %v8458_v13 = vld [vmem:[#allocation17_spill] sm:$0xff]  ;;  %v8459_v23 = vld [vmem:[#allocation18_spill] sm:$0xff] }
 0x43a   : > { %3470 = vmatprep.subr.bf16.mxu0 %v6342_v12  ;;  %3511 = vmatprep.subr.bf16.mxu1 %v6344_v14  ;;  %v8460_v12 = vld [vmem:[#allocation19_spill] sm:$0xff]  ;;  %v8461_v14 = vld [vmem:[#allocation20_spill] sm:$0xff] }
 0x43c   : > { %3325 = vmatmul.mubr.bf16.vlgmr.msra.gmra.mrb[28].mxu0 %v6993_v37  ;;  %3366 = vmatmul.mubr.bf16.vlgmr.msra.gmra.mrb[28].mxu1 %v6993_v37  ;;  %v8463_v37 = vld [vmem:[#allocation22_spill] sm:$0xff] }
 0x43d   : > { %3471 = vmatpush1.bf16.msra.mxu0 %v6346_v19  ;;  %3512 = vmatpush1.bf16.msra.mxu1 %v6348_v20  ;;  %v8464_v19 = vld [vmem:[#allocation23_spill] sm:$0xff]  ;;  %v8465_v20 = vld [vmem:[#allocation24_spill] sm:$0xff] }
 0x43e   : > { %3472 = vmatprep.subr.bf16.mxu0 %v8455_v1  ;;  %3513 = vmatprep.subr.bf16.mxu1 %v8456_v55  ;;  %v8466_v1 = vld [vmem:[#allocation25_spill] sm:$0xff]  ;;  %v8467_v55 = vld [vmem:[#allocation26_spill] sm:$0xff] }
 0x441   : > { %3473 = vmatpush1.bf16.msra.mxu0 %v8457_v41  ;;  %3514 = vmatpush1.bf16.msra.mxu1 %v8458_v13  ;;  %v8468_v41 = vld [vmem:[#allocation27_spill] sm:$0xff]  ;;  %v8469_v13 = vld [vmem:[#allocation28_spill] sm:$0xff] }
 0x442   : > { %3474 = vmatprep.subr.bf16.mxu0 %v8459_v23  ;;  %3515 = vmatprep.subr.bf16.mxu1 %v8460_v12  ;;  %v8470_v23 = vld [vmem:[#allocation29_spill] sm:$0xff]  ;;  %v8471_v12 = vld [vmem:[#allocation30_spill] sm:$0xff] }
 0x445   : > { %3475 = vmatpush1.bf16.msra.mxu0 %v8461_v14  ;;  %3516 = vmatpush1.bf16.msra.mxu1 %v8462_v9  ;;  %v8472_v14 = vld [vmem:[#allocation31_spill] sm:$0xff]  ;;  %v8473_v9 = vld [vmem:[#allocation32_spill] sm:$0xff] }
 0x446   : > { %3476 = vmatprep.subr.bf16.mxu0 %v8463_v37  ;;  %3517 = vmatprep.subr.bf16.mxu1 %v8464_v19  ;;  %v8474_v37 = vld [vmem:[#allocation33_spill] sm:$0xff]  ;;  %v8475_v19 = vld [vmem:[#allocation34_spill] sm:$0xff] }
 0x449   : > { %3477 = vmatpush1.bf16.msra.mxu0 %v8465_v20  ;;  %3518 = vmatpush1.bf16.msra.mxu1 %v8466_v1  ;;  %v8476_v20 = vld [vmem:[#allocation35_spill] sm:$0xff]  ;;  %v8477_v1 = vld [vmem:[#allocation36_spill] sm:$0xff] }
 0x44a   : > { %3478 = vmatprep.subr.bf16.mxu0 %v8467_v55  ;;  %3519 = vmatprep.subr.bf16.mxu1 %v8468_v41  ;;  %v8478_v55 = vld [vmem:[#allocation37_spill] sm:$0xff]  ;;  %v8479_v41 = vld [vmem:[#allocation38_spill] sm:$0xff] }
 0x44d   : > { %3479 = vmatpush1.bf16.msra.mxu0 %v8469_v13  ;;  %3520 = vmatpush1.bf16.msra.mxu1 %v8470_v23  ;;  %v8480_v13 = vld [vmem:[#allocation39_spill] sm:$0xff]  ;;  %v8481_v23 = vld [vmem:[#allocation40_spill] sm:$0xff] }
 0x44e   : > { %3480 = vmatprep.subr.bf16.mxu0 %v8471_v12  ;;  %3521 = vmatprep.subr.bf16.mxu1 %v8472_v14  ;;  %v8482_v12 = vld [vmem:[#allocation41_spill] sm:$0xff]  ;;  %v8483_v14 = vld [vmem:[#allocation42_spill] sm:$0xff] }
 0x451   : > { %3481 = vmatpush1.bf16.msra.mxu0 %v8473_v9  ;;  %3522 = vmatpush1.bf16.msra.mxu1 %v8474_v37  ;;  %v8484_v9 = vld [vmem:[#allocation43_spill] sm:$0xff]  ;;  %v8485_v37 = vld [vmem:[#allocation44_spill] sm:$0xff] }
 0x452   : > { %3482 = vmatprep.subr.bf16.mxu0 %v8475_v19  ;;  %3523 = vmatprep.subr.bf16.mxu1 %v8476_v20  ;;  %v8486_v19 = vld [vmem:[#allocation45_spill] sm:$0xff]  ;;  %v8487_v20 = vld [vmem:[#allocation46_spill] sm:$0xff] }
 0x455   : > { %3483 = vmatpush1.bf16.msra.mxu0 %v8477_v1  ;;  %3524 = vmatpush1.bf16.msra.mxu1 %v8478_v55  ;;  %v8488_v1 = vld [vmem:[#allocation47_spill] sm:$0xff]  ;;  %v8489_v55 = vld [vmem:[#allocation48_spill] sm:$0xff] }
 0x456   : > { %3484 = vmatprep.subr.bf16.mxu0 %v8479_v41  ;;  %3525 = vmatprep.subr.bf16.mxu1 %v8480_v13  ;;  %v8490_v41 = vld [vmem:[#allocation49_spill] sm:$0xff]  ;;  %v8491_v13 = vld [vmem:[#allocation50_spill] sm:$0xff] }
 0x459   : > { %3485 = vmatpush1.bf16.msra.mxu0 %v8481_v23  ;;  %3526 = vmatpush1.bf16.msra.mxu1 %v8482_v12  ;;  %v8492_v23 = vld [vmem:[#allocation51_spill] sm:$0xff]  ;;  %v8493_v12 = vld [vmem:[#allocation52_spill] sm:$0xff] }
 0x45a   : > { %3486 = vmatprep.subr.bf16.mxu0 %v8483_v14  ;;  %3527 = vmatprep.subr.bf16.mxu1 %v8484_v9  ;;  %v8494_v14 = vld [vmem:[#allocation53_spill] sm:$0xff]  ;;  %v8495_v9 = vld [vmem:[#allocation54_spill] sm:$0xff] }
 0x45d   : > { %3487 = vmatpush1.bf16.msra.mxu0 %v8485_v37  ;;  %3528 = vmatpush1.bf16.msra.mxu1 %v8486_v19  ;;  %v8496_v37 = vld [vmem:[#allocation55_spill] sm:$0xff]  ;;  %v8497_v19 = vld [vmem:[#allocation56_spill] sm:$0xff] }
 0x45e   : > { %3488 = vmatprep.subr.bf16.mxu0 %v8487_v20  ;;  %3529 = vmatprep.subr.bf16.mxu1 %v8488_v1  ;;  %v8498_v20 = vld [vmem:[#allocation57_spill] sm:$0xff]  ;;  %v8499_v1 = vld [vmem:[#allocation58_spill] sm:$0xff] }
 0x461   : > { %3489 = vmatpush1.bf16.msra.mxu0 %v8489_v55  ;;  %3530 = vmatpush1.bf16.msra.mxu1 %v8490_v41  ;;  %v8500_v55 = vld [vmem:[#allocation59_spill] sm:$0xff]  ;;  %v8501_v41 = vld [vmem:[#allocation60_spill] sm:$0xff] }
 0x462   : > { %3490 = vmatprep.subr.bf16.mxu0 %v8491_v13  ;;  %3531 = vmatprep.subr.bf16.mxu1 %v8492_v23  ;;  %v8502_v13 = vld [vmem:[#allocation61_spill] sm:$0xff]  ;;  %v8503_v23 = vld [vmem:[#allocation62_spill] sm:$0xff] }
 0x465   : > { %3491 = vmatpush1.bf16.msra.mxu0 %v8493_v12  ;;  %3532 = vmatpush1.bf16.msra.mxu1 %v8494_v14  ;;  %v8504_v12 = vld [vmem:[#allocation63_spill] sm:$0xff]  ;;  %v8505_v14 = vld [vmem:[#allocation64_spill] sm:$0xff] }
 0x466   : > { %3492 = vmatprep.subr.bf16.mxu0 %v8495_v9  ;;  %3533 = vmatprep.subr.bf16.mxu1 %v8496_v37  ;;  %v8506_v9 = vld [vmem:[#allocation65_spill] sm:$0xff]  ;;  %v8507_v37 = vld [vmem:[#allocation66_spill] sm:$0xff] }
 0x469   : > { %3493 = vmatpush1.bf16.msra.mxu0 %v8497_v19  ;;  %3534 = vmatpush1.bf16.msra.mxu1 %v8498_v20  ;;  %v8508_v19 = vld [vmem:[#allocation67_spill] sm:$0xff]  ;;  %v8509_v20 = vld [vmem:[#allocation68_spill] sm:$0xff] }
 0x46a   : > { %3494 = vmatprep.subr.bf16.mxu0 %v8499_v1  ;;  %3535 = vmatprep.subr.bf16.mxu1 %v8500_v55  ;;  %v8510_v1 = vld [vmem:[#allocation69_spill] sm:$0xff]  ;;  %v8511_v55 = vld [vmem:[#allocation70_spill] sm:$0xff] }
 0x46d   : > { %3495 = vmatpush1.bf16.msra.mxu0 %v8501_v41  ;;  %3536 = vmatpush1.bf16.msra.mxu1 %v8502_v13  ;;  %v8512_v41 = vld [vmem:[#allocation71_spill] sm:$0xff]  ;;  %v8513_v13 = vld [vmem:[#allocation72_spill] sm:$0xff] }
 0x46e   : > { %3496 = vmatprep.subr.bf16.mxu0 %v8503_v23  ;;  %3537 = vmatprep.subr.bf16.mxu1 %v8504_v12  ;;  %v8514_v23 = vld [vmem:[#allocation73_spill] sm:$0xff]  ;;  %v8515_v12 = vld [vmem:[#allocation74_spill] sm:$0xff] }
 0x471   : > { %3497 = vmatpush1.bf16.msra.mxu0 %v8505_v14  ;;  %3538 = vmatpush1.bf16.msra.mxu1 %v8506_v9  ;;  %v8516_v14 = vld [vmem:[#allocation75_spill] sm:$0xff] }
 0x472   : > { %3498 = vmatprep.subr.bf16.mxu0 %v8507_v37  ;;  %3539 = vmatprep.subr.bf16.mxu1 %v8508_v19 }
 0x475   : > { %3499 = vmatpush1.bf16.msra.mxu0 %v8509_v20  ;;  %3540 = vmatpush1.bf16.msra.mxu1 %v8510_v1 }
 0x476   : > { %3500 = vmatprep.subr.bf16.mxu0 %v8511_v55  ;;  %3541 = vmatprep.subr.bf16.mxu1 %v8512_v41 }
 0x479   : > { %3501 = vmatpush1.bf16.msra.mxu0 %v8513_v13  ;;  %3542 = vmatpush1.bf16.msra.mxu1 %v8514_v23 }
 0x47a   : > { %3552 = vmatprep.subr.bf16.mxu0 %v8515_v12  ;;  %3593 = vmatprep.subr.bf16.mxu1 %v8516_v14 }
 0x4cf   : > { %v3244_v9 = vpop.f32.mrb[24].mxu0  ;;  %v3285_v37 = vpop.f32.mrb[24].mxu1 }
 0x4d0   : > { %v3246_v40 = vpop.f32.mrb[25].mxu0  ;;  %v3287_v19 = vpop.f32.mrb[25].mxu1 }
 0x4d1   : > { %v3382_v39 = vcombine.low %v3244_v9, %v3246_v40  ;;  %v3383_v20 = vcombine.low %v3285_v37, %v3287_v19  ;;  %v3248_v38 = vpop.f32.mrb[26].mxu0  ;;  %v3289_v1 = vpop.f32.mrb[26].mxu1 }
 0x4d2   : > { %v3249_v25 = vpop.f32.mrb[27].mxu0  ;;  %v3290_v55 = vpop.f32.mrb[27].mxu1  ;;  %v3194_v38 = vld [vmem:[#allocation2 + $0x2] ss:$8 sm:$0xf] }
 0x4d3   : > { %v3392_v41 = vrot.slane %v3382_v39, %v6830_v47  ;;  %v3399_v13 = vrot.slane %v3383_v20, %v6830_v47  ;;  %v3195_v39 = vld [vmem:[#allocation2 + $0x2] ss:$8 sm:$0xf0] }
 0x4d4   : > { %v3196_v55 = vor.u32 %v3195_v39, %v3194_v38 }
 0x4d5   : > { %v3414_v7 = vcombine.low %v3392_v41, %v3399_v13 }
 0x4d7   : > { %v3422_v20 = vrot.slane %v3414_v7, %v6830_v47 }
 0x50f   : > { %v3326_v23 = vpop.f32.mrb[28].mxu0  ;;  %v3367_v4 = vpop.f32.mrb[28].mxu1 }
 0x510   : > { %v3328_v12 = vpop.f32.mrb[29].mxu0  ;;  %v3369_v51 = vpop.f32.mrb[29].mxu1 }
 0x511   : > { %v3384_v14 = vcombine.low %v3326_v23, %v3328_v12  ;;  %v3385_v62 = vcombine.low %v3367_v4, %v3369_v51  ;;  %v3330_v6 = vpop.f32.mrb[30].mxu0  ;;  %v3371_v2 = vpop.f32.mrb[30].mxu1 }
 0x512   : > { %v3331_v33 = vpop.f32.mrb[31].mxu0  ;;  %v3372_v9 = vpop.f32.mrb[31].mxu1 }
 0x513   : > { %v3406_v19 = vrot.slane %v3384_v14, %v6830_v47  ;;  %v3413_v1 = vrot.slane %v3385_v62, %v6830_v47 }
 0x515   : > { %v3415_v25 = vcombine.low %v3406_v19, %v3413_v1 }
 0x517   : > { %v3429_v40 = vrot.slane %v3415_v25, %v6830_v47 }
 0x519   : > { %v3430_v41 = vcombine.low %v3422_v20, %v3429_v40  ;;  %v8518_v20 = vld [vmem:[#allocation100_spill] sm:$0xff]  ;;  %v8519_v40 = vld [vmem:[#allocation101_spill] sm:$0xff] }
 0x51b   : > { %v3432_v13 = vadd.f32 %v3430_v41, %v3196_v55  ;;  %v8520_v55 = vld [vmem:[#allocation102_spill] sm:$0xff]  ;;  %v8521_v41 = vld [vmem:[#allocation103_spill] sm:$0xff] }
 0x51d   : > { %v5502_v12 = vmul.f32 -1.442695, %v3432_v13  ;;  %v3440_v6 = vrot.slane %v3432_v13, 6  ;;  %v8522_v13 = vld [vmem:[#allocation104_spill] sm:$0xff] }
 0x51f   : > { %5982 = vpow2.f32 %v5502_v12  ;;  %v8523_v12 = vld [vmem:[#allocation105_spill] sm:$0xff] }
 0x529   : > { %v5983_v23 = vpop.eup %5982 }
 0x52a   : > { %v3436_v2 = vadd.f32 1.0, %v5983_v23  ;;  %v8524_v23 = vld [vmem:[#allocation121_spill] sm:$0xff] }
 0x52c   : > { %5984 = vrcp.f32 %v3436_v2  ;;  %v8525_v2 = vld [vmem:[#allocation122_spill] sm:$0xff] }
 0x52d   : > { %5986 = vtanh.f32 %v3440_v6  ;;  %v8526_v6 = vld [vmem:[#allocation123_spill] sm:$0xff] }
 0x536   : > { %v5985_v14 = vpop.eup %5984 }
 0x537   : > { %v3444_v51 = vrot.slane %v5985_v14, 2  ;;  %v5987_v62 = vpop.eup %5986  ;;  %v3450_v7 = vrot.slane %v5985_v14, 4 }
 0x538   : > { %v3447_v4 = vmul.f32 %v5987_v62, %v5985_v14  ;;  %v8527_v14 = vld [vmem:[#allocation124_spill] sm:$0xff]  ;;  %v8529_v62 = vld [vmem:[#allocation126_spill] sm:$0xff] }
 0x539   : > { %v3446_v33 = vmul.f32 %v3444_v51, %v6988_v63  ;;  %v8517_v63 = vld [vmem:[#allocation99_spill] sm:$0xff]  ;;  %v8528_v51 = vld [vmem:[#allocation125_spill] sm:$0xff] }
 0x53b   : > { %v7134_v37 = vadd.f32 %v3447_v4, %v3446_v33  ;;  %v8530_v4 = vld [vmem:[#allocation127_spill] sm:$0xff]  ;;  %v8531_v33 = vld [vmem:[#allocation128_spill] sm:$0xff] }
 0x53d   : > { %5988 = vtanh.f32 %v7134_v37 }
 0x547   : > { %v5989_v9 = vpop.eup %5988 }
 0x548   : > { %v3452_v19 = vmul.f32 %v5989_v9, %v3450_v7  ;;  %v8532_v7 = vld [vmem:[#allocation129_spill] sm:$0xff]  ;;  %v8533_v9 = vld [vmem:[#allocation130_spill] sm:$0xff] }
 0x54a   : > { %v3465_v1 = vrot.slane %v3452_v19, %v6841_v8  ;;  %v3461_v25 = vrot.slane %v3452_v19, %v6843_v3  ;;  %v8534_v19 = vld [vmem:[#allocation131_spill] sm:$0xff] }
 0x54c   : > { %v3469_v38 = vpack.c.bf16 %v3465_v1, %v3465_v1  ;;  %v7139_v39 = vpack.c.bf16 %v3461_v25, %v3461_v25  ;;  %v8535_v1 = vld [vmem:[#allocation132_spill] sm:$0xff]  ;;  %v8536_v25 = vld [vmem:[#allocation133_spill] sm:$0xff] }
 0x54e   : > { %3502 = vmatprep.mubr.bf16.mxu0 %v3469_v38  ;;  %3543 = vmatprep.mubr.bf16.mxu1 %v3469_v38 }
 0x54f   : > { %3503 = vmatmul.mubr.bf16.vlgmr.msra.gmra.mrb[32].mxu0 %v7139_v39  ;;  %3544 = vmatmul.mubr.bf16.vlgmr.msra.gmra.mrb[32].mxu1 %v7139_v39 }
 0x550   : > { %3553 = vmatpush1.bf16.msra.mxu0 %v8334_v50  ;;  %3594 = vmatpush1.bf16.msra.mxu1 %v8335_v0 }
 0x551   : > { %3584 = vmatprep.mubr.bf16.mxu0 %v3469_v38  ;;  %3625 = vmatprep.mubr.bf16.mxu1 %v3469_v38  ;;  %v8537_v38 = vld [vmem:[#allocation134_spill] sm:$0xff] }
 0x552   : > { %3554 = vmatprep.subr.bf16.mxu0 %v8336_v32  ;;  %3595 = vmatprep.subr.bf16.mxu1 %v8337_v56 }
 0x554   : > { %3555 = vmatpush1.bf16.msra.mxu0 %v8338_v31  ;;  %3596 = vmatpush1.bf16.msra.mxu1 %v8339_v24 }
 0x555   : > { %3556 = vmatprep.subr.bf16.mxu0 %v8340_v48  ;;  %3597 = vmatprep.subr.bf16.mxu1 %v8341_v15 }
 0x558   : > { %3557 = vmatpush1.bf16.msra.mxu0 %v8342_v17  ;;  %3598 = vmatpush1.bf16.msra.mxu1 %v8343_v16 }
 0x559   : > { %3558 = vmatprep.subr.bf16.mxu0 %v8344_v49  ;;  %3599 = vmatprep.subr.bf16.mxu1 %v8345_v11 }
 0x55c   : > { %3559 = vmatpush1.bf16.msra.mxu0 %v8346_v26  ;;  %3600 = vmatpush1.bf16.msra.mxu1 %v8427_v10 }
 0x55d   : > { %3560 = vmatprep.subr.bf16.mxu0 %v8428_v58  ;;  %3601 = vmatprep.subr.bf16.mxu1 %v8429_v46 }
 0x560   : > { %3561 = vmatpush1.bf16.msra.mxu0 %v8430_v52  ;;  %3602 = vmatpush1.bf16.msra.mxu1 %v8431_v59 }
 0x561   : > { %3562 = vmatprep.subr.bf16.mxu0 %v8432_v60  ;;  %3603 = vmatprep.subr.bf16.mxu1 %v8433_v53 }
 0x564   : > { %3563 = vmatpush1.bf16.msra.mxu0 %v8434_v27  ;;  %3604 = vmatpush1.bf16.msra.mxu1 %v8435_v22 }
 0x565   : > { %3564 = vmatprep.subr.bf16.mxu0 %v8436_v21  ;;  %3605 = vmatprep.subr.bf16.mxu1 %v8517_v63 }
 0x568   : > { %3565 = vmatpush1.bf16.msra.mxu0 %v8518_v20  ;;  %3606 = vmatpush1.bf16.msra.mxu1 %v8519_v40 }
 0x569   : > { %3566 = vmatprep.subr.bf16.mxu0 %v8520_v55  ;;  %3607 = vmatprep.subr.bf16.mxu1 %v8521_v41 }
 0x56c   : > { %3567 = vmatpush1.bf16.msra.mxu0 %v8522_v13  ;;  %3608 = vmatpush1.bf16.msra.mxu1 %v8523_v12 }
 0x56d   : > { %3568 = vmatprep.subr.bf16.mxu0 %v8444_v36  ;;  %3609 = vmatprep.subr.bf16.mxu1 %v8445_v35 }
 0x570   : > { %3569 = vmatpush1.bf16.msra.mxu0 %v8446_v44  ;;  %3610 = vmatpush1.bf16.msra.mxu1 %v8447_v45 }
 0x571   : > { %3570 = vmatprep.subr.bf16.mxu0 %v8448_v29  ;;  %3611 = vmatprep.subr.bf16.mxu1 %v8449_v30 }
 0x574   : > { %3571 = vmatpush1.bf16.msra.mxu0 %v8450_v28  ;;  %3612 = vmatpush1.bf16.msra.mxu1 %v8451_v5 }
 0x575   : > { %3572 = vmatprep.subr.bf16.mxu0 %v8452_v54  ;;  %3613 = vmatprep.subr.bf16.mxu1 %v8453_v34 }
 0x578   : > { %3573 = vmatpush1.bf16.msra.mxu0 %v8454_v43  ;;  %3614 = vmatpush1.bf16.msra.mxu1 %v8375_v42 }
 0x579   : > { %3574 = vmatprep.subr.bf16.mxu0 %v8376_v57  ;;  %3615 = vmatprep.subr.bf16.mxu1 %v8377_v18 }
 0x57c   : > { %3575 = vmatpush1.bf16.msra.mxu0 %v8378_v61  ;;  %3616 = vmatpush1.bf16.msra.mxu1 %v8524_v23 }
 0x57d   : > { %3576 = vmatprep.subr.bf16.mxu0 %v8525_v2  ;;  %3617 = vmatprep.subr.bf16.mxu1 %v8526_v6 }
 0x580   : > { %3577 = vmatpush1.bf16.msra.mxu0 %v8527_v14  ;;  %3618 = vmatpush1.bf16.msra.mxu1 %v8528_v51  ;;  %v8538_v14 = vld [vmem:[#allocation135_spill] sm:$0xff]  ;;  %v8539_v51 = vld [vmem:[#allocation136_spill] sm:$0xff] }
 0x581   : > { %3578 = vmatprep.subr.bf16.mxu0 %v8529_v62  ;;  %3619 = vmatprep.subr.bf16.mxu1 %v8530_v4  ;;  %v8540_v62 = vld [vmem:[#allocation137_spill] sm:$0xff]  ;;  %v8541_v4 = vld [vmem:[#allocation10_spill] sm:$0xff] }
 0x584   : > { %3579 = vmatpush1.bf16.msra.mxu0 %v8531_v33  ;;  %3620 = vmatpush1.bf16.msra.mxu1 %v8532_v7  ;;  %v8542_v33 = vld [vmem:[#allocation11_spill] sm:$0xff] }
 0x585   : > { %3580 = vmatprep.subr.bf16.mxu0 %v8533_v9  ;;  %3621 = vmatprep.subr.bf16.mxu1 %v8534_v19  ;;  %v8543_v19 = vld [vmem:[#allocation12_spill] sm:$0xff]  ;;  %v8552_v9 = vld [vmem:[#allocation21_spill] sm:$0xff] }
 0x588   : > { %3581 = vmatpush1.bf16.msra.mxu0 %v8535_v1  ;;  %3622 = vmatpush1.bf16.msra.mxu1 %v8536_v25  ;;  %v8544_v1 = vld [vmem:[#allocation13_spill] sm:$0xff]  ;;  %v8545_v25 = vld [vmem:[#allocation14_spill] sm:$0xff] }
 0x589   : > { %3582 = vmatprep.subr.bf16.mxu0 %v8537_v38  ;;  %3623 = vmatprep.subr.bf16.mxu1 %v8538_v14  ;;  %v8546_v38 = vld [vmem:[#allocation15_spill] sm:$0xff]  ;;  %v8547_v14 = vld [vmem:[#allocation16_spill] sm:$0xff] }
 0x58c   : > { %3583 = vmatpush1.bf16.msra.mxu0 %v8539_v51  ;;  %3624 = vmatpush1.bf16.msra.mxu1 %v8540_v62  ;;  %v8548_v51 = vld [vmem:[#allocation17_spill] sm:$0xff]  ;;  %v8549_v62 = vld [vmem:[#allocation18_spill] sm:$0xff] }
 0x58d   : > { %3730 = vmatprep.subr.bf16.mxu0 %v8541_v4  ;;  %3771 = vmatprep.subr.bf16.mxu1 %v8542_v33  ;;  %v8550_v4 = vld [vmem:[#allocation19_spill] sm:$0xff]  ;;  %v8551_v33 = vld [vmem:[#allocation20_spill] sm:$0xff] }
 0x58f   : > { %3585 = vmatmul.mubr.bf16.vlgmr.msra.gmra.mrb[36].mxu0 %v7139_v39  ;;  %3626 = vmatmul.mubr.bf16.vlgmr.msra.gmra.mrb[36].mxu1 %v7139_v39  ;;  %v8553_v39 = vld [vmem:[#allocation22_spill] sm:$0xff] }
 0x590   : > { %3731 = vmatpush1.bf16.msra.mxu0 %v8543_v19  ;;  %3772 = vmatpush1.bf16.msra.mxu1 %v8544_v1  ;;  %v8554_v19 = vld [vmem:[#allocation23_spill] sm:$0xff]  ;;  %v8555_v1 = vld [vmem:[#allocation24_spill] sm:$0xff] }
 0x591   : > { %3732 = vmatprep.subr.bf16.mxu0 %v8545_v25  ;;  %3773 = vmatprep.subr.bf16.mxu1 %v8546_v38  ;;  %v8556_v25 = vld [vmem:[#allocation25_spill] sm:$0xff]  ;;  %v8557_v38 = vld [vmem:[#allocation26_spill] sm:$0xff] }
 0x594   : > { %3733 = vmatpush1.bf16.msra.mxu0 %v8547_v14  ;;  %3774 = vmatpush1.bf16.msra.mxu1 %v8548_v51  ;;  %v8558_v14 = vld [vmem:[#allocation27_spill] sm:$0xff]  ;;  %v8559_v51 = vld [vmem:[#allocation28_spill] sm:$0xff] }
 0x595   : > { %3734 = vmatprep.subr.bf16.mxu0 %v8549_v62  ;;  %3775 = vmatprep.subr.bf16.mxu1 %v8550_v4  ;;  %v8560_v62 = vld [vmem:[#allocation29_spill] sm:$0xff]  ;;  %v8561_v4 = vld [vmem:[#allocation30_spill] sm:$0xff] }
 0x598   : > { %3735 = vmatpush1.bf16.msra.mxu0 %v8551_v33  ;;  %3776 = vmatpush1.bf16.msra.mxu1 %v8552_v9  ;;  %v8562_v33 = vld [vmem:[#allocation31_spill] sm:$0xff]  ;;  %v8563_v9 = vld [vmem:[#allocation32_spill] sm:$0xff] }
 0x599   : > { %3736 = vmatprep.subr.bf16.mxu0 %v8553_v39  ;;  %3777 = vmatprep.subr.bf16.mxu1 %v8554_v19  ;;  %v8564_v39 = vld [vmem:[#allocation33_spill] sm:$0xff]  ;;  %v8565_v19 = vld [vmem:[#allocation34_spill] sm:$0xff] }
 0x59c   : > { %3737 = vmatpush1.bf16.msra.mxu0 %v8555_v1  ;;  %3778 = vmatpush1.bf16.msra.mxu1 %v8556_v25  ;;  %v8566_v1 = vld [vmem:[#allocation35_spill] sm:$0xff]  ;;  %v8567_v25 = vld [vmem:[#allocation36_spill] sm:$0xff] }
 0x59d   : > { %3738 = vmatprep.subr.bf16.mxu0 %v8557_v38  ;;  %3779 = vmatprep.subr.bf16.mxu1 %v8558_v14  ;;  %v8568_v38 = vld [vmem:[#allocation37_spill] sm:$0xff]  ;;  %v8569_v14 = vld [vmem:[#allocation38_spill] sm:$0xff] }
 0x5a0   : > { %3739 = vmatpush1.bf16.msra.mxu0 %v8559_v51  ;;  %3780 = vmatpush1.bf16.msra.mxu1 %v8560_v62  ;;  %v8570_v51 = vld [vmem:[#allocation39_spill] sm:$0xff]  ;;  %v8571_v62 = vld [vmem:[#allocation40_spill] sm:$0xff] }
 0x5a1   : > { %3740 = vmatprep.subr.bf16.mxu0 %v8561_v4  ;;  %3781 = vmatprep.subr.bf16.mxu1 %v8562_v33  ;;  %v8572_v4 = vld [vmem:[#allocation41_spill] sm:$0xff]  ;;  %v8573_v33 = vld [vmem:[#allocation42_spill] sm:$0xff] }
 0x5a4   : > { %3741 = vmatpush1.bf16.msra.mxu0 %v8563_v9  ;;  %3782 = vmatpush1.bf16.msra.mxu1 %v8564_v39  ;;  %v8574_v9 = vld [vmem:[#allocation43_spill] sm:$0xff]  ;;  %v8575_v39 = vld [vmem:[#allocation44_spill] sm:$0xff] }
 0x5a5   : > { %3742 = vmatprep.subr.bf16.mxu0 %v8565_v19  ;;  %3783 = vmatprep.subr.bf16.mxu1 %v8566_v1  ;;  %v8576_v19 = vld [vmem:[#allocation45_spill] sm:$0xff]  ;;  %v8577_v1 = vld [vmem:[#allocation46_spill] sm:$0xff] }
 0x5a8   : > { %3743 = vmatpush1.bf16.msra.mxu0 %v8567_v25  ;;  %3784 = vmatpush1.bf16.msra.mxu1 %v8568_v38  ;;  %v8578_v25 = vld [vmem:[#allocation47_spill] sm:$0xff]  ;;  %v8579_v38 = vld [vmem:[#allocation48_spill] sm:$0xff] }
 0x5a9   : > { %3744 = vmatprep.subr.bf16.mxu0 %v8569_v14  ;;  %3785 = vmatprep.subr.bf16.mxu1 %v8570_v51  ;;  %v8580_v14 = vld [vmem:[#allocation49_spill] sm:$0xff]  ;;  %v8581_v51 = vld [vmem:[#allocation50_spill] sm:$0xff] }
 0x5ac   : > { %3745 = vmatpush1.bf16.msra.mxu0 %v8571_v62  ;;  %3786 = vmatpush1.bf16.msra.mxu1 %v8572_v4  ;;  %v8582_v62 = vld [vmem:[#allocation51_spill] sm:$0xff]  ;;  %v8583_v4 = vld [vmem:[#allocation52_spill] sm:$0xff] }
 0x5ad   : > { %3746 = vmatprep.subr.bf16.mxu0 %v8573_v33  ;;  %3787 = vmatprep.subr.bf16.mxu1 %v8574_v9  ;;  %v8584_v33 = vld [vmem:[#allocation53_spill] sm:$0xff]  ;;  %v8585_v9 = vld [vmem:[#allocation54_spill] sm:$0xff] }
 0x5b0   : > { %3747 = vmatpush1.bf16.msra.mxu0 %v8575_v39  ;;  %3788 = vmatpush1.bf16.msra.mxu1 %v8576_v19  ;;  %v8586_v39 = vld [vmem:[#allocation55_spill] sm:$0xff]  ;;  %v8587_v19 = vld [vmem:[#allocation56_spill] sm:$0xff] }
 0x5b1   : > { %3748 = vmatprep.subr.bf16.mxu0 %v8577_v1  ;;  %3789 = vmatprep.subr.bf16.mxu1 %v8578_v25  ;;  %v8588_v1 = vld [vmem:[#allocation57_spill] sm:$0xff]  ;;  %v8589_v25 = vld [vmem:[#allocation58_spill] sm:$0xff] }
 0x5b4   : > { %3749 = vmatpush1.bf16.msra.mxu0 %v8579_v38  ;;  %3790 = vmatpush1.bf16.msra.mxu1 %v8580_v14  ;;  %v8590_v38 = vld [vmem:[#allocation59_spill] sm:$0xff]  ;;  %v8591_v14 = vld [vmem:[#allocation60_spill] sm:$0xff] }
 0x5b5   : > { %3750 = vmatprep.subr.bf16.mxu0 %v8581_v51  ;;  %3791 = vmatprep.subr.bf16.mxu1 %v8582_v62  ;;  %v8592_v51 = vld [vmem:[#allocation61_spill] sm:$0xff]  ;;  %v8593_v62 = vld [vmem:[#allocation62_spill] sm:$0xff] }
 0x5b8   : > { %3751 = vmatpush1.bf16.msra.mxu0 %v8583_v4  ;;  %3792 = vmatpush1.bf16.msra.mxu1 %v8584_v33  ;;  %v8594_v4 = vld [vmem:[#allocation63_spill] sm:$0xff]  ;;  %v8595_v33 = vld [vmem:[#allocation64_spill] sm:$0xff] }
 0x5b9   : > { %3752 = vmatprep.subr.bf16.mxu0 %v8585_v9  ;;  %3793 = vmatprep.subr.bf16.mxu1 %v8586_v39  ;;  %v8596_v9 = vld [vmem:[#allocation65_spill] sm:$0xff]  ;;  %v8597_v39 = vld [vmem:[#allocation66_spill] sm:$0xff] }
 0x5bc   : > { %3753 = vmatpush1.bf16.msra.mxu0 %v8587_v19  ;;  %3794 = vmatpush1.bf16.msra.mxu1 %v8588_v1  ;;  %v8598_v19 = vld [vmem:[#allocation67_spill] sm:$0xff]  ;;  %v8599_v1 = vld [vmem:[#allocation68_spill] sm:$0xff] }
 0x5bd   : > { %3754 = vmatprep.subr.bf16.mxu0 %v8589_v25  ;;  %3795 = vmatprep.subr.bf16.mxu1 %v8590_v38  ;;  %v8600_v25 = vld [vmem:[#allocation69_spill] sm:$0xff]  ;;  %v8601_v38 = vld [vmem:[#allocation70_spill] sm:$0xff] }
 0x5c0   : > { %3755 = vmatpush1.bf16.msra.mxu0 %v8591_v14  ;;  %3796 = vmatpush1.bf16.msra.mxu1 %v8592_v51  ;;  %v8602_v14 = vld [vmem:[#allocation71_spill] sm:$0xff]  ;;  %v8603_v51 = vld [vmem:[#allocation72_spill] sm:$0xff] }
 0x5c1   : > { %3756 = vmatprep.subr.bf16.mxu0 %v8593_v62  ;;  %3797 = vmatprep.subr.bf16.mxu1 %v8594_v4  ;;  %v8604_v62 = vld [vmem:[#allocation73_spill] sm:$0xff]  ;;  %v8605_v4 = vld [vmem:[#allocation74_spill] sm:$0xff] }
 0x5c4   : > { %3757 = vmatpush1.bf16.msra.mxu0 %v8595_v33  ;;  %3798 = vmatpush1.bf16.msra.mxu1 %v8596_v9  ;;  %v8606_v33 = vld [vmem:[#allocation75_spill] sm:$0xff] }
 0x5c5   : > { %3758 = vmatprep.subr.bf16.mxu0 %v8597_v39  ;;  %3799 = vmatprep.subr.bf16.mxu1 %v8598_v19 }
 0x5c8   : > { %3759 = vmatpush1.bf16.msra.mxu0 %v8599_v1  ;;  %3800 = vmatpush1.bf16.msra.mxu1 %v8600_v25 }
 0x5c9   : > { %3760 = vmatprep.subr.bf16.mxu0 %v8601_v38  ;;  %3801 = vmatprep.subr.bf16.mxu1 %v8602_v14 }
 0x5cc   : > { %3761 = vmatpush1.bf16.msra.mxu0 %v8603_v51  ;;  %3802 = vmatpush1.bf16.msra.mxu1 %v8604_v62 }
 0x5cd   : > { %3812 = vmatprep.subr.bf16.mxu0 %v8605_v4  ;;  %3853 = vmatprep.subr.bf16.mxu1 %v8606_v33 }
 0x622   : > { %v3504_v9 = vpop.f32.mrb[32].mxu0  ;;  %v3545_v39 = vpop.f32.mrb[32].mxu1 }
 0x623   : > { %v3506_v7 = vpop.f32.mrb[33].mxu0  ;;  %v3547_v19 = vpop.f32.mrb[33].mxu1 }
 0x624   : > { %v3642_v6 = vcombine.low %v3504_v9, %v3506_v7  ;;  %v3643_v1 = vcombine.low %v3545_v39, %v3547_v19  ;;  %v3508_v2 = vpop.f32.mrb[34].mxu0  ;;  %v3549_v25 = vpop.f32.mrb[34].mxu1  ;;  %v3454_v19 = vld [vmem:[#allocation2 + $0x3] ss:$8 sm:$0xf] }
 0x625   : > { %v3509_v23 = vpop.f32.mrb[35].mxu0  ;;  %v3550_v38 = vpop.f32.mrb[35].mxu1 }
 0x626   : > { %v3652_v14 = vrot.slane %v3642_v6, %v6830_v47  ;;  %v3659_v51 = vrot.slane %v3643_v1, %v6830_v47  ;;  %v3455_v6 = vld [vmem:[#allocation2 + $0x3] ss:$8 sm:$0xf0] }
 0x628   : > { %v3674_v61 = vcombine.low %v3652_v14, %v3659_v51  ;;  %v3456_v51 = vor.u32 %v3455_v6, %v3454_v19 }
 0x62a   : > { %v3682_v1 = vrot.slane %v3674_v61, %v6830_v47 }
 0x662   : > { %v3586_v62 = vpop.f32.mrb[36].mxu0  ;;  %v3627_v18 = vpop.f32.mrb[36].mxu1 }
 0x663   : > { %v3588_v4 = vpop.f32.mrb[37].mxu0  ;;  %v3629_v57 = vpop.f32.mrb[37].mxu1 }
 0x664   : > { %v3644_v33 = vcombine.low %v3586_v62, %v3588_v4  ;;  %v3645_v42 = vcombine.low %v3627_v18, %v3629_v57  ;;  %v3590_v43 = vpop.f32.mrb[38].mxu0  ;;  %v3631_v34 = vpop.f32.mrb[38].mxu1 }
 0x665   : > { %v3591_v54 = vpop.f32.mrb[39].mxu0  ;;  %v3632_v7 = vpop.f32.mrb[39].mxu1 }
 0x666   : > { %v3666_v2 = vrot.slane %v3644_v33, %v6830_v47  ;;  %v3673_v23 = vrot.slane %v3645_v42, %v6830_v47 }
 0x668   : > { %v3675_v9 = vcombine.low %v3666_v2, %v3673_v23 }
 0x66a   : > { %v3689_v14 = vrot.slane %v3675_v9, %v6830_v47 }
 0x66c   : > { %v3690_v25 = vcombine.low %v3682_v1, %v3689_v14  ;;  %v8608_v1 = vld [vmem:[#allocation115_spill] sm:$0xff]  ;;  %v8609_v14 = vld [vmem:[#allocation116_spill] sm:$0xff] }
 0x66e   : > { %v3692_v38 = vadd.f32 %v3690_v25, %v3456_v51  ;;  %v8610_v51 = vld [vmem:[#allocation117_spill] sm:$0xff]  ;;  %v8611_v25 = vld [vmem:[#allocation118_spill] sm:$0xff] }
 0x670   : > { %v5503_v62 = vmul.f32 -1.442695, %v3692_v38  ;;  %v3700_v54 = vrot.slane %v3692_v38, 6  ;;  %v8612_v38 = vld [vmem:[#allocation119_spill] sm:$0xff] }
 0x672   : > { %5990 = vpow2.f32 %v5503_v62  ;;  %v8613_v62 = vld [vmem:[#allocation120_spill] sm:$0xff] }
 0x67c   : > { %v5991_v57 = vpop.eup %5990 }
 0x67d   : > { %v3696_v18 = vadd.f32 1.0, %v5991_v57  ;;  %v8614_v57 = vld [vmem:[#allocation121_spill] sm:$0xff] }
 0x67f   : > { %5992 = vrcp.f32 %v3696_v18  ;;  %v8615_v18 = vld [vmem:[#allocation122_spill] sm:$0xff] }
 0x680   : > { %5994 = vtanh.f32 %v3700_v54  ;;  %v8616_v54 = vld [vmem:[#allocation123_spill] sm:$0xff] }
 0x689   : > { %v5993_v34 = vpop.eup %5992 }
 0x68a   : > { %v3704_v43 = vrot.slane %v5993_v34, 2  ;;  %v5995_v42 = vpop.eup %5994  ;;  %v3710_v61 = vrot.slane %v5993_v34, 4 }
 0x68b   : > { %v3707_v4 = vmul.f32 %v5995_v42, %v5993_v34  ;;  %v8617_v34 = vld [vmem:[#allocation124_spill] sm:$0xff]  ;;  %v8619_v42 = vld [vmem:[#allocation126_spill] sm:$0xff] }
 0x68c   : > { %v3706_v33 = vmul.f32 %v3704_v43, %v7134_v37  ;;  %v8607_v37 = vld [vmem:[#allocation114_spill] sm:$0xff]  ;;  %v8618_v43 = vld [vmem:[#allocation125_spill] sm:$0xff] }
 0x68e   : > { %v7280_v39 = vadd.f32 %v3707_v4, %v3706_v33  ;;  %v8620_v4 = vld [vmem:[#allocation127_spill] sm:$0xff]  ;;  %v8621_v33 = vld [vmem:[#allocation128_spill] sm:$0xff] }
 0x690   : > { %5996 = vtanh.f32 %v7280_v39 }
 0x69a   : > { %v5997_v7 = vpop.eup %5996 }
 0x69b   : > { %v3712_v2 = vmul.f32 %v5997_v7, %v3710_v61  ;;  %v8622_v61 = vld [vmem:[#allocation129_spill] sm:$0xff]  ;;  %v8623_v7 = vld [vmem:[#allocation130_spill] sm:$0xff] }
 0x69d   : > { %v3725_v23 = vrot.slane %v3712_v2, %v6841_v8  ;;  %v3721_v9 = vrot.slane %v3712_v2, %v6843_v3  ;;  %v8624_v2 = vld [vmem:[#allocation131_spill] sm:$0xff] }
 0x69f   : > { %v3729_v19 = vpack.c.bf16 %v3725_v23, %v3725_v23  ;;  %v7285_v6 = vpack.c.bf16 %v3721_v9, %v3721_v9  ;;  %v8625_v23 = vld [vmem:[#allocation132_spill] sm:$0xff]  ;;  %v8626_v9 = vld [vmem:[#allocation133_spill] sm:$0xff] }
 0x6a1   : > { %3762 = vmatprep.mubr.bf16.mxu0 %v3729_v19  ;;  %3803 = vmatprep.mubr.bf16.mxu1 %v3729_v19 }
 0x6a2   : > { %3763 = vmatmul.mubr.bf16.vlgmr.msra.gmra.mrb[40].mxu0 %v7285_v6  ;;  %3804 = vmatmul.mubr.bf16.vlgmr.msra.gmra.mrb[40].mxu1 %v7285_v6 }
 0x6a3   : > { %3813 = vmatpush1.bf16.msra.mxu0 %v8334_v50  ;;  %3854 = vmatpush1.bf16.msra.mxu1 %v8335_v0 }
 0x6a4   : > { %3844 = vmatprep.mubr.bf16.mxu0 %v3729_v19  ;;  %3885 = vmatprep.mubr.bf16.mxu1 %v3729_v19  ;;  %v8627_v19 = vld [vmem:[#allocation134_spill] sm:$0xff] }
 0x6a5   : > { %3814 = vmatprep.subr.bf16.mxu0 %v8336_v32  ;;  %3855 = vmatprep.subr.bf16.mxu1 %v8337_v56 }
 0x6a7   : > { %3815 = vmatpush1.bf16.msra.mxu0 %v8338_v31  ;;  %3856 = vmatpush1.bf16.msra.mxu1 %v8339_v24 }
 0x6a8   : > { %3816 = vmatprep.subr.bf16.mxu0 %v8340_v48  ;;  %3857 = vmatprep.subr.bf16.mxu1 %v8341_v15 }
 0x6ab   : > { %3817 = vmatpush1.bf16.msra.mxu0 %v8342_v17  ;;  %3858 = vmatpush1.bf16.msra.mxu1 %v8343_v16 }
 0x6ac   : > { %3818 = vmatprep.subr.bf16.mxu0 %v8344_v49  ;;  %3859 = vmatprep.subr.bf16.mxu1 %v8345_v11 }
 0x6af   : > { %3819 = vmatpush1.bf16.msra.mxu0 %v8346_v26  ;;  %3860 = vmatpush1.bf16.msra.mxu1 %v8427_v10 }
 0x6b0   : > { %3820 = vmatprep.subr.bf16.mxu0 %v8428_v58  ;;  %3861 = vmatprep.subr.bf16.mxu1 %v8429_v46 }
 0x6b3   : > { %3821 = vmatpush1.bf16.msra.mxu0 %v8430_v52  ;;  %3862 = vmatpush1.bf16.msra.mxu1 %v8431_v59 }
 0x6b4   : > { %3822 = vmatprep.subr.bf16.mxu0 %v8432_v60  ;;  %3863 = vmatprep.subr.bf16.mxu1 %v8433_v53 }
 0x6b7   : > { %3823 = vmatpush1.bf16.msra.mxu0 %v8434_v27  ;;  %3864 = vmatpush1.bf16.msra.mxu1 %v8435_v22 }
 0x6b8   : > { %3824 = vmatprep.subr.bf16.mxu0 %v8436_v21  ;;  %3865 = vmatprep.subr.bf16.mxu1 %v8517_v63 }
 0x6bb   : > { %3825 = vmatpush1.bf16.msra.mxu0 %v8518_v20  ;;  %3866 = vmatpush1.bf16.msra.mxu1 %v8519_v40 }
 0x6bc   : > { %3826 = vmatprep.subr.bf16.mxu0 %v8520_v55  ;;  %3867 = vmatprep.subr.bf16.mxu1 %v8521_v41 }
 0x6bf   : > { %3827 = vmatpush1.bf16.msra.mxu0 %v8522_v13  ;;  %3868 = vmatpush1.bf16.msra.mxu1 %v8523_v12 }
 0x6c0   : > { %3828 = vmatprep.subr.bf16.mxu0 %v8444_v36  ;;  %3869 = vmatprep.subr.bf16.mxu1 %v8445_v35 }
 0x6c3   : > { %3829 = vmatpush1.bf16.msra.mxu0 %v8446_v44  ;;  %3870 = vmatpush1.bf16.msra.mxu1 %v8447_v45 }
 0x6c4   : > { %3830 = vmatprep.subr.bf16.mxu0 %v8448_v29  ;;  %3871 = vmatprep.subr.bf16.mxu1 %v8449_v30 }
 0x6c7   : > { %3831 = vmatpush1.bf16.msra.mxu0 %v8450_v28  ;;  %3872 = vmatpush1.bf16.msra.mxu1 %v8451_v5 }
 0x6c8   : > { %3832 = vmatprep.subr.bf16.mxu0 %v8607_v37  ;;  %3873 = vmatprep.subr.bf16.mxu1 %v8608_v1 }
 0x6cb   : > { %3833 = vmatpush1.bf16.msra.mxu0 %v8609_v14  ;;  %3874 = vmatpush1.bf16.msra.mxu1 %v8610_v51 }
 0x6cc   : > { %3834 = vmatprep.subr.bf16.mxu0 %v8611_v25  ;;  %3875 = vmatprep.subr.bf16.mxu1 %v8612_v38 }
 0x6cf   : > { %3835 = vmatpush1.bf16.msra.mxu0 %v8613_v62  ;;  %3876 = vmatpush1.bf16.msra.mxu1 %v8614_v57 }
 0x6d0   : > { %3836 = vmatprep.subr.bf16.mxu0 %v8615_v18  ;;  %3877 = vmatprep.subr.bf16.mxu1 %v8616_v54 }
 0x6d3   : > { %3837 = vmatpush1.bf16.msra.mxu0 %v8617_v34  ;;  %3878 = vmatpush1.bf16.msra.mxu1 %v8618_v43  ;;  %v8628_v34 = vld [vmem:[#allocation135_spill] sm:$0xff]  ;;  %v8629_v43 = vld [vmem:[#allocation136_spill] sm:$0xff] }
 0x6d4   : > { %3838 = vmatprep.subr.bf16.mxu0 %v8619_v42  ;;  %3879 = vmatprep.subr.bf16.mxu1 %v8620_v4  ;;  %v8630_v42 = vld [vmem:[#allocation137_spill] sm:$0xff]  ;;  %v8631_v4 = vld [vmem:[#allocation10_spill] sm:$0xff] }
 0x6d7   : > { %3839 = vmatpush1.bf16.msra.mxu0 %v8621_v33  ;;  %3880 = vmatpush1.bf16.msra.mxu1 %v8622_v61  ;;  %v8632_v33 = vld [vmem:[#allocation11_spill] sm:$0xff] }
 0x6d8   : > { %3840 = vmatprep.subr.bf16.mxu0 %v8623_v7  ;;  %3881 = vmatprep.subr.bf16.mxu1 %v8624_v2  ;;  %v8633_v2 = vld [vmem:[#allocation12_spill] sm:$0xff]  ;;  %v8642_v7 = vld [vmem:[#allocation21_spill] sm:$0xff] }
 0x6db   : > { %3841 = vmatpush1.bf16.msra.mxu0 %v8625_v23  ;;  %3882 = vmatpush1.bf16.msra.mxu1 %v8626_v9  ;;  %v8634_v23 = vld [vmem:[#allocation13_spill] sm:$0xff]  ;;  %v8635_v9 = vld [vmem:[#allocation14_spill] sm:$0xff] }
 0x6dc   : > { %3842 = vmatprep.subr.bf16.mxu0 %v8627_v19  ;;  %3883 = vmatprep.subr.bf16.mxu1 %v8628_v34  ;;  %v8636_v19 = vld [vmem:[#allocation15_spill] sm:$0xff]  ;;  %v8637_v34 = vld [vmem:[#allocation16_spill] sm:$0xff] }
 0x6df   : > { %3843 = vmatpush1.bf16.msra.mxu0 %v8629_v43  ;;  %3884 = vmatpush1.bf16.msra.mxu1 %v8630_v42  ;;  %v8638_v43 = vld [vmem:[#allocation17_spill] sm:$0xff]  ;;  %v8639_v42 = vld [vmem:[#allocation18_spill] sm:$0xff] }
 0x6e0   : > { %3990 = vmatprep.subr.bf16.mxu0 %v8631_v4  ;;  %4031 = vmatprep.subr.bf16.mxu1 %v8632_v33  ;;  %v8640_v4 = vld [vmem:[#allocation19_spill] sm:$0xff]  ;;  %v8641_v33 = vld [vmem:[#allocation20_spill] sm:$0xff] }
 0x6e2   : > { %3845 = vmatmul.mubr.bf16.vlgmr.msra.gmra.mrb[44].mxu0 %v7285_v6  ;;  %3886 = vmatmul.mubr.bf16.vlgmr.msra.gmra.mrb[44].mxu1 %v7285_v6  ;;  %v8643_v6 = vld [vmem:[#allocation22_spill] sm:$0xff] }
 0x6e3   : > { %3991 = vmatpush1.bf16.msra.mxu0 %v8633_v2  ;;  %4032 = vmatpush1.bf16.msra.mxu1 %v8634_v23  ;;  %v8644_v2 = vld [vmem:[#allocation23_spill] sm:$0xff]  ;;  %v8645_v23 = vld [vmem:[#allocation24_spill] sm:$0xff] }
 0x6e4   : > { %3992 = vmatprep.subr.bf16.mxu0 %v8635_v9  ;;  %4033 = vmatprep.subr.bf16.mxu1 %v8636_v19  ;;  %v8646_v9 = vld [vmem:[#allocation25_spill] sm:$0xff]  ;;  %v8647_v19 = vld [vmem:[#allocation26_spill] sm:$0xff] }
 0x6e7   : > { %3993 = vmatpush1.bf16.msra.mxu0 %v8637_v34  ;;  %4034 = vmatpush1.bf16.msra.mxu1 %v8638_v43  ;;  %v8648_v34 = vld [vmem:[#allocation27_spill] sm:$0xff]  ;;  %v8649_v43 = vld [vmem:[#allocation28_spill] sm:$0xff] }
 0x6e8   : > { %3994 = vmatprep.subr.bf16.mxu0 %v8639_v42  ;;  %4035 = vmatprep.subr.bf16.mxu1 %v8640_v4  ;;  %v8650_v42 = vld [vmem:[#allocation29_spill] sm:$0xff]  ;;  %v8651_v4 = vld [vmem:[#allocation30_spill] sm:$0xff] }
 0x6eb   : > { %3995 = vmatpush1.bf16.msra.mxu0 %v8641_v33  ;;  %4036 = vmatpush1.bf16.msra.mxu1 %v8642_v7  ;;  %v8652_v33 = vld [vmem:[#allocation31_spill] sm:$0xff]  ;;  %v8653_v7 = vld [vmem:[#allocation32_spill] sm:$0xff] }
 0x6ec   : > { %3996 = vmatprep.subr.bf16.mxu0 %v8643_v6  ;;  %4037 = vmatprep.subr.bf16.mxu1 %v8644_v2  ;;  %v8654_v6 = vld [vmem:[#allocation33_spill] sm:$0xff]  ;;  %v8655_v2 = vld [vmem:[#allocation34_spill] sm:$0xff] }
 0x6ef   : > { %3997 = vmatpush1.bf16.msra.mxu0 %v8645_v23  ;;  %4038 = vmatpush1.bf16.msra.mxu1 %v8646_v9  ;;  %v8656_v23 = vld [vmem:[#allocation35_spill] sm:$0xff]  ;;  %v8657_v9 = vld [vmem:[#allocation36_spill] sm:$0xff] }
 0x6f0   : > { %3998 = vmatprep.subr.bf16.mxu0 %v8647_v19  ;;  %4039 = vmatprep.subr.bf16.mxu1 %v8648_v34  ;;  %v8658_v19 = vld [vmem:[#allocation37_spill] sm:$0xff]  ;;  %v8659_v34 = vld [vmem:[#allocation38_spill] sm:$0xff] }
 0x6f3   : > { %3999 = vmatpush1.bf16.msra.mxu0 %v8649_v43  ;;  %4040 = vmatpush1.bf16.msra.mxu1 %v8650_v42  ;;  %v8660_v43 = vld [vmem:[#allocation39_spill] sm:$0xff]  ;;  %v8661_v42 = vld [vmem:[#allocation40_spill] sm:$0xff] }
 0x6f4   : > { %4000 = vmatprep.subr.bf16.mxu0 %v8651_v4  ;;  %4041 = vmatprep.subr.bf16.mxu1 %v8652_v33  ;;  %v8662_v4 = vld [vmem:[#allocation41_spill] sm:$0xff]  ;;  %v8663_v33 = vld [vmem:[#allocation42_spill] sm:$0xff] }
 0x6f7   : > { %4001 = vmatpush1.bf16.msra.mxu0 %v8653_v7  ;;  %4042 = vmatpush1.bf16.msra.mxu1 %v8654_v6  ;;  %v8664_v7 = vld [vmem:[#allocation43_spill] sm:$0xff]  ;;  %v8665_v6 = vld [vmem:[#allocation44_spill] sm:$0xff] }
 0x6f8   : > { %4002 = vmatprep.subr.bf16.mxu0 %v8655_v2  ;;  %4043 = vmatprep.subr.bf16.mxu1 %v8656_v23  ;;  %v8666_v2 = vld [vmem:[#allocation45_spill] sm:$0xff]  ;;  %v8667_v23 = vld [vmem:[#allocation46_spill] sm:$0xff] }
 0x6fb   : > { %4003 = vmatpush1.bf16.msra.mxu0 %v8657_v9  ;;  %4044 = vmatpush1.bf16.msra.mxu1 %v8658_v19  ;;  %v8668_v9 = vld [vmem:[#allocation47_spill] sm:$0xff]  ;;  %v8669_v19 = vld [vmem:[#allocation48_spill] sm:$0xff] }
 0x6fc   : > { %4004 = vmatprep.subr.bf16.mxu0 %v8659_v34  ;;  %4045 = vmatprep.subr.bf16.mxu1 %v8660_v43  ;;  %v8670_v34 = vld [vmem:[#allocation49_spill] sm:$0xff]  ;;  %v8671_v43 = vld [vmem:[#allocation50_spill] sm:$0xff] }
 0x6ff   : > { %4005 = vmatpush1.bf16.msra.mxu0 %v8661_v42  ;;  %4046 = vmatpush1.bf16.msra.mxu1 %v8662_v4  ;;  %v8672_v42 = vld [vmem:[#allocation51_spill] sm:$0xff]  ;;  %v8673_v4 = vld [vmem:[#allocation52_spill] sm:$0xff] }
 0x700   : > { %4006 = vmatprep.subr.bf16.mxu0 %v8663_v33  ;;  %4047 = vmatprep.subr.bf16.mxu1 %v8664_v7  ;;  %v8674_v33 = vld [vmem:[#allocation53_spill] sm:$0xff]  ;;  %v8675_v7 = vld [vmem:[#allocation54_spill] sm:$0xff] }
 0x703   : > { %4007 = vmatpush1.bf16.msra.mxu0 %v8665_v6  ;;  %4048 = vmatpush1.bf16.msra.mxu1 %v8666_v2  ;;  %v8676_v6 = vld [vmem:[#allocation55_spill] sm:$0xff]  ;;  %v8677_v2 = vld [vmem:[#allocation56_spill] sm:$0xff] }
 0x704   : > { %4008 = vmatprep.subr.bf16.mxu0 %v8667_v23  ;;  %4049 = vmatprep.subr.bf16.mxu1 %v8668_v9  ;;  %v8678_v23 = vld [vmem:[#allocation57_spill] sm:$0xff]  ;;  %v8679_v9 = vld [vmem:[#allocation58_spill] sm:$0xff] }
 0x707   : > { %4009 = vmatpush1.bf16.msra.mxu0 %v8669_v19  ;;  %4050 = vmatpush1.bf16.msra.mxu1 %v8670_v34  ;;  %v8680_v19 = vld [vmem:[#allocation59_spill] sm:$0xff]  ;;  %v8681_v34 = vld [vmem:[#allocation60_spill] sm:$0xff] }
 0x708   : > { %4010 = vmatprep.subr.bf16.mxu0 %v8671_v43  ;;  %4051 = vmatprep.subr.bf16.mxu1 %v8672_v42  ;;  %v8682_v43 = vld [vmem:[#allocation61_spill] sm:$0xff]  ;;  %v8683_v42 = vld [vmem:[#allocation62_spill] sm:$0xff] }
 0x70b   : > { %4011 = vmatpush1.bf16.msra.mxu0 %v8673_v4  ;;  %4052 = vmatpush1.bf16.msra.mxu1 %v8674_v33  ;;  %v8684_v4 = vld [vmem:[#allocation63_spill] sm:$0xff]  ;;  %v8685_v33 = vld [vmem:[#allocation64_spill] sm:$0xff] }
 0x70c   : > { %4012 = vmatprep.subr.bf16.mxu0 %v8675_v7  ;;  %4053 = vmatprep.subr.bf16.mxu1 %v8676_v6  ;;  %v8686_v7 = vld [vmem:[#allocation65_spill] sm:$0xff]  ;;  %v8687_v6 = vld [vmem:[#allocation66_spill] sm:$0xff] }
 0x70f   : > { %4013 = vmatpush1.bf16.msra.mxu0 %v8677_v2  ;;  %4054 = vmatpush1.bf16.msra.mxu1 %v8678_v23  ;;  %v8688_v2 = vld [vmem:[#allocation67_spill] sm:$0xff]  ;;  %v8689_v23 = vld [vmem:[#allocation68_spill] sm:$0xff] }
 0x710   : > { %4014 = vmatprep.subr.bf16.mxu0 %v8679_v9  ;;  %4055 = vmatprep.subr.bf16.mxu1 %v8680_v19  ;;  %v8690_v9 = vld [vmem:[#allocation69_spill] sm:$0xff]  ;;  %v8691_v19 = vld [vmem:[#allocation70_spill] sm:$0xff] }
 0x713   : > { %4015 = vmatpush1.bf16.msra.mxu0 %v8681_v34  ;;  %4056 = vmatpush1.bf16.msra.mxu1 %v8682_v43  ;;  %v8692_v34 = vld [vmem:[#allocation71_spill] sm:$0xff]  ;;  %v8693_v43 = vld [vmem:[#allocation72_spill] sm:$0xff] }
 0x714   : > { %4016 = vmatprep.subr.bf16.mxu0 %v8683_v42  ;;  %4057 = vmatprep.subr.bf16.mxu1 %v8684_v4  ;;  %v8694_v42 = vld [vmem:[#allocation73_spill] sm:$0xff]  ;;  %v8695_v4 = vld [vmem:[#allocation74_spill] sm:$0xff] }
 0x717   : > { %4017 = vmatpush1.bf16.msra.mxu0 %v8685_v33  ;;  %4058 = vmatpush1.bf16.msra.mxu1 %v8686_v7  ;;  %v8696_v33 = vld [vmem:[#allocation75_spill] sm:$0xff] }
 0x718   : > { %4018 = vmatprep.subr.bf16.mxu0 %v8687_v6  ;;  %4059 = vmatprep.subr.bf16.mxu1 %v8688_v2 }
 0x71b   : > { %4019 = vmatpush1.bf16.msra.mxu0 %v8689_v23  ;;  %4060 = vmatpush1.bf16.msra.mxu1 %v8690_v9 }
 0x71c   : > { %4020 = vmatprep.subr.bf16.mxu0 %v8691_v19  ;;  %4061 = vmatprep.subr.bf16.mxu1 %v8692_v34 }
 0x71f   : > { %4021 = vmatpush1.bf16.msra.mxu0 %v8693_v43  ;;  %4062 = vmatpush1.bf16.msra.mxu1 %v8694_v42 }
 0x720   : > { %4072 = vmatprep.subr.bf16.mxu0 %v8695_v4  ;;  %4113 = vmatprep.subr.bf16.mxu1 %v8696_v33 }
 0x775   : > { %v3764_v7 = vpop.f32.mrb[40].mxu0  ;;  %v3805_v6 = vpop.f32.mrb[40].mxu1 }
 0x776   : > { %v3766_v61 = vpop.f32.mrb[41].mxu0  ;;  %v3807_v2 = vpop.f32.mrb[41].mxu1 }
 0x777   : > { %v3902_v54 = vcombine.low %v3764_v7, %v3766_v61  ;;  %v3903_v23 = vcombine.low %v3805_v6, %v3807_v2  ;;  %v3768_v18 = vpop.f32.mrb[42].mxu0  ;;  %v3809_v9 = vpop.f32.mrb[42].mxu1  ;;  %v3714_v2 = vld [vmem:[#allocation2 + $0x4] ss:$8 sm:$0xf] }
 0x778   : > { %v3769_v57 = vpop.f32.mrb[43].mxu0  ;;  %v3810_v19 = vpop.f32.mrb[43].mxu1 }
 0x779   : > { %v3912_v34 = vrot.slane %v3902_v54, %v6830_v47  ;;  %v3919_v43 = vrot.slane %v3903_v23, %v6830_v47  ;;  %v3715_v54 = vld [vmem:[#allocation2 + $0x4] ss:$8 sm:$0xf0] }
 0x77b   : > { %v3934_v62 = vcombine.low %v3912_v34, %v3919_v43  ;;  %v3716_v43 = vor.u32 %v3715_v54, %v3714_v2 }
 0x77d   : > { %v3942_v23 = vrot.slane %v3934_v62, %v6830_v47 }
 0x7b5   : > { %v3846_v42 = vpop.f32.mrb[44].mxu0  ;;  %v3887_v38 = vpop.f32.mrb[44].mxu1 }
 0x7b6   : > { %v3848_v4 = vpop.f32.mrb[45].mxu0  ;;  %v3889_v25 = vpop.f32.mrb[45].mxu1 }
 0x7b7   : > { %v3904_v33 = vcombine.low %v3846_v42, %v3848_v4  ;;  %v3905_v51 = vcombine.low %v3887_v38, %v3889_v25  ;;  %v3850_v14 = vpop.f32.mrb[46].mxu0  ;;  %v3891_v1 = vpop.f32.mrb[46].mxu1 }
 0x7b8   : > { %v3851_v37 = vpop.f32.mrb[47].mxu0  ;;  %v3892_v61 = vpop.f32.mrb[47].mxu1 }
 0x7b9   : > { %v3926_v18 = vrot.slane %v3904_v33, %v6830_v47  ;;  %v3933_v57 = vrot.slane %v3905_v51, %v6830_v47 }
 0x7bb   : > { %v3935_v7 = vcombine.low %v3926_v18, %v3933_v57 }
 0x7bd   : > { %v3949_v34 = vrot.slane %v3935_v7, %v6830_v47 }
 0x7bf   : > { %v3950_v9 = vcombine.low %v3942_v23, %v3949_v34  ;;  %v8698_v23 = vld [vmem:[#allocation115_spill] sm:$0xff]  ;;  %v8699_v34 = vld [vmem:[#allocation116_spill] sm:$0xff] }
 0x7c1   : > { %v3952_v19 = vadd.f32 %v3950_v9, %v3716_v43  ;;  %v8700_v43 = vld [vmem:[#allocation117_spill] sm:$0xff]  ;;  %v8701_v9 = vld [vmem:[#allocation118_spill] sm:$0xff] }
 0x7c3   : > { %v5504_v42 = vmul.f32 -1.442695, %v3952_v19  ;;  %v3960_v37 = vrot.slane %v3952_v19, 6  ;;  %v8702_v19 = vld [vmem:[#allocation119_spill] sm:$0xff] }
 0x7c5   : > { %5998 = vpow2.f32 %v5504_v42  ;;  %v8703_v42 = vld [vmem:[#allocation120_spill] sm:$0xff] }
 0x7cf   : > { %v5999_v14 = vpop.eup %5998 }
 0x7d0   : > { %v3956_v1 = vadd.f32 1.0, %v5999_v14  ;;  %v8704_v14 = vld [vmem:[#allocation121_spill] sm:$0xff] }
 0x7d2   : > { %6000 = vrcp.f32 %v3956_v1  ;;  %v8705_v1 = vld [vmem:[#allocation122_spill] sm:$0xff] }
 0x7d3   : > { %6002 = vtanh.f32 %v3960_v37  ;;  %v8706_v37 = vld [vmem:[#allocation123_spill] sm:$0xff] }
 0x7dc   : > { %v6001_v25 = vpop.eup %6000 }
 0x7dd   : > { %v3964_v38 = vrot.slane %v6001_v25, 2  ;;  %v6003_v51 = vpop.eup %6002  ;;  %v3970_v62 = vrot.slane %v6001_v25, 4 }
 0x7de   : > { %v3967_v4 = vmul.f32 %v6003_v51, %v6001_v25  ;;  %v8707_v25 = vld [vmem:[#allocation124_spill] sm:$0xff]  ;;  %v8709_v51 = vld [vmem:[#allocation126_spill] sm:$0xff] }
 0x7df   : > { %v3966_v33 = vmul.f32 %v3964_v38, %v7280_v39  ;;  %v8697_v39 = vld [vmem:[#allocation114_spill] sm:$0xff]  ;;  %v8708_v38 = vld [vmem:[#allocation125_spill] sm:$0xff] }
 0x7e1   : > { %v7426_v6 = vadd.f32 %v3967_v4, %v3966_v33  ;;  %v8710_v4 = vld [vmem:[#allocation127_spill] sm:$0xff]  ;;  %v8711_v33 = vld [vmem:[#allocation128_spill] sm:$0xff] }
 0x7e3   : > { %6004 = vtanh.f32 %v7426_v6 }
 0x7ed   : > { %v6005_v61 = vpop.eup %6004 }
 0x7ee   : > { %v3972_v18 = vmul.f32 %v6005_v61, %v3970_v62  ;;  %v8712_v62 = vld [vmem:[#allocation129_spill] sm:$0xff]  ;;  %v8713_v61 = vld [vmem:[#allocation130_spill] sm:$0xff] }
 0x7f0   : > { %v3985_v57 = vrot.slane %v3972_v18, %v6841_v8  ;;  %v3981_v7 = vrot.slane %v3972_v18, %v6843_v3  ;;  %v8714_v18 = vld [vmem:[#allocation131_spill] sm:$0xff] }
 0x7f2   : > { %v3989_v2 = vpack.c.bf16 %v3985_v57, %v3985_v57  ;;  %v7431_v54 = vpack.c.bf16 %v3981_v7, %v3981_v7  ;;  %v8715_v57 = vld [vmem:[#allocation132_spill] sm:$0xff]  ;;  %v8716_v7 = vld [vmem:[#allocation133_spill] sm:$0xff] }
 0x7f4   : > { %4022 = vmatprep.mubr.bf16.mxu0 %v3989_v2  ;;  %4063 = vmatprep.mubr.bf16.mxu1 %v3989_v2 }
 0x7f5   : > { %4023 = vmatmul.mubr.bf16.vlgmr.msra.gmra.mrb[48].mxu0 %v7431_v54  ;;  %4064 = vmatmul.mubr.bf16.vlgmr.msra.gmra.mrb[48].mxu1 %v7431_v54 }
 0x7f6   : > { %4073 = vmatpush1.bf16.msra.mxu0 %v8334_v50  ;;  %4114 = vmatpush1.bf16.msra.mxu1 %v8335_v0 }
 0x7f7   : > { %4104 = vmatprep.mubr.bf16.mxu0 %v3989_v2  ;;  %4145 = vmatprep.mubr.bf16.mxu1 %v3989_v2  ;;  %v8717_v2 = vld [vmem:[#allocation134_spill] sm:$0xff] }
 0x7f8   : > { %4074 = vmatprep.subr.bf16.mxu0 %v8336_v32  ;;  %4115 = vmatprep.subr.bf16.mxu1 %v8337_v56 }
 0x7fa   : > { %4075 = vmatpush1.bf16.msra.mxu0 %v8338_v31  ;;  %4116 = vmatpush1.bf16.msra.mxu1 %v8339_v24 }
 0x7fb   : > { %4076 = vmatprep.subr.bf16.mxu0 %v8340_v48  ;;  %4117 = vmatprep.subr.bf16.mxu1 %v8341_v15 }
 0x7fe   : > { %4077 = vmatpush1.bf16.msra.mxu0 %v8342_v17  ;;  %4118 = vmatpush1.bf16.msra.mxu1 %v8343_v16 }
 0x7ff   : > { %4078 = vmatprep.subr.bf16.mxu0 %v8344_v49  ;;  %4119 = vmatprep.subr.bf16.mxu1 %v8345_v11 }
 0x802   : > { %4079 = vmatpush1.bf16.msra.mxu0 %v8346_v26  ;;  %4120 = vmatpush1.bf16.msra.mxu1 %v8427_v10 }
 0x803   : > { %4080 = vmatprep.subr.bf16.mxu0 %v8428_v58  ;;  %4121 = vmatprep.subr.bf16.mxu1 %v8429_v46 }
 0x806   : > { %4081 = vmatpush1.bf16.msra.mxu0 %v8430_v52  ;;  %4122 = vmatpush1.bf16.msra.mxu1 %v8431_v59 }
 0x807   : > { %4082 = vmatprep.subr.bf16.mxu0 %v8432_v60  ;;  %4123 = vmatprep.subr.bf16.mxu1 %v8433_v53 }
 0x80a   : > { %4083 = vmatpush1.bf16.msra.mxu0 %v8434_v27  ;;  %4124 = vmatpush1.bf16.msra.mxu1 %v8435_v22 }
 0x80b   : > { %4084 = vmatprep.subr.bf16.mxu0 %v8436_v21  ;;  %4125 = vmatprep.subr.bf16.mxu1 %v8517_v63 }
 0x80e   : > { %4085 = vmatpush1.bf16.msra.mxu0 %v8518_v20  ;;  %4126 = vmatpush1.bf16.msra.mxu1 %v8519_v40 }
 0x80f   : > { %4086 = vmatprep.subr.bf16.mxu0 %v8520_v55  ;;  %4127 = vmatprep.subr.bf16.mxu1 %v8521_v41 }
 0x812   : > { %4087 = vmatpush1.bf16.msra.mxu0 %v8522_v13  ;;  %4128 = vmatpush1.bf16.msra.mxu1 %v8523_v12 }
 0x813   : > { %4088 = vmatprep.subr.bf16.mxu0 %v8444_v36  ;;  %4129 = vmatprep.subr.bf16.mxu1 %v8445_v35 }
 0x816   : > { %4089 = vmatpush1.bf16.msra.mxu0 %v8446_v44  ;;  %4130 = vmatpush1.bf16.msra.mxu1 %v8447_v45 }
 0x817   : > { %4090 = vmatprep.subr.bf16.mxu0 %v8448_v29  ;;  %4131 = vmatprep.subr.bf16.mxu1 %v8449_v30 }
 0x81a   : > { %4091 = vmatpush1.bf16.msra.mxu0 %v8450_v28  ;;  %4132 = vmatpush1.bf16.msra.mxu1 %v8451_v5 }
 0x81b   : > { %4092 = vmatprep.subr.bf16.mxu0 %v8697_v39  ;;  %4133 = vmatprep.subr.bf16.mxu1 %v8698_v23 }
 0x81e   : > { %4093 = vmatpush1.bf16.msra.mxu0 %v8699_v34  ;;  %4134 = vmatpush1.bf16.msra.mxu1 %v8700_v43 }
 0x81f   : > { %4094 = vmatprep.subr.bf16.mxu0 %v8701_v9  ;;  %4135 = vmatprep.subr.bf16.mxu1 %v8702_v19 }
 0x822   : > { %4095 = vmatpush1.bf16.msra.mxu0 %v8703_v42  ;;  %4136 = vmatpush1.bf16.msra.mxu1 %v8704_v14 }
 0x823   : > { %4096 = vmatprep.subr.bf16.mxu0 %v8705_v1  ;;  %4137 = vmatprep.subr.bf16.mxu1 %v8706_v37 }
 0x826   : > { %4097 = vmatpush1.bf16.msra.mxu0 %v8707_v25  ;;  %4138 = vmatpush1.bf16.msra.mxu1 %v8708_v38  ;;  %v8718_v25 = vld [vmem:[#allocation135_spill] sm:$0xff]  ;;  %v8719_v38 = vld [vmem:[#allocation136_spill] sm:$0xff] }
 0x827   : > { %4098 = vmatprep.subr.bf16.mxu0 %v8709_v51  ;;  %4139 = vmatprep.subr.bf16.mxu1 %v8710_v4  ;;  %v8720_v51 = vld [vmem:[#allocation137_spill] sm:$0xff]  ;;  %v8721_v4 = vld [vmem:[#allocation10_spill] sm:$0xff] }
 0x82a   : > { %4099 = vmatpush1.bf16.msra.mxu0 %v8711_v33  ;;  %4140 = vmatpush1.bf16.msra.mxu1 %v8712_v62  ;;  %v8722_v33 = vld [vmem:[#allocation11_spill] sm:$0xff] }
 0x82b   : > { %4100 = vmatprep.subr.bf16.mxu0 %v8713_v61  ;;  %4141 = vmatprep.subr.bf16.mxu1 %v8714_v18  ;;  %v8723_v18 = vld [vmem:[#allocation12_spill] sm:$0xff]  ;;  %v8732_v61 = vld [vmem:[#allocation21_spill] sm:$0xff] }
 0x82e   : > { %4101 = vmatpush1.bf16.msra.mxu0 %v8715_v57  ;;  %4142 = vmatpush1.bf16.msra.mxu1 %v8716_v7  ;;  %v8724_v57 = vld [vmem:[#allocation13_spill] sm:$0xff]  ;;  %v8725_v7 = vld [vmem:[#allocation14_spill] sm:$0xff] }
 0x82f   : > { %4102 = vmatprep.subr.bf16.mxu0 %v8717_v2  ;;  %4143 = vmatprep.subr.bf16.mxu1 %v8718_v25  ;;  %v8726_v2 = vld [vmem:[#allocation15_spill] sm:$0xff]  ;;  %v8727_v25 = vld [vmem:[#allocation16_spill] sm:$0xff] }
 0x832   : > { %4103 = vmatpush1.bf16.msra.mxu0 %v8719_v38  ;;  %4144 = vmatpush1.bf16.msra.mxu1 %v8720_v51  ;;  %v8728_v38 = vld [vmem:[#allocation17_spill] sm:$0xff]  ;;  %v8729_v51 = vld [vmem:[#allocation18_spill] sm:$0xff] }
 0x833   : > { %4250 = vmatprep.subr.bf16.mxu0 %v8721_v4  ;;  %4291 = vmatprep.subr.bf16.mxu1 %v8722_v33  ;;  %v8730_v4 = vld [vmem:[#allocation19_spill] sm:$0xff]  ;;  %v8731_v33 = vld [vmem:[#allocation20_spill] sm:$0xff] }
 0x835   : > { %4105 = vmatmul.mubr.bf16.vlgmr.msra.gmra.mrb[52].mxu0 %v7431_v54  ;;  %4146 = vmatmul.mubr.bf16.vlgmr.msra.gmra.mrb[52].mxu1 %v7431_v54  ;;  %v8733_v54 = vld [vmem:[#allocation22_spill] sm:$0xff] }
 0x836   : > { %4251 = vmatpush1.bf16.msra.mxu0 %v8723_v18  ;;  %4292 = vmatpush1.bf16.msra.mxu1 %v8724_v57  ;;  %v8734_v18 = vld [vmem:[#allocation23_spill] sm:$0xff]  ;;  %v8735_v57 = vld [vmem:[#allocation24_spill] sm:$0xff] }
 0x837   : > { %4252 = vmatprep.subr.bf16.mxu0 %v8725_v7  ;;  %4293 = vmatprep.subr.bf16.mxu1 %v8726_v2  ;;  %v8736_v7 = vld [vmem:[#allocation25_spill] sm:$0xff]  ;;  %v8737_v2 = vld [vmem:[#allocation26_spill] sm:$0xff] }
 0x83a   : > { %4253 = vmatpush1.bf16.msra.mxu0 %v8727_v25  ;;  %4294 = vmatpush1.bf16.msra.mxu1 %v8728_v38  ;;  %v8738_v25 = vld [vmem:[#allocation27_spill] sm:$0xff]  ;;  %v8739_v38 = vld [vmem:[#allocation28_spill] sm:$0xff] }
 0x83b   : > { %4254 = vmatprep.subr.bf16.mxu0 %v8729_v51  ;;  %4295 = vmatprep.subr.bf16.mxu1 %v8730_v4  ;;  %v8740_v51 = vld [vmem:[#allocation29_spill] sm:$0xff]  ;;  %v8741_v4 = vld [vmem:[#allocation30_spill] sm:$0xff] }
 0x83e   : > { %4255 = vmatpush1.bf16.msra.mxu0 %v8731_v33  ;;  %4296 = vmatpush1.bf16.msra.mxu1 %v8732_v61  ;;  %v8742_v33 = vld [vmem:[#allocation31_spill] sm:$0xff]  ;;  %v8743_v61 = vld [vmem:[#allocation32_spill] sm:$0xff] }
 0x83f   : > { %4256 = vmatprep.subr.bf16.mxu0 %v8733_v54  ;;  %4297 = vmatprep.subr.bf16.mxu1 %v8734_v18  ;;  %v8744_v54 = vld [vmem:[#allocation33_spill] sm:$0xff]  ;;  %v8745_v18 = vld [vmem:[#allocation34_spill] sm:$0xff] }
 0x842   : > { %4257 = vmatpush1.bf16.msra.mxu0 %v8735_v57  ;;  %4298 = vmatpush1.bf16.msra.mxu1 %v8736_v7  ;;  %v8746_v57 = vld [vmem:[#allocation35_spill] sm:$0xff]  ;;  %v8747_v7 = vld [vmem:[#allocation36_spill] sm:$0xff] }
 0x843   : > { %4258 = vmatprep.subr.bf16.mxu0 %v8737_v2  ;;  %4299 = vmatprep.subr.bf16.mxu1 %v8738_v25  ;;  %v8748_v2 = vld [vmem:[#allocation37_spill] sm:$0xff]  ;;  %v8749_v25 = vld [vmem:[#allocation38_spill] sm:$0xff] }
 0x846   : > { %4259 = vmatpush1.bf16.msra.mxu0 %v8739_v38  ;;  %4300 = vmatpush1.bf16.msra.mxu1 %v8740_v51  ;;  %v8750_v38 = vld [vmem:[#allocation39_spill] sm:$0xff]  ;;  %v8751_v51 = vld [vmem:[#allocation40_spill] sm:$0xff] }
 0x847   : > { %4260 = vmatprep.subr.bf16.mxu0 %v8741_v4  ;;  %4301 = vmatprep.subr.bf16.mxu1 %v8742_v33  ;;  %v8752_v4 = vld [vmem:[#allocation41_spill] sm:$0xff]  ;;  %v8753_v33 = vld [vmem:[#allocation42_spill] sm:$0xff] }
 0x84a   : > { %4261 = vmatpush1.bf16.msra.mxu0 %v8743_v61  ;;  %4302 = vmatpush1.bf16.msra.mxu1 %v8744_v54  ;;  %v8754_v61 = vld [vmem:[#allocation43_spill] sm:$0xff]  ;;  %v8755_v54 = vld [vmem:[#allocation44_spill] sm:$0xff] }
 0x84b   : > { %4262 = vmatprep.subr.bf16.mxu0 %v8745_v18  ;;  %4303 = vmatprep.subr.bf16.mxu1 %v8746_v57  ;;  %v8756_v18 = vld [vmem:[#allocation45_spill] sm:$0xff]  ;;  %v8757_v57 = vld [vmem:[#allocation46_spill] sm:$0xff] }
 0x84e   : > { %4263 = vmatpush1.bf16.msra.mxu0 %v8747_v7  ;;  %4304 = vmatpush1.bf16.msra.mxu1 %v8748_v2  ;;  %v8758_v7 = vld [vmem:[#allocation47_spill] sm:$0xff]  ;;  %v8759_v2 = vld [vmem:[#allocation48_spill] sm:$0xff] }
 0x84f   : > { %4264 = vmatprep.subr.bf16.mxu0 %v8749_v25  ;;  %4305 = vmatprep.subr.bf16.mxu1 %v8750_v38  ;;  %v8760_v25 = vld [vmem:[#allocation49_spill] sm:$0xff]  ;;  %v8761_v38 = vld [vmem:[#allocation50_spill] sm:$0xff] }
 0x852   : > { %4265 = vmatpush1.bf16.msra.mxu0 %v8751_v51  ;;  %4306 = vmatpush1.bf16.msra.mxu1 %v8752_v4  ;;  %v8762_v51 = vld [vmem:[#allocation51_spill] sm:$0xff]  ;;  %v8763_v4 = vld [vmem:[#allocation52_spill] sm:$0xff] }
 0x853   : > { %4266 = vmatprep.subr.bf16.mxu0 %v8753_v33  ;;  %4307 = vmatprep.subr.bf16.mxu1 %v8754_v61  ;;  %v8764_v33 = vld [vmem:[#allocation53_spill] sm:$0xff]  ;;  %v8765_v61 = vld [vmem:[#allocation54_spill] sm:$0xff] }
 0x856   : > { %4267 = vmatpush1.bf16.msra.mxu0 %v8755_v54  ;;  %4308 = vmatpush1.bf16.msra.mxu1 %v8756_v18  ;;  %v8766_v54 = vld [vmem:[#allocation55_spill] sm:$0xff]  ;;  %v8767_v18 = vld [vmem:[#allocation56_spill] sm:$0xff] }
 0x857   : > { %4268 = vmatprep.subr.bf16.mxu0 %v8757_v57  ;;  %4309 = vmatprep.subr.bf16.mxu1 %v8758_v7  ;;  %v8768_v57 = vld [vmem:[#allocation57_spill] sm:$0xff]  ;;  %v8769_v7 = vld [vmem:[#allocation58_spill] sm:$0xff] }
 0x85a   : > { %4269 = vmatpush1.bf16.msra.mxu0 %v8759_v2  ;;  %4310 = vmatpush1.bf16.msra.mxu1 %v8760_v25  ;;  %v8770_v2 = vld [vmem:[#allocation59_spill] sm:$0xff]  ;;  %v8771_v25 = vld [vmem:[#allocation60_spill] sm:$0xff] }
 0x85b   : > { %4270 = vmatprep.subr.bf16.mxu0 %v8761_v38  ;;  %4311 = vmatprep.subr.bf16.mxu1 %v8762_v51  ;;  %v8772_v38 = vld [vmem:[#allocation61_spill] sm:$0xff]  ;;  %v8773_v51 = vld [vmem:[#allocation62_spill] sm:$0xff] }
 0x85e   : > { %4271 = vmatpush1.bf16.msra.mxu0 %v8763_v4  ;;  %4312 = vmatpush1.bf16.msra.mxu1 %v8764_v33  ;;  %v8774_v4 = vld [vmem:[#allocation63_spill] sm:$0xff]  ;;  %v8775_v33 = vld [vmem:[#allocation64_spill] sm:$0xff] }
 0x85f   : > { %4272 = vmatprep.subr.bf16.mxu0 %v8765_v61  ;;  %4313 = vmatprep.subr.bf16.mxu1 %v8766_v54  ;;  %v8776_v61 = vld [vmem:[#allocation65_spill] sm:$0xff]  ;;  %v8777_v54 = vld [vmem:[#allocation66_spill] sm:$0xff] }
 0x862   : > { %4273 = vmatpush1.bf16.msra.mxu0 %v8767_v18  ;;  %4314 = vmatpush1.bf16.msra.mxu1 %v8768_v57  ;;  %v8778_v18 = vld [vmem:[#allocation67_spill] sm:$0xff]  ;;  %v8779_v57 = vld [vmem:[#allocation68_spill] sm:$0xff] }
 0x863   : > { %4274 = vmatprep.subr.bf16.mxu0 %v8769_v7  ;;  %4315 = vmatprep.subr.bf16.mxu1 %v8770_v2  ;;  %v8780_v7 = vld [vmem:[#allocation69_spill] sm:$0xff]  ;;  %v8781_v2 = vld [vmem:[#allocation70_spill] sm:$0xff] }
 0x866   : > { %4275 = vmatpush1.bf16.msra.mxu0 %v8771_v25  ;;  %4316 = vmatpush1.bf16.msra.mxu1 %v8772_v38  ;;  %v8782_v25 = vld [vmem:[#allocation71_spill] sm:$0xff]  ;;  %v8783_v38 = vld [vmem:[#allocation72_spill] sm:$0xff] }
 0x867   : > { %4276 = vmatprep.subr.bf16.mxu0 %v8773_v51  ;;  %4317 = vmatprep.subr.bf16.mxu1 %v8774_v4  ;;  %v8784_v51 = vld [vmem:[#allocation73_spill] sm:$0xff]  ;;  %v8785_v4 = vld [vmem:[#allocation74_spill] sm:$0xff] }
 0x86a   : > { %4277 = vmatpush1.bf16.msra.mxu0 %v8775_v33  ;;  %4318 = vmatpush1.bf16.msra.mxu1 %v8776_v61  ;;  %v8786_v33 = vld [vmem:[#allocation75_spill] sm:$0xff] }
 0x86b   : > { %4278 = vmatprep.subr.bf16.mxu0 %v8777_v54  ;;  %4319 = vmatprep.subr.bf16.mxu1 %v8778_v18 }
 0x86e   : > { %4279 = vmatpush1.bf16.msra.mxu0 %v8779_v57  ;;  %4320 = vmatpush1.bf16.msra.mxu1 %v8780_v7 }
 0x86f   : > { %4280 = vmatprep.subr.bf16.mxu0 %v8781_v2  ;;  %4321 = vmatprep.subr.bf16.mxu1 %v8782_v25 }
 0x872   : > { %4281 = vmatpush1.bf16.msra.mxu0 %v8783_v38  ;;  %4322 = vmatpush1.bf16.msra.mxu1 %v8784_v51 }
 0x873   : > { %4332 = vmatprep.subr.bf16.mxu0 %v8785_v4  ;;  %4373 = vmatprep.subr.bf16.mxu1 %v8786_v33 }
 0x8c8   : > { %v4024_v61 = vpop.f32.mrb[48].mxu0  ;;  %v4065_v54 = vpop.f32.mrb[48].mxu1 }
 0x8c9   : > { %v4026_v62 = vpop.f32.mrb[49].mxu0  ;;  %v4067_v18 = vpop.f32.mrb[49].mxu1 }
 0x8ca   : > { %v4162_v37 = vcombine.low %v4024_v61, %v4026_v62  ;;  %v4163_v57 = vcombine.low %v4065_v54, %v4067_v18  ;;  %v4028_v1 = vpop.f32.mrb[50].mxu0  ;;  %v4069_v7 = vpop.f32.mrb[50].mxu1  ;;  %v3974_v18 = vld [vmem:[#allocation2 + $0x5] ss:$8 sm:$0xf] }
 0x8cb   : > { %v4029_v14 = vpop.f32.mrb[51].mxu0  ;;  %v4070_v2 = vpop.f32.mrb[51].mxu1 }
 0x8cc   : > { %v4172_v25 = vrot.slane %v4162_v37, %v6830_v47  ;;  %v4179_v38 = vrot.slane %v4163_v57, %v6830_v47  ;;  %v3975_v37 = vld [vmem:[#allocation2 + $0x5] ss:$8 sm:$0xf0] }
 0x8ce   : > { %v4194_v42 = vcombine.low %v4172_v25, %v4179_v38  ;;  %v3976_v38 = vor.u32 %v3975_v37, %v3974_v18 }
 0x8d0   : > { %v4202_v57 = vrot.slane %v4194_v42, %v6830_v47 }
 0x908   : > { %v4106_v51 = vpop.f32.mrb[52].mxu0  ;;  %v4147_v19 = vpop.f32.mrb[52].mxu1 }
 0x909   : > { %v4108_v4 = vpop.f32.mrb[53].mxu0  ;;  %v4149_v9 = vpop.f32.mrb[53].mxu1 }
 0x90a   : > { %v4164_v33 = vcombine.low %v4106_v51, %v4108_v4  ;;  %v4165_v43 = vcombine.low %v4147_v19, %v4149_v9  ;;  %v4110_v34 = vpop.f32.mrb[54].mxu0  ;;  %v4151_v23 = vpop.f32.mrb[54].mxu1 }
 0x90b   : > { %v4111_v39 = vpop.f32.mrb[55].mxu0  ;;  %v4152_v62 = vpop.f32.mrb[55].mxu1 }
 0x90c   : > { %v4186_v1 = vrot.slane %v4164_v33, %v6830_v47  ;;  %v4193_v14 = vrot.slane %v4165_v43, %v6830_v47 }
 0x90e   : > { %v4195_v61 = vcombine.low %v4186_v1, %v4193_v14 }
 0x910   : > { %v4209_v25 = vrot.slane %v4195_v61, %v6830_v47 }
 0x912   : > { %v4210_v7 = vcombine.low %v4202_v57, %v4209_v25  ;;  %v8788_v57 = vld [vmem:[#allocation115_spill] sm:$0xff]  ;;  %v8789_v25 = vld [vmem:[#allocation116_spill] sm:$0xff] }
 0x914   : > { %v4212_v2 = vadd.f32 %v4210_v7, %v3976_v38  ;;  %v8790_v38 = vld [vmem:[#allocation117_spill] sm:$0xff]  ;;  %v8791_v7 = vld [vmem:[#allocation118_spill] sm:$0xff] }
 0x916   : > { %v5505_v51 = vmul.f32 -1.442695, %v4212_v2  ;;  %v4220_v39 = vrot.slane %v4212_v2, 6  ;;  %v8792_v2 = vld [vmem:[#allocation119_spill] sm:$0xff] }
 0x918   : > { %6006 = vpow2.f32 %v5505_v51  ;;  %v8793_v51 = vld [vmem:[#allocation120_spill] sm:$0xff] }
 0x922   : > { %v6007_v34 = vpop.eup %6006 }
 0x923   : > { %v4216_v23 = vadd.f32 1.0, %v6007_v34  ;;  %v8794_v34 = vld [vmem:[#allocation121_spill] sm:$0xff] }
 0x925   : > { %6008 = vrcp.f32 %v4216_v23  ;;  %v8795_v23 = vld [vmem:[#allocation122_spill] sm:$0xff] }
 0x926   : > { %6010 = vtanh.f32 %v4220_v39  ;;  %v8796_v39 = vld [vmem:[#allocation123_spill] sm:$0xff] }
 0x92f   : > { %v6009_v9 = vpop.eup %6008 }
 0x930   : > { %v4224_v19 = vrot.slane %v6009_v9, 2  ;;  %v6011_v43 = vpop.eup %6010  ;;  %v4230_v42 = vrot.slane %v6009_v9, 4 }
 0x931   : > { %v4227_v4 = vmul.f32 %v6011_v43, %v6009_v9  ;;  %v8797_v9 = vld [vmem:[#allocation124_spill] sm:$0xff]  ;;  %v8799_v43 = vld [vmem:[#allocation126_spill] sm:$0xff] }
 0x932   : > { %v4226_v33 = vmul.f32 %v4224_v19, %v7426_v6  ;;  %v8787_v6 = vld [vmem:[#allocation114_spill] sm:$0xff]  ;;  %v8798_v19 = vld [vmem:[#allocation125_spill] sm:$0xff] }
 0x934   : > { %v7572_v54 = vadd.f32 %v4227_v4, %v4226_v33  ;;  %v8800_v4 = vld [vmem:[#allocation127_spill] sm:$0xff]  ;;  %v8801_v33 = vld [vmem:[#allocation128_spill] sm:$0xff] }
 0x936   : > { %6012 = vtanh.f32 %v7572_v54 }
 0x940   : > { %v6013_v62 = vpop.eup %6012 }
 0x941   : > { %v4232_v1 = vmul.f32 %v6013_v62, %v4230_v42  ;;  %v8802_v42 = vld [vmem:[#allocation129_spill] sm:$0xff]  ;;  %v8803_v62 = vld [vmem:[#allocation130_spill] sm:$0xff] }
 0x943   : > { %v4245_v14 = vrot.slane %v4232_v1, %v6841_v8  ;;  %v4241_v61 = vrot.slane %v4232_v1, %v6843_v3  ;;  %v8804_v1 = vld [vmem:[#allocation131_spill] sm:$0xff] }
 0x945   : > { %v4249_v18 = vpack.c.bf16 %v4245_v14, %v4245_v14  ;;  %v7577_v37 = vpack.c.bf16 %v4241_v61, %v4241_v61  ;;  %v8805_v14 = vld [vmem:[#allocation132_spill] sm:$0xff]  ;;  %v8806_v61 = vld [vmem:[#allocation133_spill] sm:$0xff] }
 0x947   : > { %4282 = vmatprep.mubr.bf16.mxu0 %v4249_v18  ;;  %4323 = vmatprep.mubr.bf16.mxu1 %v4249_v18 }
 0x948   : > { %4283 = vmatmul.mubr.bf16.vlgmr.msra.gmra.mrb[56].mxu0 %v7577_v37  ;;  %4324 = vmatmul.mubr.bf16.vlgmr.msra.gmra.mrb[56].mxu1 %v7577_v37 }
 0x949   : > { %4333 = vmatpush1.bf16.msra.mxu0 %v8334_v50  ;;  %4374 = vmatpush1.bf16.msra.mxu1 %v8335_v0 }
 0x94a   : > { %4364 = vmatprep.mubr.bf16.mxu0 %v4249_v18  ;;  %4405 = vmatprep.mubr.bf16.mxu1 %v4249_v18  ;;  %v8807_v18 = vld [vmem:[#allocation134_spill] sm:$0xff] }
 0x94b   : > { %4334 = vmatprep.subr.bf16.mxu0 %v8336_v32  ;;  %4375 = vmatprep.subr.bf16.mxu1 %v8337_v56 }
 0x94d   : > { %4335 = vmatpush1.bf16.msra.mxu0 %v8338_v31  ;;  %4376 = vmatpush1.bf16.msra.mxu1 %v8339_v24 }
 0x94e   : > { %4336 = vmatprep.subr.bf16.mxu0 %v8340_v48  ;;  %4377 = vmatprep.subr.bf16.mxu1 %v8341_v15 }
 0x951   : > { %4337 = vmatpush1.bf16.msra.mxu0 %v8342_v17  ;;  %4378 = vmatpush1.bf16.msra.mxu1 %v8343_v16 }
 0x952   : > { %4338 = vmatprep.subr.bf16.mxu0 %v8344_v49  ;;  %4379 = vmatprep.subr.bf16.mxu1 %v8345_v11 }
 0x955   : > { %4339 = vmatpush1.bf16.msra.mxu0 %v8346_v26  ;;  %4380 = vmatpush1.bf16.msra.mxu1 %v8427_v10 }
 0x956   : > { %4340 = vmatprep.subr.bf16.mxu0 %v8428_v58  ;;  %4381 = vmatprep.subr.bf16.mxu1 %v8429_v46 }
 0x959   : > { %4341 = vmatpush1.bf16.msra.mxu0 %v8430_v52  ;;  %4382 = vmatpush1.bf16.msra.mxu1 %v8431_v59 }
 0x95a   : > { %4342 = vmatprep.subr.bf16.mxu0 %v8432_v60  ;;  %4383 = vmatprep.subr.bf16.mxu1 %v8433_v53 }
 0x95d   : > { %4343 = vmatpush1.bf16.msra.mxu0 %v8434_v27  ;;  %4384 = vmatpush1.bf16.msra.mxu1 %v8435_v22 }
 0x95e   : > { %4344 = vmatprep.subr.bf16.mxu0 %v8436_v21  ;;  %4385 = vmatprep.subr.bf16.mxu1 %v8517_v63 }
 0x961   : > { %4345 = vmatpush1.bf16.msra.mxu0 %v8518_v20  ;;  %4386 = vmatpush1.bf16.msra.mxu1 %v8519_v40 }
 0x962   : > { %4346 = vmatprep.subr.bf16.mxu0 %v8520_v55  ;;  %4387 = vmatprep.subr.bf16.mxu1 %v8521_v41 }
 0x965   : > { %4347 = vmatpush1.bf16.msra.mxu0 %v8522_v13  ;;  %4388 = vmatpush1.bf16.msra.mxu1 %v8523_v12 }
 0x966   : > { %4348 = vmatprep.subr.bf16.mxu0 %v8444_v36  ;;  %4389 = vmatprep.subr.bf16.mxu1 %v8445_v35 }
 0x969   : > { %4349 = vmatpush1.bf16.msra.mxu0 %v8446_v44  ;;  %4390 = vmatpush1.bf16.msra.mxu1 %v8447_v45 }
 0x96a   : > { %4350 = vmatprep.subr.bf16.mxu0 %v8448_v29  ;;  %4391 = vmatprep.subr.bf16.mxu1 %v8449_v30 }
 0x96d   : > { %4351 = vmatpush1.bf16.msra.mxu0 %v8450_v28  ;;  %4392 = vmatpush1.bf16.msra.mxu1 %v8451_v5 }
 0x96e   : > { %4352 = vmatprep.subr.bf16.mxu0 %v8787_v6  ;;  %4393 = vmatprep.subr.bf16.mxu1 %v8788_v57 }
 0x971   : > { %4353 = vmatpush1.bf16.msra.mxu0 %v8789_v25  ;;  %4394 = vmatpush1.bf16.msra.mxu1 %v8790_v38 }
 0x972   : > { %4354 = vmatprep.subr.bf16.mxu0 %v8791_v7  ;;  %4395 = vmatprep.subr.bf16.mxu1 %v8792_v2 }
 0x975   : > { %4355 = vmatpush1.bf16.msra.mxu0 %v8793_v51  ;;  %4396 = vmatpush1.bf16.msra.mxu1 %v8794_v34 }
 0x976   : > { %4356 = vmatprep.subr.bf16.mxu0 %v8795_v23  ;;  %4397 = vmatprep.subr.bf16.mxu1 %v8796_v39 }
 0x979   : > { %4357 = vmatpush1.bf16.msra.mxu0 %v8797_v9  ;;  %4398 = vmatpush1.bf16.msra.mxu1 %v8798_v19  ;;  %v8808_v9 = vld [vmem:[#allocation135_spill] sm:$0xff]  ;;  %v8809_v19 = vld [vmem:[#allocation136_spill] sm:$0xff] }
 0x97a   : > { %4358 = vmatprep.subr.bf16.mxu0 %v8799_v43  ;;  %4399 = vmatprep.subr.bf16.mxu1 %v8800_v4  ;;  %v8810_v43 = vld [vmem:[#allocation137_spill] sm:$0xff]  ;;  %v8811_v4 = vld [vmem:[#allocation10_spill] sm:$0xff] }
 0x97d   : > { %4359 = vmatpush1.bf16.msra.mxu0 %v8801_v33  ;;  %4400 = vmatpush1.bf16.msra.mxu1 %v8802_v42  ;;  %v8812_v33 = vld [vmem:[#allocation11_spill] sm:$0xff] }
 0x97e   : > { %4360 = vmatprep.subr.bf16.mxu0 %v8803_v62  ;;  %4401 = vmatprep.subr.bf16.mxu1 %v8804_v1  ;;  %v8813_v1 = vld [vmem:[#allocation12_spill] sm:$0xff]  ;;  %v8822_v62 = vld [vmem:[#allocation21_spill] sm:$0xff] }
 0x981   : > { %4361 = vmatpush1.bf16.msra.mxu0 %v8805_v14  ;;  %4402 = vmatpush1.bf16.msra.mxu1 %v8806_v61  ;;  %v8814_v14 = vld [vmem:[#allocation13_spill] sm:$0xff]  ;;  %v8815_v61 = vld [vmem:[#allocation14_spill] sm:$0xff] }
 0x982   : > { %4362 = vmatprep.subr.bf16.mxu0 %v8807_v18  ;;  %4403 = vmatprep.subr.bf16.mxu1 %v8808_v9  ;;  %v8816_v18 = vld [vmem:[#allocation15_spill] sm:$0xff]  ;;  %v8817_v9 = vld [vmem:[#allocation16_spill] sm:$0xff] }
 0x985   : > { %4363 = vmatpush1.bf16.msra.mxu0 %v8809_v19  ;;  %4404 = vmatpush1.bf16.msra.mxu1 %v8810_v43  ;;  %v8818_v19 = vld [vmem:[#allocation17_spill] sm:$0xff]  ;;  %v8819_v43 = vld [vmem:[#allocation18_spill] sm:$0xff] }
 0x986   : > { %4510 = vmatprep.subr.bf16.mxu0 %v8811_v4  ;;  %4551 = vmatprep.subr.bf16.mxu1 %v8812_v33  ;;  %v8820_v4 = vld [vmem:[#allocation19_spill] sm:$0xff]  ;;  %v8821_v33 = vld [vmem:[#allocation20_spill] sm:$0xff] }
 0x988   : > { %4365 = vmatmul.mubr.bf16.vlgmr.msra.gmra.mrb[60].mxu0 %v7577_v37  ;;  %4406 = vmatmul.mubr.bf16.vlgmr.msra.gmra.mrb[60].mxu1 %v7577_v37  ;;  %v8823_v37 = vld [vmem:[#allocation22_spill] sm:$0xff] }
 0x989   : > { %4511 = vmatpush1.bf16.msra.mxu0 %v8813_v1  ;;  %4552 = vmatpush1.bf16.msra.mxu1 %v8814_v14  ;;  %v8824_v1 = vld [vmem:[#allocation23_spill] sm:$0xff]  ;;  %v8825_v14 = vld [vmem:[#allocation24_spill] sm:$0xff] }
 0x98a   : > { %4512 = vmatprep.subr.bf16.mxu0 %v8815_v61  ;;  %4553 = vmatprep.subr.bf16.mxu1 %v8816_v18  ;;  %v8826_v61 = vld [vmem:[#allocation25_spill] sm:$0xff]  ;;  %v8827_v18 = vld [vmem:[#allocation26_spill] sm:$0xff] }
 0x98d   : > { %4513 = vmatpush1.bf16.msra.mxu0 %v8817_v9  ;;  %4554 = vmatpush1.bf16.msra.mxu1 %v8818_v19  ;;  %v8828_v9 = vld [vmem:[#allocation27_spill] sm:$0xff]  ;;  %v8829_v19 = vld [vmem:[#allocation28_spill] sm:$0xff] }
 0x98e   : > { %4514 = vmatprep.subr.bf16.mxu0 %v8819_v43  ;;  %4555 = vmatprep.subr.bf16.mxu1 %v8820_v4  ;;  %v8830_v43 = vld [vmem:[#allocation29_spill] sm:$0xff]  ;;  %v8831_v4 = vld [vmem:[#allocation30_spill] sm:$0xff] }
 0x991   : > { %4515 = vmatpush1.bf16.msra.mxu0 %v8821_v33  ;;  %4556 = vmatpush1.bf16.msra.mxu1 %v8822_v62  ;;  %v8832_v33 = vld [vmem:[#allocation31_spill] sm:$0xff]  ;;  %v8833_v62 = vld [vmem:[#allocation32_spill] sm:$0xff] }
 0x992   : > { %4516 = vmatprep.subr.bf16.mxu0 %v8823_v37  ;;  %4557 = vmatprep.subr.bf16.mxu1 %v8824_v1  ;;  %v8834_v37 = vld [vmem:[#allocation33_spill] sm:$0xff]  ;;  %v8835_v1 = vld [vmem:[#allocation34_spill] sm:$0xff] }
 0x995   : > { %4517 = vmatpush1.bf16.msra.mxu0 %v8825_v14  ;;  %4558 = vmatpush1.bf16.msra.mxu1 %v8826_v61  ;;  %v8836_v14 = vld [vmem:[#allocation35_spill] sm:$0xff]  ;;  %v8837_v61 = vld [vmem:[#allocation36_spill] sm:$0xff] }
 0x996   : > { %4518 = vmatprep.subr.bf16.mxu0 %v8827_v18  ;;  %4559 = vmatprep.subr.bf16.mxu1 %v8828_v9  ;;  %v8838_v18 = vld [vmem:[#allocation37_spill] sm:$0xff]  ;;  %v8839_v9 = vld [vmem:[#allocation38_spill] sm:$0xff] }
 0x999   : > { %4519 = vmatpush1.bf16.msra.mxu0 %v8829_v19  ;;  %4560 = vmatpush1.bf16.msra.mxu1 %v8830_v43  ;;  %v8840_v19 = vld [vmem:[#allocation39_spill] sm:$0xff]  ;;  %v8841_v43 = vld [vmem:[#allocation40_spill] sm:$0xff] }
 0x99a   : > { %4520 = vmatprep.subr.bf16.mxu0 %v8831_v4  ;;  %4561 = vmatprep.subr.bf16.mxu1 %v8832_v33  ;;  %v8842_v4 = vld [vmem:[#allocation41_spill] sm:$0xff]  ;;  %v8843_v33 = vld [vmem:[#allocation42_spill] sm:$0xff] }
 0x99d   : > { %4521 = vmatpush1.bf16.msra.mxu0 %v8833_v62  ;;  %4562 = vmatpush1.bf16.msra.mxu1 %v8834_v37  ;;  %v8844_v62 = vld [vmem:[#allocation43_spill] sm:$0xff]  ;;  %v8845_v37 = vld [vmem:[#allocation44_spill] sm:$0xff] }
 0x99e   : > { %4522 = vmatprep.subr.bf16.mxu0 %v8835_v1  ;;  %4563 = vmatprep.subr.bf16.mxu1 %v8836_v14  ;;  %v8846_v1 = vld [vmem:[#allocation45_spill] sm:$0xff]  ;;  %v8847_v14 = vld [vmem:[#allocation46_spill] sm:$0xff] }
 0x9a1   : > { %4523 = vmatpush1.bf16.msra.mxu0 %v8837_v61  ;;  %4564 = vmatpush1.bf16.msra.mxu1 %v8838_v18  ;;  %v8848_v61 = vld [vmem:[#allocation47_spill] sm:$0xff]  ;;  %v8849_v18 = vld [vmem:[#allocation48_spill] sm:$0xff] }
 0x9a2   : > { %4524 = vmatprep.subr.bf16.mxu0 %v8839_v9  ;;  %4565 = vmatprep.subr.bf16.mxu1 %v8840_v19  ;;  %v8850_v9 = vld [vmem:[#allocation49_spill] sm:$0xff]  ;;  %v8851_v19 = vld [vmem:[#allocation50_spill] sm:$0xff] }
 0x9a5   : > { %4525 = vmatpush1.bf16.msra.mxu0 %v8841_v43  ;;  %4566 = vmatpush1.bf16.msra.mxu1 %v8842_v4  ;;  %v8852_v43 = vld [vmem:[#allocation51_spill] sm:$0xff]  ;;  %v8853_v4 = vld [vmem:[#allocation52_spill] sm:$0xff] }
 0x9a6   : > { %4526 = vmatprep.subr.bf16.mxu0 %v8843_v33  ;;  %4567 = vmatprep.subr.bf16.mxu1 %v8844_v62  ;;  %v8854_v33 = vld [vmem:[#allocation53_spill] sm:$0xff]  ;;  %v8855_v62 = vld [vmem:[#allocation54_spill] sm:$0xff] }
 0x9a9   : > { %4527 = vmatpush1.bf16.msra.mxu0 %v8845_v37  ;;  %4568 = vmatpush1.bf16.msra.mxu1 %v8846_v1  ;;  %v8856_v37 = vld [vmem:[#allocation55_spill] sm:$0xff]  ;;  %v8857_v1 = vld [vmem:[#allocation56_spill] sm:$0xff] }
 0x9aa   : > { %4528 = vmatprep.subr.bf16.mxu0 %v8847_v14  ;;  %4569 = vmatprep.subr.bf16.mxu1 %v8848_v61  ;;  %v8858_v14 = vld [vmem:[#allocation57_spill] sm:$0xff]  ;;  %v8859_v61 = vld [vmem:[#allocation58_spill] sm:$0xff] }
 0x9ad   : > { %4529 = vmatpush1.bf16.msra.mxu0 %v8849_v18  ;;  %4570 = vmatpush1.bf16.msra.mxu1 %v8850_v9  ;;  %v8860_v18 = vld [vmem:[#allocation59_spill] sm:$0xff]  ;;  %v8861_v9 = vld [vmem:[#allocation60_spill] sm:$0xff] }
 0x9ae   : > { %4530 = vmatprep.subr.bf16.mxu0 %v8851_v19  ;;  %4571 = vmatprep.subr.bf16.mxu1 %v8852_v43  ;;  %v8862_v19 = vld [vmem:[#allocation61_spill] sm:$0xff]  ;;  %v8863_v43 = vld [vmem:[#allocation62_spill] sm:$0xff] }
 0x9b1   : > { %4531 = vmatpush1.bf16.msra.mxu0 %v8853_v4  ;;  %4572 = vmatpush1.bf16.msra.mxu1 %v8854_v33  ;;  %v8864_v4 = vld [vmem:[#allocation63_spill] sm:$0xff]  ;;  %v8865_v33 = vld [vmem:[#allocation64_spill] sm:$0xff] }
 0x9b2   : > { %4532 = vmatprep.subr.bf16.mxu0 %v8855_v62  ;;  %4573 = vmatprep.subr.bf16.mxu1 %v8856_v37  ;;  %v8866_v62 = vld [vmem:[#allocation65_spill] sm:$0xff]  ;;  %v8867_v37 = vld [vmem:[#allocation66_spill] sm:$0xff] }
 0x9b5   : > { %4533 = vmatpush1.bf16.msra.mxu0 %v8857_v1  ;;  %4574 = vmatpush1.bf16.msra.mxu1 %v8858_v14  ;;  %v8868_v1 = vld [vmem:[#allocation67_spill] sm:$0xff]  ;;  %v8869_v14 = vld [vmem:[#allocation68_spill] sm:$0xff] }
 0x9b6   : > { %4534 = vmatprep.subr.bf16.mxu0 %v8859_v61  ;;  %4575 = vmatprep.subr.bf16.mxu1 %v8860_v18  ;;  %v8870_v61 = vld [vmem:[#allocation69_spill] sm:$0xff]  ;;  %v8871_v18 = vld [vmem:[#allocation70_spill] sm:$0xff] }
 0x9b9   : > { %4535 = vmatpush1.bf16.msra.mxu0 %v8861_v9  ;;  %4576 = vmatpush1.bf16.msra.mxu1 %v8862_v19  ;;  %v8872_v9 = vld [vmem:[#allocation71_spill] sm:$0xff]  ;;  %v8873_v19 = vld [vmem:[#allocation72_spill] sm:$0xff] }
 0x9ba   : > { %4536 = vmatprep.subr.bf16.mxu0 %v8863_v43  ;;  %4577 = vmatprep.subr.bf16.mxu1 %v8864_v4  ;;  %v8874_v43 = vld [vmem:[#allocation73_spill] sm:$0xff]  ;;  %v8875_v4 = vld [vmem:[#allocation74_spill] sm:$0xff] }
 0x9bd   : > { %4537 = vmatpush1.bf16.msra.mxu0 %v8865_v33  ;;  %4578 = vmatpush1.bf16.msra.mxu1 %v8866_v62  ;;  %v8876_v33 = vld [vmem:[#allocation75_spill] sm:$0xff] }
 0x9be   : > { %4538 = vmatprep.subr.bf16.mxu0 %v8867_v37  ;;  %4579 = vmatprep.subr.bf16.mxu1 %v8868_v1 }
 0x9c1   : > { %4539 = vmatpush1.bf16.msra.mxu0 %v8869_v14  ;;  %4580 = vmatpush1.bf16.msra.mxu1 %v8870_v61 }
 0x9c2   : > { %4540 = vmatprep.subr.bf16.mxu0 %v8871_v18  ;;  %4581 = vmatprep.subr.bf16.mxu1 %v8872_v9 }
 0x9c5   : > { %4541 = vmatpush1.bf16.msra.mxu0 %v8873_v19  ;;  %4582 = vmatpush1.bf16.msra.mxu1 %v8874_v43 }
 0x9c6   : > { %4592 = vmatprep.subr.bf16.mxu0 %v8875_v4  ;;  %4633 = vmatprep.subr.bf16.mxu1 %v8876_v33 }
 0xa1b   : > { %v4284_v62 = vpop.f32.mrb[56].mxu0  ;;  %v4325_v37 = vpop.f32.mrb[56].mxu1 }
 0xa1c   : > { %v4286_v42 = vpop.f32.mrb[57].mxu0  ;;  %v4327_v1 = vpop.f32.mrb[57].mxu1 }
 0xa1d   : > { %v4422_v39 = vcombine.low %v4284_v62, %v4286_v42  ;;  %v4423_v14 = vcombine.low %v4325_v37, %v4327_v1  ;;  %v4288_v23 = vpop.f32.mrb[58].mxu0  ;;  %v4329_v61 = vpop.f32.mrb[58].mxu1  ;;  %v4234_v37 = vld [vmem:[#allocation2 + $0x6] ss:$8 sm:$0xf] }
 0xa1e   : > { %v4289_v34 = vpop.f32.mrb[59].mxu0  ;;  %v4330_v18 = vpop.f32.mrb[59].mxu1 }
 0xa1f   : > { %v4432_v9 = vrot.slane %v4422_v39, %v6830_v47  ;;  %v4439_v19 = vrot.slane %v4423_v14, %v6830_v47  ;;  %v4235_v39 = vld [vmem:[#allocation2 + $0x6] ss:$8 sm:$0xf0] }
 0xa20   : > { %v4236_v61 = vor.u32 %v4235_v39, %v4234_v37 }
 0xa21   : > { %v4454_v51 = vcombine.low %v4432_v9, %v4439_v19 }
 0xa23   : > { %v4462_v1 = vrot.slane %v4454_v51, %v6830_v47 }
 0xa5b   : > { %v4366_v43 = vpop.f32.mrb[60].mxu0  ;;  %v4407_v2 = vpop.f32.mrb[60].mxu1 }
 0xa5c   : > { %v4368_v4 = vpop.f32.mrb[61].mxu0  ;;  %v4409_v7 = vpop.f32.mrb[61].mxu1 }
 0xa5d   : > { %v4424_v33 = vcombine.low %v4366_v43, %v4368_v4  ;;  %v4425_v38 = vcombine.low %v4407_v2, %v4409_v7  ;;  %v4370_v25 = vpop.f32.mrb[62].mxu0  ;;  %v4411_v57 = vpop.f32.mrb[62].mxu1 }
 0xa5e   : > { %v4371_v6 = vpop.f32.mrb[63].mxu0  ;;  %v4412_v42 = vpop.f32.mrb[63].mxu1 }
 0xa5f   : > { %v4446_v23 = vrot.slane %v4424_v33, %v6830_v47  ;;  %v4453_v34 = vrot.slane %v4425_v38, %v6830_v47 }
 0xa61   : > { %v4455_v62 = vcombine.low %v4446_v23, %v4453_v34 }
 0xa63   : > { %v4469_v14 = vrot.slane %v4455_v62, %v6830_v47 }
 0xa65   : > { %v4470_v18 = vcombine.low %v4462_v1, %v4469_v14  ;;  %v5957_v1 = vld [vmem:[%s7900_s4 + $0x38] sm:$0xff]  }
 0xa67   : > { %v4472_v9 = vadd.f32 %v4470_v18, %v4236_v61  ;;  %v5958_v18 = vld [vmem:[%s7902_s6] sm:$0xff]  }
 0xa69   : > { %v5506_v19 = vmul.f32 -1.442695, %v4472_v9  ;;  %v4480_v6 = vrot.slane %v4472_v9, 6 }
 0xa6b   : > { %6014 = vpow2.f32 %v5506_v19 }
 0xa75   : > { %v6015_v25 = vpop.eup %6014 }
 0xa76   : > { %v4476_v57 = vadd.f32 1.0, %v6015_v25  ;;  %v6147_v25 = vmov 0.0  }
 0xa78   : > { %6016 = vrcp.f32 %v4476_v57 }
 0xa79   : > { %6018 = vtanh.f32 %v4480_v6 }
 0xa82   : > { %v6017_v7 = vpop.eup %6016 }
 0xa83   : > { %v4484_v2 = vrot.slane %v6017_v7, 2  ;;  %v6019_v38 = vpop.eup %6018  ;;  %v4490_v51 = vrot.slane %v6017_v7, 4 }
 0xa84   : > { %v4487_v43 = vmul.f32 %v6019_v38, %v6017_v7  ;;  %v5959_v38 = vld [vmem:[%s7902_s6 + $0x8] sm:$0xff]  }
 0xa85   : > { %v4486_v4 = vmul.f32 %v4484_v2, %v7572_v54  ;;  %v5956_v54 = vld [vmem:[%s7900_s4 + $0x78] sm:$0xff]  }
 0xa87   : > { %v7718_v33 = vadd.f32 %v4487_v43, %v4486_v4 }
 0xa89   : > { %6020 = vtanh.f32 %v7718_v33 }
 0xa93   : > { %v6021_v42 = vpop.eup %6020 }
 0xa94   : > { %v4492_v23 = vmul.f32 %v6021_v42, %v4490_v51 }
 0xa96   : > { %v4505_v34 = vrot.slane %v4492_v23, %v6841_v8  ;;  %v4501_v62 = vrot.slane %v4492_v23, %v6843_v3 }
 0xa98   : > { %v4509_v37 = vpack.c.bf16 %v4505_v34, %v4505_v34  ;;  %v7723_v39 = vpack.c.bf16 %v4501_v62, %v4501_v62  ;;  %v5960_v34 = vld [vmem:[%s7902_s6 + $0x10] sm:$0xff]   ;;  %v5961_v62 = vld [vmem:[%s7902_s6 + $0x18] sm:$0xff]  }
 0xa9a   : > { %4542 = vmatprep.mubr.bf16.mxu0 %v4509_v37  ;;  %4583 = vmatprep.mubr.bf16.mxu1 %v4509_v37 }
 0xa9b   : > { %4543 = vmatmul.mubr.bf16.vlgmr.msra.gmra.mrb[64].mxu0 %v7723_v39  ;;  %4584 = vmatmul.mubr.bf16.vlgmr.msra.gmra.mrb[64].mxu1 %v7723_v39 }
 0xa9c   : > { %4593 = vmatpush1.bf16.msra.mxu0 %v8334_v50  ;;  %4634 = vmatpush1.bf16.msra.mxu1 %v8335_v0  ;;  %v8877_v50 = vld [vmem:[#allocation114_spill] sm:$0xff]  ;;  %v8878_v0 = vld [vmem:[#allocation115_spill] sm:$0xff] }
 0xa9d   : > { %4624 = vmatprep.mubr.bf16.mxu0 %v4509_v37  ;;  %4665 = vmatprep.mubr.bf16.mxu1 %v4509_v37  ;;  %v5962_v37 = vld [vmem:[%s7902_s6 + $0x20] sm:$0xff]  }
 0xa9e   : > { %4594 = vmatprep.subr.bf16.mxu0 %v8336_v32  ;;  %4635 = vmatprep.subr.bf16.mxu1 %v8337_v56  ;;  %v8879_v32 = vld [vmem:[#allocation116_spill] sm:$0xff]  ;;  %v8880_v56 = vld [vmem:[#allocation117_spill] sm:$0xff] }
 0xaa0   : > { %4595 = vmatpush1.bf16.msra.mxu0 %v8338_v31  ;;  %4636 = vmatpush1.bf16.msra.mxu1 %v8339_v24  ;;  %v8881_v31 = vld [vmem:[#allocation118_spill] sm:$0xff]  ;;  %v8882_v24 = vld [vmem:[#allocation119_spill] sm:$0xff] }
 0xaa1   : > { %4596 = vmatprep.subr.bf16.mxu0 %v8340_v48  ;;  %4637 = vmatprep.subr.bf16.mxu1 %v8341_v15  ;;  %v8883_v48 = vld [vmem:[#allocation120_spill] sm:$0xff]  ;;  %v8884_v15 = vld [vmem:[#allocation121_spill] sm:$0xff] }
 0xaa4   : > { %4597 = vmatpush1.bf16.msra.mxu0 %v8342_v17  ;;  %4638 = vmatpush1.bf16.msra.mxu1 %v8343_v16  ;;  %v8885_v17 = vld [vmem:[#allocation122_spill] sm:$0xff]  ;;  %v8886_v16 = vld [vmem:[#allocation123_spill] sm:$0xff] }
 0xaa5   : > { %4598 = vmatprep.subr.bf16.mxu0 %v8344_v49  ;;  %4639 = vmatprep.subr.bf16.mxu1 %v8345_v11  ;;  %v8887_v49 = vld [vmem:[#allocation124_spill] sm:$0xff]  ;;  %v8888_v11 = vld [vmem:[#allocation125_spill] sm:$0xff] }
 0xaa8   : > { %4599 = vmatpush1.bf16.msra.mxu0 %v8346_v26  ;;  %4640 = vmatpush1.bf16.msra.mxu1 %v8427_v10  ;;  %v8889_v26 = vld [vmem:[#allocation126_spill] sm:$0xff]  ;;  %v8890_v10 = vld [vmem:[#allocation127_spill] sm:$0xff] }
 0xaa9   : > { %4600 = vmatprep.subr.bf16.mxu0 %v8428_v58  ;;  %4641 = vmatprep.subr.bf16.mxu1 %v8429_v46  ;;  %v8891_v58 = vld [vmem:[#allocation128_spill] sm:$0xff]  ;;  %v8892_v46 = vld [vmem:[#allocation129_spill] sm:$0xff] }
 0xaac   : > { %4601 = vmatpush1.bf16.msra.mxu0 %v8430_v52  ;;  %4642 = vmatpush1.bf16.msra.mxu1 %v8431_v59  ;;  %v8893_v52 = vld [vmem:[#allocation130_spill] sm:$0xff]  ;;  %v8894_v59 = vld [vmem:[#allocation131_spill] sm:$0xff] }
 0xaad   : > { %4602 = vmatprep.subr.bf16.mxu0 %v8432_v60  ;;  %4643 = vmatprep.subr.bf16.mxu1 %v8433_v53  ;;  %v8895_v60 = vld [vmem:[#allocation132_spill] sm:$0xff]  ;;  %v8896_v53 = vld [vmem:[#allocation133_spill] sm:$0xff] }
 0xab0   : > { %4603 = vmatpush1.bf16.msra.mxu0 %v8434_v27  ;;  %4644 = vmatpush1.bf16.msra.mxu1 %v8435_v22  ;;  %v8897_v27 = vld [vmem:[#allocation134_spill] sm:$0xff]  ;;  %v8898_v22 = vld [vmem:[#allocation135_spill] sm:$0xff] }
 0xab1   : > { %4604 = vmatprep.subr.bf16.mxu0 %v8436_v21  ;;  %4645 = vmatprep.subr.bf16.mxu1 %v8517_v63  ;;  %v8899_v21 = vld [vmem:[#allocation136_spill] sm:$0xff]  ;;  %v5949_v63 = vld [vmem:[%s7900_s4 + $0x18] sm:$0xff]  }
 0xab4   : > { %4605 = vmatpush1.bf16.msra.mxu0 %v8518_v20  ;;  %4646 = vmatpush1.bf16.msra.mxu1 %v8519_v40  ;;  %v5950_v20 = vld [vmem:[%s7900_s4 + $0x60] sm:$0xff]  }
 0xab5   : > { %4606 = vmatprep.subr.bf16.mxu0 %v8520_v55  ;;  %4647 = vmatprep.subr.bf16.mxu1 %v8521_v41  ;;  %v5951_v40 = vld [vmem:[%s7900_s4 + $0x20] sm:$0xff]   ;;  %v5952_v55 = vld [vmem:[%s7900_s4 + $0x68] sm:$0xff]  }
 0xab6   : > { %v5953_v41 = vld [vmem:[%s7900_s4 + $0x28] sm:$0xff]  }
 0xab8   : > { %4607 = vmatpush1.bf16.msra.mxu0 %v8522_v13  ;;  %4648 = vmatpush1.bf16.msra.mxu1 %v8523_v12  ;;  %v5954_v13 = vld [vmem:[%s7900_s4 + $0x70] sm:$0xff]  }
 0xab9   : > { %4608 = vmatprep.subr.bf16.mxu0 %v8444_v36  ;;  %4649 = vmatprep.subr.bf16.mxu1 %v8445_v35  ;;  %v5945_v36 = vld [vmem:[%s7900_s4 + $0x8] sm:$0xff]   ;;  %v5946_v35 = vld [vmem:[%s7900_s4 + $0x50] sm:$0xff]  }
 0xaba   : > { %v5955_v12 = vld [vmem:[%s7900_s4 + $0x30] sm:$0xff]  }
 0xabc   : > { %4609 = vmatpush1.bf16.msra.mxu0 %v8446_v44  ;;  %4650 = vmatpush1.bf16.msra.mxu1 %v8447_v45  ;;  %v5947_v44 = vld [vmem:[%s7900_s4 + $0x10] sm:$0xff]   ;;  %v5948_v45 = vld [vmem:[%s7900_s4 + $0x58] sm:$0xff]  }
 0xabd   : > { %4610 = vmatprep.subr.bf16.mxu0 %v8448_v29  ;;  %4651 = vmatprep.subr.bf16.mxu1 %v8449_v30  ;;  %v8900_v29 = vld [vmem:[#allocation137_spill] sm:$0xff]  ;;  %v5942_v30 = vld [vmem:[%s7900_s4 + $0x40] sm:$0xff]  }
 0xac0   : > { %4611 = vmatpush1.bf16.msra.mxu0 %v8450_v28  ;;  %4652 = vmatpush1.bf16.msra.mxu1 %v8451_v5  ;;  %v5943_v28 = vld [vmem:[%s7900_s4] sm:$0xff]   ;;  %v5944_v5 = vld [vmem:[%s7900_s4 + $0x48] sm:$0xff]  }
 0xac1   : > { %4612 = vmatprep.subr.bf16.mxu0 %v8877_v50  ;;  %4653 = vmatprep.subr.bf16.mxu1 %v8878_v0 }
 0xac4   : > { %4613 = vmatpush1.bf16.msra.mxu0 %v8879_v32  ;;  %4654 = vmatpush1.bf16.msra.mxu1 %v8880_v56 }
 0xac5   : > { %4614 = vmatprep.subr.bf16.mxu0 %v8881_v31  ;;  %4655 = vmatprep.subr.bf16.mxu1 %v8882_v24 }
 0xac8   : > { %4615 = vmatpush1.bf16.msra.mxu0 %v8883_v48  ;;  %4656 = vmatpush1.bf16.msra.mxu1 %v8884_v15 }
 0xac9   : > { %4616 = vmatprep.subr.bf16.mxu0 %v8885_v17  ;;  %4657 = vmatprep.subr.bf16.mxu1 %v8886_v16 }
 0xacc   : > { %4617 = vmatpush1.bf16.msra.mxu0 %v8887_v49  ;;  %4658 = vmatpush1.bf16.msra.mxu1 %v8888_v11 }
 0xacd   : > { %4618 = vmatprep.subr.bf16.mxu0 %v8889_v26  ;;  %4659 = vmatprep.subr.bf16.mxu1 %v8890_v10  ;;  %v4494_v26 = vld [vmem:[#allocation2 + $0x7] ss:$8 sm:$0xf] }
 0xace   : > { %v4495_v10 = vld [vmem:[#allocation2 + $0x7] ss:$8 sm:$0xf0] }
 0xad0   : > { %4619 = vmatpush1.bf16.msra.mxu0 %v8891_v58  ;;  %4660 = vmatpush1.bf16.msra.mxu1 %v8892_v46 }
 0xad1   : > { %4620 = vmatprep.subr.bf16.mxu0 %v8893_v52  ;;  %4661 = vmatprep.subr.bf16.mxu1 %v8894_v59  ;;  %v4496_v52 = vor.u32 %v4495_v10, %v4494_v26 }
 0xad4   : > { %4621 = vmatpush1.bf16.msra.mxu0 %v8895_v60  ;;  %4662 = vmatpush1.bf16.msra.mxu1 %v8896_v53 }
 0xad5   : > { %4622 = vmatprep.subr.bf16.mxu0 %v8897_v27  ;;  %4663 = vmatprep.subr.bf16.mxu1 %v8898_v22 }
 0xad8   : > { %4623 = vmatpush1.bf16.msra.mxu0 %v8899_v21  ;;  %4664 = vmatpush1.bf16.msra.mxu1 %v8900_v29 }
 0xad9   : > { %5534 = vmatprep.subr.bf16.mxu0 %v5942_v30  ;;  %5565 = vmatprep.subr.bf16.mxu1 %v6147_v25 }
 0xadb   : > { %4625 = vmatmul.mubr.bf16.vlgmr.msra.gmra.mrb[68].mxu0 %v7723_v39  ;;  %4666 = vmatmul.mubr.bf16.vlgmr.msra.gmra.mrb[68].mxu1 %v7723_v39 }
 0xadc   : > { %5535 = vmatpush3.bf16.msra.mxu0 %v5943_v28  ;;  %5566 = vmatpush3.bf16.msra.mxu1 %v5958_v18 }
 0xadd   : > { %5536 = vmatprep.subr.bf16.mxu0 %v5944_v5  ;;  %5567 = vmatprep.subr.bf16.mxu1 %v6147_v25 }
 0xade   : > { %5581 = vmatprep.mubr.msk.bf16.mxu1 %vm6148_vm7, %v6147_v25 }
 0xae0   : > { %5537 = vmatpush3.bf16.msra.mxu0 %v5945_v36  ;;  %5568 = vmatpush3.bf16.msra.mxu1 %v5959_v38 }
 0xae1   : > { %5538 = vmatprep.subr.bf16.mxu0 %v5946_v35  ;;  %5569 = vmatprep.subr.bf16.mxu1 %v6147_v25 }
 0xae4   : > { %5539 = vmatpush3.bf16.msra.mxu0 %v5947_v44  ;;  %5570 = vmatpush3.bf16.msra.mxu1 %v5960_v34 }
 0xae5   : > { %5540 = vmatprep.subr.bf16.mxu0 %v5948_v45  ;;  %5571 = vmatprep.subr.bf16.mxu1 %v6147_v25 }
 0xae8   : > { %5541 = vmatpush3.bf16.msra.mxu0 %v5949_v63  ;;  %5572 = vmatpush3.bf16.msra.mxu1 %v5961_v62 }
 0xae9   : > { %5542 = vmatprep.subr.bf16.mxu0 %v5950_v20  ;;  %5573 = vmatprep.subr.bf16.mxu1 %v6147_v25 }
 0xaec   : > { %5543 = vmatpush3.bf16.msra.mxu0 %v5951_v40  ;;  %5574 = vmatpush3.bf16.msra.mxu1 %v5962_v37 }
 0xaed   : > { %5544 = vmatprep.subr.bf16.mxu0 %v5952_v55  ;;  %5575 = vmatprep.subr.bf16.mxu1 %v6147_v25 }
 0xaf0   : > { %5545 = vmatpush3.bf16.msra.mxu0 %v5953_v41  ;;  %v5963_v41 = vld [vmem:[%s7902_s6 + $0x28] sm:$0xff]  }
 0xaf1   : > { %5546 = vmatprep.subr.bf16.mxu0 %v5954_v13  ;;  %5576 = vmatpush3.bf16.msra.mxu1 %v5963_v41  ;;  %v4798_v13 = vld [vmem:[%s7901_s5] sm:$0x1] }
 0xaf2   : > { %5577 = vmatprep.subr.bf16.mxu1 %v6147_v25 }
 0xaf4   : > { %5547 = vmatpush3.bf16.msra.mxu0 %v5955_v12 }
 0xaf5   : > { %5548 = vmatprep.subr.bf16.mxu0 %v5956_v54 }
 0xaf8   : > { %5549 = vmatpush3.bf16.msra.mxu0 %v5957_v1 }
 0xb6e   : > { %v4544_v14 = vpop.f32.mrb[64].mxu0  ;;  %v4585_v61 = vpop.f32.mrb[64].mxu1 }
 0xb6f   : > { %v4546_v9 = vpop.f32.mrb[65].mxu0  ;;  %v4587_v19 = vpop.f32.mrb[65].mxu1 }
 0xb70   : > { %v4682_v57 = vcombine.low %v4544_v14, %v4546_v9  ;;  %v4683_v6 = vcombine.low %v4585_v61, %v4587_v19  ;;  %v4548_v7 = vpop.f32.mrb[66].mxu0  ;;  %v4589_v2 = vpop.f32.mrb[66].mxu1 }
 0xb71   : > { %v4549_v43 = vpop.f32.mrb[67].mxu0  ;;  %v4590_v4 = vpop.f32.mrb[67].mxu1 }
 0xb72   : > { %v4692_v51 = vrot.slane %v4682_v57, %v6830_v47  ;;  %v4699_v42 = vrot.slane %v4683_v6, %v6830_v47  ;;  %v4955_v57 = vld [vmem:[%s7903_s7] sm:$0x1] }
 0xb74   : > { %v4714_v23 = vcombine.low %v4692_v51, %v4699_v42 }
 0xb76   : > { %v4722_v58 = vrot.slane %v4714_v23, %v6830_v47 }
 0xbae   : > { %v4626_v39 = vpop.f32.mrb[68].mxu0  ;;  %v4667_v50 = vpop.f32.mrb[68].mxu1 }
 0xbaf   : > { %v4628_v0 = vpop.f32.mrb[69].mxu0  ;;  %v4669_v32 = vpop.f32.mrb[69].mxu1 }
 0xbb0   : > { %v4684_v56 = vcombine.low %v4626_v39, %v4628_v0  ;;  %v4685_v31 = vcombine.low %v4667_v50, %v4669_v32  ;;  %v4630_v24 = vpop.f32.mrb[70].mxu0  ;;  %v4671_v48 = vpop.f32.mrb[70].mxu1 }
 0xbb1   : > { %v4631_v15 = vpop.f32.mrb[71].mxu0  ;;  %v4672_v17 = vpop.f32.mrb[71].mxu1 }
 0xbb2   : > { %v4706_v16 = vrot.slane %v4684_v56, %v6830_v47  ;;  %v4713_v49 = vrot.slane %v4685_v31, %v6830_v47 }
 0xbb4   : > { %v4715_v11 = vcombine.low %v4706_v16, %v4713_v49 }
 0xbb6   : > { %v4729_v46 = vrot.slane %v4715_v11, %v6830_v47 }
 0xbb8   : > { %v4730_v59 = vcombine.low %v4722_v58, %v4729_v46 }
 0xbba   : > { %v4732_v60 = vadd.f32 %v4730_v59, %v4496_v52 }
 0xbbc   : > { %v5507_v53 = vmul.f32 -1.442695, %v4732_v60  ;;  %v4740_v21 = vrot.slane %v4732_v60, 6 }
 0xbbe   : > { %6022 = vpow2.f32 %v5507_v53 }
 0xbc8   : > { %v6023_v27 = vpop.eup %6022 }
 0xbc9   : > { %v4736_v22 = vadd.f32 1.0, %v6023_v27 }
 0xbcb   : > { %6024 = vrcp.f32 %v4736_v22 }
 0xbcc   : > { %6026 = vtanh.f32 %v4740_v21 }
 0xbd5   : > { %v6025_v29 = vpop.eup %6024 }
 0xbd6   : > { %v4744_v30 = vrot.slane %v6025_v29, 2  ;;  %v6027_v28 = vpop.eup %6026  ;;  %v4750_v44 = vrot.slane %v6025_v29, 4 }
 0xbd7   : > { %v4747_v36 = vmul.f32 %v6027_v28, %v6025_v29 }
 0xbd8   : > { %v4746_v5 = vmul.f32 %v4744_v30, %v7718_v33  ;;  %v5964_v33 = vld [vmem:[%s7902_s6 + $0x30] sm:$0xff]  }
 0xbd9   : > { %5578 = vmatpush3.bf16.msra.mxu1 %v5964_v33 }
 0xbda   : > { %v4748_v35 = vadd.f32 %v4747_v36, %v4746_v5  ;;  %5579 = vmatprep.subr.bf16.mxu1 %v6147_v25 }
 0xbdc   : > { %6028 = vtanh.f32 %v4748_v35 }
 0xbe6   : > { %v6029_v47 = vpop.eup %6028 }
 0xbe7   : > { %v4752_v45 = vmul.f32 %v6029_v47, %v4750_v44 }
 0xbe9   : > { %v4761_v63 = vrot.slane %v4752_v45, %v6841_v8  ;;  %v4757_v20 = vrot.slane %v4752_v45, %v6843_v3  ;;  %v5965_v8 = vld [vmem:[%s7902_s6 + $0x38] sm:$0xff]  }
 0xbea   : > { %5580 = vmatpush3.bf16.msra.mxu1 %v5965_v8 }
 0xbeb   : > { %v4765_v40 = vpack.c.bf16 %v4761_v63, %v4761_v63  ;;  %v4764_v55 = vpack.c.bf16 %v4757_v20, %v4757_v20 }
 0xbed   : > { %4927 = vmatprep.mubr.bf16.mxu0 %v4765_v40 }
 0xbee   : > { %4928 = vmatmul.mubr.bf16.vlgmr.msra.gmra.mrb[72].mxu0 %v4764_v55 }
 0xcc1   : > { %v5550_v3 = vpop.f32.mrb[72].mxu0 }
 0xcc2   : > { %v5551_v12 = vpop.f32.mrb[73].mxu0 }
 0xcc3   : > { %v5552_v54 = vadd.f32 %v5551_v12, %v5550_v3  ;;  %v5553_v1 = vpop.f32.mrb[74].mxu0 }
 0xcc4   : > { %v5554_v14 = vpop.f32.mrb[75].mxu0 }
 0xcc5   : > { %v4930_v61 = vadd.f32 %v5552_v54, %v4798_v13 }
 0xcc7   : > { %vm4935_vm8 = vcmp.gt.f32.partialorder %v4930_v61, 0.0  ;;  %v4936_v18 = vmul.f32 0.01, %v4930_v61 }
 0xcc9   : > { %v4937_v9 = vsel %vm4935_vm8, %v4930_v61, %v4936_v18 }
 0xcca   : > { %v4938_v19 = vpack.c.bf16 %v4937_v9, %v4937_v9 }
 0xccc   : > { %5582 = vmatmul.mubr.bf16.vlgmr.msra.gmra.mrb[72].mxu1 %v4938_v19 }
 0xd9f   : > { %v5038_v25 = vpop.f32.mrb[72].mxu1 }
 0xda0   : > { %v5039_v6 = vadd.f32 %v5038_v25, %v4955_v57  ;;  %v5583_v7 = vpop.f32.mrb[73].mxu1 }
 0xda1   : > { %v5041_v2 = vpop.f32.mrb[74].mxu1 }
 0xda2   : > { %v5584_v38 = vpop.f32.mrb[75].mxu1  ;;  %v5058_v43 = vsel %vm5057_vm9, %v5039_v6, -inf  ;;  %v5045_v4 = vsel %vm5044_vm10, %v5039_v6, -inf }
 0xda3   : > { %5059 = vmax.xlane.f32.xlu0 %v5058_v43  ;;  %5046 = vmax.xlane.f32.xlu1 %v5045_v4 }
 0xe30   : > { %v5060_v51 = vpop.xlane.xlu0 %5059  ;;  %v5047_v62 = vpop.xlane.xlu1 %5046 }
 0xe31   : > { %v5061_v42 = vsub.f32 %v5039_v6, %v5060_v51  ;;  %v5048_v37 = vsub.f32 %v5039_v6, %v5047_v62 }
 0xe33   : > { %v5062_v23 = vmul.f32 1.442695, %v5061_v42  ;;  %v5049_v39 = vmul.f32 1.442695, %v5048_v37 }
 0xe35   : > { %6030 = vpow2.f32 %v5062_v23 }
 0xe36   : > { %6032 = vpow2.f32 %v5049_v39 }
 0xe3f   : > { %v6031_v34 = vpop.eup %6030 }
 0xe40   : > { %5065 = vrot.lane.b32.xlu0 %v6031_v34, %s6149_s24  ;;  %v6033_v32 = vpop.eup %6032 }
 0xe41   : > { %v5051_v56 = vsel %vm5044_vm10, %v6033_v32, 0.0 }
 0xeb2   : > { %v5066_v50 = vpop.permute.xlu0 %5065 }
 0xeb3   : > { %v5069_v0 = vsel %vm5068_vm11, %v5066_v50, 0.0 }
 0xeb4   : > { %5070 = vadd.xlane.f32.xlu1 %v5069_v0 }
 0xeb8   : > { %5052 = vadd.xlane.f32.xlu1 %v5051_v56 }
 0xf41   : > { %v5071_v31 = vpop.xlane.xlu1 %5070 }
 0xf42   : > { %6034 = vlog2.f32 %v5071_v31 }
 0xf45   : > { %v5053_v17 = vpop.xlane.xlu1 %5052 }
 0xf46   : > { %6036 = vlog2.f32 %v5053_v17 }
 0xf4c   : > { %v6035_v24 = vpop.eup %6034 }
 0xf4d   : > { %v5073_v48 = vmul.f32 0.6931472, %v6035_v24 }
 0xf4f   : > { %v5074_v15 = vsub.f32 %v5061_v42, %v5073_v48 }
 0xf50   : > { %v6037_v16 = vpop.eup %6036 }
 0xf51   : > { %5076 = vrot.lane.b32.xlu1 %v5074_v15, %s6150_s25  ;;  %v5055_v49 = vmul.f32 0.6931472, %v6037_v16 }
 0xf53   : > { %v5056_v11 = vsub.f32 %v5048_v37, %v5055_v49 }
 0xf55   : > { %v5080_v26 = vsel %vm5079_vm12, %v5056_v11, 0.0 }
 0xfc3   : > { %v5077_v10 = vpop.permute.xlu1 %5076 }
 0xfc4   : > { %v5082_v58 = vsel %vm5081_vm13, %v5080_v26, %v5077_v10 }
 0xfc5   : > { %v5084_v46 = vsel %vm5083_vm14, %v5082_v58, 0.0 }
 0xfc6   : > { %5086 = vst.msk [vmem:[%s345_s29] sm:$0x1] %vm5085_vm15, %v5084_v46 }
 0xfc7 PF: > { %s20_s27 = sadd.s32 1, %s6136_s27  }
 0xfc8   : > { %p17_p3 = scmp.ge.s32.totalorder %s20_s27, 6  }
 0xfca   :  { %19 = sbr.rel (!%p17_p3) target bundleno = 2 (0x2), region = 102 }
 0xfd1   :  { %5104 = vsyncpa [#allocation4], 1 }
 0xfd2   :  { %5106 = vsyncpa [#allocation4 + $0x1], 1 }
 0xfd3   :  { %5107 = vsyncpa [#allocation6], 1 }

</bundles_post_ra>
